<compile_context>
chip_gen: v6e
topology: v6e:2x2x1
jax: 0.10.0
libtpu: 0.0.40
codegen_flags: <defaults>
</compile_context>

<pallas_src>
import functools

import jax
import jax.numpy as jnp
from jax import lax
from jax.experimental import pallas as pl
from jax.experimental.pallas import tpu as pltpu

EPS = 1e-5     # PyTorch BatchNorm2d default
LANE = 128     # TPU lane width


def _round_up(x, m):
    return (x + m - 1) // m * m


def _chip_limits():
    """Returns (physical VMEM bytes, M-tile row cap).  Conservative fallback."""
    try:
        vmem_cap = int(pltpu.get_tpu_info().vmem_capacity_bytes)
    except Exception:
        vmem_cap = 64 * 2**20                      # assume the smallest (v7x)
    tile_cap = 512 if vmem_cap <= 64 * 2**20 else 1024
    return vmem_cap, tile_cap


def _pick_tile_m(m, hw, cap):
    """Largest multiple of 8 <= cap dividing m; fallback = one image (hw rows)."""
    t = (min(cap, m) // 8) * 8
    while t >= 8:
        if m % t == 0:
            return t
        t -= 8
    if hw % 8 == 0 and hw <= 8 * cap:
        return hw                                   # hw always divides m
    # TODO(synk): masked tail tiles for pathological M with no small divisor.
    return m


def _compiler_params(block_bytes, vmem_cap):
    limit = int(min(int(0.75 * vmem_cap), max(32 * 2**20, 2 * block_bytes)))
    return pltpu.CompilerParams(
        dimension_semantics=("parallel",),
        vmem_limit_bytes=limit,
    )


def _bn_scale_shift(stats, rows_per_tile, total_rows, gamma, beta):
    """Per-tile packed (sum | sumsq) partials -> per-channel BN scale/shift.

    Two-level (Chan) combine: per-tile mean-centered M2 first, then combine
    across tiles — numerically far better than global E[x^2]-E[x]^2 for
    post-ReLU activations with large means.
    """
    c = stats.shape[-1] // 2
    s_t = stats[:, 0, :c]
    sq_t = stats[:, 0, c:]
    mean_t = s_t / rows_per_tile
    m2_t = jnp.maximum(sq_t - rows_per_tile * mean_t * mean_t, 0.0)
    mean = jnp.sum(s_t, axis=0) / total_rows
    m2 = jnp.sum(m2_t, axis=0) + rows_per_tile * jnp.sum(
        jnp.square(mean_t - mean[None, :]), axis=0)
    var = jnp.maximum(m2 / total_rows, 0.0)         # biased variance (PyTorch BN)
    scale = gamma * lax.rsqrt(var + EPS)
    shift = beta - mean * scale
    return scale[None, :].astype(jnp.float32), shift[None, :].astype(jnp.float32)


# --------------------------- pass 1: conv1 (1x1) -----------------------------
def _conv1x1_stats_kernel(x_ref, w_ref, y_ref, st_ref):
    a = x_ref[...].astype(jnp.bfloat16)             # fp32 in, bf16 MXU operand
    y = jnp.dot(a, w_ref[...], preferred_element_type=jnp.float32)
    y_ref[...] = y.astype(y_ref.dtype)
    s = jnp.sum(y, axis=0, keepdims=True)
    sq = jnp.sum(y * y, axis=0, keepdims=True)
    st_ref[0] = jnp.concatenate([s, sq], axis=1)    # lane-dense (1, 2C) row


# ----------------- pass 2: bn1+relu -> conv2 (3x3, per image) ----------------
def _conv3x3_stats_kernel(w_img, y1_ref, w2_ref, sc_ref, sh_ref, y2_ref, st_ref):
    hw, c = y1_ref.shape

    # bn1 + relu on the whole image tile; halo handled below, no HBM pad.
    a = jnp.maximum(y1_ref[...].astype(jnp.float32) * sc_ref[...] + sh_ref[...], 0.0)
    a = a.astype(jnp.bfloat16)

    # Row (H) shifts in flat (hw, c) space: shift by w_img rows, zero edges.
    zr = jnp.zeros((w_img, c), jnp.bfloat16)
    dn = jnp.concatenate([zr, a[:-w_img]], axis=0)   # a[h-1]
    up = jnp.concatenate([a[w_img:], zr], axis=0)    # a[h+1]

    # Single big matmul: K = 3C (row taps), N = 3C (column taps).
    amat = jnp.concatenate([dn, a, up], axis=1)                       # (hw, 3C)
    cols = jnp.dot(amat, w2_ref[...], preferred_element_type=jnp.float32)
    c0, c1, c2 = cols[:, :c], cols[:, c:2 * c], cols[:, 2 * c:]

    # y2[h, w] = c0[h, w-1] + c1[h, w] + c2[h, w+1]   (zero outside the image)
    z1 = jnp.zeros((1, c), jnp.float32)
    left = jnp.concatenate([z1, c0[:-1]], axis=0)
    right = jnp.concatenate([c2[1:], z1], axis=0)
    wi = lax.broadcasted_iota(jnp.int32, (hw, 1), 0) % w_img
    left = jnp.where(wi == 0, 0.0, left)
    right = jnp.where(wi == w_img - 1, 0.0, right)
    y2 = left + c1 + right

    y2_ref[...] = y2.astype(y2_ref.dtype)
    s = jnp.sum(y2, axis=0, keepdims=True)
    sq = jnp.sum(y2 * y2, axis=0, keepdims=True)
    st_ref[0] = jnp.concatenate([s, sq], axis=1)


# --------------------- pass 3: bn2+relu -> conv3 (1x1) -----------------------
def _bnrelu_conv1x1_stats_kernel(x_ref, w_ref, sc_ref, sh_ref, y_ref, st_ref):
    a = jnp.maximum(x_ref[...].astype(jnp.float32) * sc_ref[...] + sh_ref[...], 0.0)
    y = jnp.dot(a.astype(jnp.bfloat16), w_ref[...], preferred_element_type=jnp.float32)
    y_ref[...] = y.astype(y_ref.dtype)
    s = jnp.sum(y, axis=0, keepdims=True)
    sq = jnp.sum(y * y, axis=0, keepdims=True)
    st_ref[0] = jnp.concatenate([s, sq], axis=1)


# -------------------- pass 4: bn3 + fp32 residual + relu ---------------------
def _bn_add_relu_kernel(y_ref, id_ref, sc_ref, sh_ref, o_ref):
    y = y_ref[...].astype(jnp.float32) * sc_ref[...] + sh_ref[...]
    o_ref[...] = jnp.maximum(y + id_ref[...], 0.0)


# --------------------------------- wrapper -----------------------------------
def bottleneck_forward_nhwc(x_nhwc, params):
    """Core NHWC path (no layout passes).  x_nhwc: (N, H, W, Cin) float32."""
    w1, g1, b1, w2, g2, b2, w3, g3, b3 = params
    n, h, w_dim, cin = x_nhwc.shape
    cmid = w1.shape[1]
    cout = w3.shape[1]
    assert cin == cout, "identity residual requires in_channel == out_channel*4"
    hw = h * w_dim
    m = n * hw
    assert hw % 8 == 0 or n == 1, "pass 2 needs H*W % 8 == 0 (or batch 1)"

    cio_p = _round_up(cin, LANE)       # identity path => cout_p == cio_p
    cmid_p = _round_up(cmid, LANE)
    cout_p = cio_p

    vmem_cap, tile_cap = _chip_limits()
    tm = _pick_tile_m(m, hw, tile_cap)
    nt = m // tm

    # fp32 activations + fp32 identity (no wrapper cast pass).  The channel pad
    # is a no-op for real ResNet-50 stages (C already a multiple of 128).
    x2d = jnp.pad(x_nhwc.reshape(m, cin), ((0, 0), (0, cio_p - cin)))

    w1p = jnp.pad(w1, ((0, cio_p - cin), (0, cmid_p - cmid))).astype(jnp.bfloat16)
    # 3x3 weight as one (3C, 3C) matrix: rows = (kh, cin), cols = (kw, cout).
    w2p = jnp.pad(w2, ((0, 0), (0, 0), (0, cmid_p - cmid), (0, cmid_p - cmid)))
    w2m = jnp.transpose(w2p, (0, 2, 1, 3)).reshape(3 * cmid_p, 3 * cmid_p)
    w2m = w2m.astype(jnp.bfloat16)
    w3p = jnp.pad(w3, ((0, cmid_p - cmid), (0, cout_p - cout))).astype(jnp.bfloat16)

    g1p = jnp.pad(g1.reshape(-1), (0, cmid_p - cmid)).astype(jnp.float32)
    b1p = jnp.pad(b1.reshape(-1), (0, cmid_p - cmid)).astype(jnp.float32)
    g2p = jnp.pad(g2.reshape(-1), (0, cmid_p - cmid)).astype(jnp.float32)
    b2p = jnp.pad(b2.reshape(-1), (0, cmid_p - cmid)).astype(jnp.float32)
    g3p = jnp.pad(g3.reshape(-1), (0, cout_p - cout)).astype(jnp.float32)
    b3p = jnp.pad(b3.reshape(-1), (0, cout_p - cout)).astype(jnp.float32)

    # ---- pass 1: conv1 (1x1) + per-tile BN1 partial stats ----
    blk = 2 * (tm * cio_p * 4 + tm * cmid_p * 2) + 2 * cio_p * cmid_p * 2 \
        + tm * cmid_p * 4
    y1, st1 = pl.pallas_call(
        _conv1x1_stats_kernel,
        grid=(nt,),
        in_specs=[pl.BlockSpec((tm, cio_p), lambda i: (i, 0)),
                  pl.BlockSpec((cio_p, cmid_p), lambda i: (0, 0))],
        out_specs=[pl.BlockSpec((tm, cmid_p), lambda i: (i, 0)),
                   pl.BlockSpec((1, 1, 2 * cmid_p), lambda i: (i, 0, 0))],
        out_shape=[jax.ShapeDtypeStruct((m, cmid_p), jnp.bfloat16),
                   jax.ShapeDtypeStruct((nt, 1, 2 * cmid_p), jnp.float32)],
        compiler_params=_compiler_params(blk, vmem_cap),
    )(x2d, w1p)
    sc1, sh1 = _bn_scale_shift(st1, tm, m, g1p, b1p)

    # ---- pass 2: bn1+relu -> conv2 (3x3) per image + BN2 partial stats ----
    blk = 2 * (2 * hw * cmid_p * 2) + 2 * (3 * cmid_p) * (3 * cmid_p) * 2 \
        + 40 * hw * cmid_p                       # include fp32/bf16 temporaries
    y2, st2 = pl.pallas_call(
        functools.partial(_conv3x3_stats_kernel, w_dim),
        grid=(n,),
        in_specs=[pl.BlockSpec((hw, cmid_p), lambda i: (i, 0)),
                  pl.BlockSpec((3 * cmid_p, 3 * cmid_p), lambda i: (0, 0)),
                  pl.BlockSpec((1, cmid_p), lambda i: (0, 0)),
                  pl.BlockSpec((1, cmid_p), lambda i: (0, 0))],
        out_specs=[pl.BlockSpec((hw, cmid_p), lambda i: (i, 0)),
                   pl.BlockSpec((1, 1, 2 * cmid_p), lambda i: (i, 0, 0))],
        out_shape=[jax.ShapeDtypeStruct((m, cmid_p), jnp.bfloat16),
                   jax.ShapeDtypeStruct((n, 1, 2 * cmid_p), jnp.float32)],
        compiler_params=_compiler_params(blk, vmem_cap),
    )(y1, w2m, sc1, sh1)
    sc2, sh2 = _bn_scale_shift(st2, hw, m, g2p, b2p)

    # ---- pass 3: bn2+relu -> conv3 (1x1) + BN3 partial stats ----
    blk = 2 * (tm * cmid_p * 2 + tm * cout_p * 2) + 2 * cmid_p * cout_p * 2 \
        + tm * (cmid_p + cout_p) * 4
    y3, st3 = pl.pallas_call(
        _bnrelu_conv1x1_stats_kernel,
        grid=(nt,),
        in_specs=[pl.BlockSpec((tm, cmid_p), lambda i: (i, 0)),
                  pl.BlockSpec((cmid_p, cout_p), lambda i: (0, 0)),
                  pl.BlockSpec((1, cmid_p), lambda i: (0, 0)),
                  pl.BlockSpec((1, cmid_p), lambda i: (0, 0))],
        out_specs=[pl.BlockSpec((tm, cout_p), lambda i: (i, 0)),
                   pl.BlockSpec((1, 1, 2 * cout_p), lambda i: (i, 0, 0))],
        out_shape=[jax.ShapeDtypeStruct((m, cout_p), jnp.bfloat16),
                   jax.ShapeDtypeStruct((nt, 1, 2 * cout_p), jnp.float32)],
        compiler_params=_compiler_params(blk, vmem_cap),
    )(y2, w3p, sc2, sh2)
    sc3, sh3 = _bn_scale_shift(st3, tm, m, g3p, b3p)

    # ---- pass 4: bn3 + streamed fp32 residual + relu ----
    blk = 2 * (tm * cout_p * 2 + tm * cout_p * 4 + tm * cout_p * 4)
    out2d = pl.pallas_call(
        _bn_add_relu_kernel,
        grid=(nt,),
        in_specs=[pl.BlockSpec((tm, cout_p), lambda i: (i, 0)),
                  pl.BlockSpec((tm, cout_p), lambda i: (i, 0)),
                  pl.BlockSpec((1, cout_p), lambda i: (0, 0)),
                  pl.BlockSpec((1, cout_p), lambda i: (0, 0))],
        out_specs=pl.BlockSpec((tm, cout_p), lambda i: (i, 0)),
        out_shape=jax.ShapeDtypeStruct((m, cout_p), jnp.float32),
        compiler_params=_compiler_params(blk, vmem_cap),
    )(y3, x2d, sc3, sh3)

    # No-op slice when cout is already a multiple of 128 (all real ResNet stages).
    return out2d[:, :cout].reshape(n, h, w_dim, cout)


def bottleneck_forward(x_nchw, params):
    """NCHW adapter for PyTorch-layout parity.  x_nchw: (N, Cin, H, W) float32."""
    # TODO(synk): in an NHWC pipeline call bottleneck_forward_nhwc directly and
    # skip both transposes (they are the only remaining wrapper layout passes).
    out_nhwc = bottleneck_forward_nhwc(jnp.transpose(x_nchw, (0, 2, 3, 1)), params)
    return jnp.transpose(out_nhwc, (0, 3, 1, 2))


# ----------------------------- pure-JAX reference ----------------------------
def bottleneck_reference(x_nchw, params):
    w1, g1, b1, w2, g2, b2, w3, g3, b3 = params
    x = jnp.transpose(x_nchw, (0, 2, 3, 1))  # NHWC

    def bn(y, g, b):
        mean = jnp.mean(y, axis=(0, 1, 2), keepdims=True)
        var = jnp.mean(jnp.square(y - mean), axis=(0, 1, 2), keepdims=True)
        return ((y - mean) * lax.rsqrt(var + EPS) * g.reshape(1, 1, 1, -1)
                + b.reshape(1, 1, 1, -1))

    y = jnp.einsum("nhwc,cd->nhwd", x, w1)
    y = jax.nn.relu(bn(y, g1, b1))
    y = lax.conv_general_dilated(y, w2, window_strides=(1, 1), padding="SAME",
                                 dimension_numbers=("NHWC", "HWIO", "NHWC"))
    y = jax.nn.relu(bn(y, g2, b2))
    y = jnp.einsum("nhwc,cd->nhwd", y, w3)
    y = jax.nn.relu(bn(y, g3, b3) + x)
    return jnp.transpose(y, (0, 3, 1, 2))


if __name__ == "__main__":
    # Shapes consistent with the module defaults: in_channel = out_channel * 4
    # so the identity branch (downsample=None) is shape-compatible.
    N, H, W = 2, 16, 16
    CMID = 4                    # out_channel
    COUT = CMID * 4             # expansion = 4
    CIN = COUT                  # = 16

    key = jax.random.PRNGKey(0)
    ks = jax.random.split(key, 10)
    x = jax.random.normal(ks[0], (N, CIN, H, W), jnp.float32)

    # PyTorch-equivalent layouts: conv1.weight (Cmid,Cin,1,1) -> w1=(Cin,Cmid);
    # conv2.weight (Cmid,Cmid,3,3) -> w2 in HWIO; conv3.weight -> w3=(Cmid,Cout).
    w1 = jax.random.normal(ks[1], (CIN, CMID), jnp.float32) * 0.2
    w2 = jax.random.normal(ks[2], (3, 3, CMID, CMID), jnp.float32) * 0.2
    w3 = jax.random.normal(ks[3], (CMID, COUT), jnp.float32) * 0.2
    g1 = 1.0 + 0.1 * jax.random.normal(ks[4], (CMID,), jnp.float32)
    b1 = 0.1 * jax.random.normal(ks[5], (CMID,), jnp.float32)
    g2 = 1.0 + 0.1 * jax.random.normal(ks[6], (CMID,), jnp.float32)
    b2 = 0.1 * jax.random.normal(ks[7], (CMID,), jnp.float32)
    g3 = 1.0 + 0.1 * jax.random.normal(ks[8], (COUT,), jnp.float32)
    b3 = 0.1 * jax.random.normal(ks[9], (COUT,), jnp.float32)
    params = (w1, g1, b1, w2, g2, b2, w3, g3, b3)

    out = jax.jit(bottleneck_forward)(x, params)
    out = jax.block_until_ready(out)

    ref = bottleneck_reference(x, params)
    assert out.shape == (N, COUT, H, W), out.shape
    err = float(jnp.max(jnp.abs(out - ref)))
    assert err < 1e-1, f"max abs error {err}"   # bf16 MXU operands vs f32 reference
    print("KERNEL_OK")
</pallas_src>

<mosaic_0001>
module attributes {stable_mosaic.version = 11 : i64} {
  func.func @_conv1x1_stats_kernel(%arg0: i32, %arg1: memref<512x128xf32, #tpu.memory_space<vmem>>, %arg2: memref<128x128xbf16, #tpu.memory_space<vmem>>, %arg3: memref<512x128xbf16, #tpu.memory_space<vmem>>, %arg4: memref<1x1x256xf32, #tpu.memory_space<vmem>>) attributes {dimension_semantics = [#tpu.dimension_semantics<parallel>], iteration_bounds = array<i64: 1>, scalar_prefetch = 0 : i64, scratch_operands = 0 : i64, tpu.core_type = #tpu.core_type<tc>, window_params = [{transform_indices = @transform_0, window_bounds = array<i64: 512, 128>}, {pipeline_mode = #tpu.pipeline_mode<synchronous>, transform_indices = @transform_1, window_bounds = array<i64: 128, 128>}, {transform_indices = @transform_2, window_bounds = array<i64: 512, 128>}, {transform_indices = @transform_3, window_bounds = array<i64: 1, 1, 256>}]} {
    %c0 = arith.constant 0 : index
    %c0_0 = arith.constant 0 : index
    %0 = vector.load %arg1[%c0, %c0_0] : memref<512x128xf32, #tpu.memory_space<vmem>>, vector<512x128xf32>
    %1 = arith.truncf %0 : vector<512x128xf32> to vector<512x128xbf16>
    %c0_1 = arith.constant 0 : index
    %c0_2 = arith.constant 0 : index
    %2 = vector.load %arg2[%c0_1, %c0_2] : memref<128x128xbf16, #tpu.memory_space<vmem>>, vector<128x128xbf16>
    %cst = arith.constant dense<0.000000e+00> : vector<512x128xf32>
    %3 = tpu.matmul %1, %2, %cst {dimension_numbers = #tpu.dot_dimension_numbers<[1], [0], [0], [1], [0, 0, 1, 1], [], []>} : vector<512x128xbf16>, vector<128x128xbf16>, vector<512x128xf32> -> vector<512x128xf32>
    %4 = arith.truncf %3 : vector<512x128xf32> to vector<512x128xbf16>
    %c0_3 = arith.constant 0 : index
    %c0_4 = arith.constant 0 : index
    %5 = vector.load %arg3[%c0_3, %c0_4] : memref<512x128xbf16, #tpu.memory_space<vmem>>, vector<512x128xbf16>
    tpu.vector_store %arg3[%c0_3, %c0_4], %4 {strides = array<i32>} : memref<512x128xbf16, #tpu.memory_space<vmem>>, vector<512x128xbf16>,
    %cst_5 = arith.constant dense<0.000000e+00> : vector<128xf32>
    %6 = vector.multi_reduction <add>, %3, %cst_5 [0] : vector<512x128xf32> to vector<128xf32>
    %7 = vector.shape_cast %6 : vector<128xf32> to vector<1x128xf32>
    %8 = arith.mulf %3, %3 : vector<512x128xf32>
    %cst_6 = arith.constant dense<0.000000e+00> : vector<128xf32>
    %9 = vector.multi_reduction <add>, %8, %cst_6 [0] : vector<512x128xf32> to vector<128xf32>
    %10 = vector.shape_cast %9 : vector<128xf32> to vector<1x128xf32>
    %11 = tpu.concatenate %7, %10 in 1 : vector<1x128xf32>, vector<1x128xf32> -> vector<1x256xf32>
    %c0_7 = arith.constant 0 : index
    %c0_8 = arith.constant 0 : index
    %c0_9 = arith.constant 0 : index
    %12 = vector.load %arg4[%c0_7, %c0_8, %c0_9] : memref<1x1x256xf32, #tpu.memory_space<vmem>>, vector<1x1x256xf32>
    %13 = vector.shape_cast %12 : vector<1x1x256xf32> to vector<1x256xf32>
    %14 = vector.shape_cast %11 : vector<1x256xf32> to vector<1x1x256xf32>
    tpu.vector_store %arg4[%c0_7, %c0_8, %c0_9], %14 {strides = array<i32>} : memref<1x1x256xf32, #tpu.memory_space<vmem>>, vector<1x1x256xf32>,
    return
  }
  func.func @transform_0(%arg0: i32) -> (i32, i32) {
    %c0_i32 = arith.constant 0 : i32
    %c0_i32_0 = arith.constant 0 : i32
    return %arg0, %c0_i32 : i32, i32
  }
  func.func @transform_1(%arg0: i32) -> (i32, i32) {
    %c0_i32 = arith.constant 0 : i32
    %c0_i32_0 = arith.constant 0 : i32
    %c0_i32_1 = arith.constant 0 : i32
    return %c0_i32, %c0_i32_0 : i32, i32
  }
  func.func @transform_2(%arg0: i32) -> (i32, i32) {
    %c0_i32 = arith.constant 0 : i32
    %c0_i32_0 = arith.constant 0 : i32
    return %arg0, %c0_i32 : i32, i32
  }
  func.func @transform_3(%arg0: i32) -> (i32, i32, i32) {
    %c0_i32 = arith.constant 0 : i32
    %c0_i32_0 = arith.constant 0 : i32
    %c0_i32_1 = arith.constant 0 : i32
    return %arg0, %c0_i32, %c0_i32_0 : i32, i32, i32
  }
}

module attributes {stable_mosaic.version = 11 : i64} {
  func.func @_conv3x3_stats_kernel(%arg0: i32, %arg1: memref<256x128xbf16, #tpu.memory_space<vmem>>, %arg2: memref<384x384xbf16, #tpu.memory_space<vmem>>, %arg3: memref<1x128xf32, #tpu.memory_space<vmem>>, %arg4: memref<1x128xf32, #tpu.memory_space<vmem>>, %arg5: memref<256x128xbf16, #tpu.memory_space<vmem>>, %arg6: memref<1x1x256xf32, #tpu.memory_space<vmem>>) attributes {dimension_semantics = [#tpu.dimension_semantics<parallel>], iteration_bounds = array<i64: 2>, scalar_prefetch = 0 : i64, scratch_operands = 0 : i64, tpu.core_type = #tpu.core_type<tc>, window_params = [{transform_indices = @transform_0, window_bounds = array<i64: 256, 128>}, {pipeline_mode = #tpu.pipeline_mode<synchronous>, transform_indices = @transform_1, window_bounds = array<i64: 384, 384>}, {pipeline_mode = #tpu.pipeline_mode<synchronous>, transform_indices = @transform_2, window_bounds = array<i64: 1, 128>}, {pipeline_mode = #tpu.pipeline_mode<synchronous>, transform_indices = @transform_3, window_bounds = array<i64: 1, 128>}, {transform_indices = @transform_4, window_bounds = array<i64: 256, 128>}, {transform_indices = @transform_5, window_bounds = array<i64: 1, 1, 256>}]} {
    %c0 = arith.constant 0 : index
    %c0_0 = arith.constant 0 : index
    %0 = vector.load %arg1[%c0, %c0_0] : memref<256x128xbf16, #tpu.memory_space<vmem>>, vector<256x128xbf16>
    %1 = arith.extf %0 : vector<256x128xbf16> to vector<256x128xf32>
    %c0_1 = arith.constant 0 : index
    %c0_2 = arith.constant 0 : index
    %2 = vector.load %arg3[%c0_1, %c0_2] : memref<1x128xf32, #tpu.memory_space<vmem>>, vector<1x128xf32>
    %3 = vector.broadcast %2 : vector<1x128xf32> to vector<256x128xf32>
    %4 = arith.mulf %1, %3 : vector<256x128xf32>
    %c0_3 = arith.constant 0 : index
    %c0_4 = arith.constant 0 : index
    %5 = vector.load %arg4[%c0_3, %c0_4] : memref<1x128xf32, #tpu.memory_space<vmem>>, vector<1x128xf32>
    %6 = vector.broadcast %5 : vector<1x128xf32> to vector<256x128xf32>
    %7 = arith.addf %4, %6 : vector<256x128xf32>
    %cst = arith.constant 0.000000e+00 : f32
    %8 = vector.broadcast %cst : f32 to vector<256x128xf32>
    %9 = arith.maximumf %7, %8 : vector<256x128xf32>
    %10 = arith.truncf %9 : vector<256x128xf32> to vector<256x128xbf16>
    %cst_5 = arith.constant 0.000000e+00 : bf16
    %11 = vector.broadcast %cst_5 : bf16 to vector<16x128xbf16>
    %12 = vector.extract_strided_slice %10 {offsets = [0, 0], sizes = [240, 128], strides = [1, 1]} : vector<256x128xbf16> to vector<240x128xbf16>
    %13 = tpu.concatenate %11, %12 in 0 : vector<16x128xbf16>, vector<240x128xbf16> -> vector<256x128xbf16>
    %14 = vector.extract_strided_slice %10 {offsets = [16, 0], sizes = [240, 128], strides = [1, 1]} : vector<256x128xbf16> to vector<240x128xbf16>
    %15 = tpu.concatenate %14, %11 in 0 : vector<240x128xbf16>, vector<16x128xbf16> -> vector<256x128xbf16>
    %16 = tpu.concatenate %13, %10, %15 in 1 : vector<256x128xbf16>, vector<256x128xbf16>, vector<256x128xbf16> -> vector<256x384xbf16>
    %c0_6 = arith.constant 0 : index
    %c0_7 = arith.constant 0 : index
    %17 = vector.load %arg2[%c0_6, %c0_7] : memref<384x384xbf16, #tpu.memory_space<vmem>>, vector<384x384xbf16>
    %cst_8 = arith.constant dense<0.000000e+00> : vector<256x384xf32>
    %18 = tpu.matmul %16, %17, %cst_8 {dimension_numbers = #tpu.dot_dimension_numbers<[1], [0], [0], [1], [0, 0, 1, 1], [], []>} : vector<256x384xbf16>, vector<384x384xbf16>, vector<256x384xf32> -> vector<256x384xf32>
    %19 = vector.extract_strided_slice %18 {offsets = [0, 0], sizes = [256, 128], strides = [1, 1]} : vector<256x384xf32> to vector<256x128xf32>
    %20 = vector.extract_strided_slice %18 {offsets = [0, 128], sizes = [256, 128], strides = [1, 1]} : vector<256x384xf32> to vector<256x128xf32>
    %21 = vector.extract_strided_slice %18 {offsets = [0, 256], sizes = [256, 128], strides = [1, 1]} : vector<256x384xf32> to vector<256x128xf32>
    %cst_9 = arith.constant 0.000000e+00 : f32
    %22 = vector.broadcast %cst_9 : f32 to vector<1x128xf32>
    %23 = vector.extract_strided_slice %19 {offsets = [0, 0], sizes = [255, 128], strides = [1, 1]} : vector<256x128xf32> to vector<255x128xf32>
    %24 = tpu.concatenate %22, %23 in 0 : vector<1x128xf32>, vector<255x128xf32> -> vector<256x128xf32>
    %25 = vector.extract_strided_slice %21 {offsets = [1, 0], sizes = [255, 128], strides = [1, 1]} : vector<256x128xf32> to vector<255x128xf32>
    %26 = tpu.concatenate %25, %22 in 0 : vector<255x128xf32>, vector<1x128xf32> -> vector<256x128xf32>
    %27 = tpu.iota {dimensions = array<i32: 0>} : vector<256x1xi32>
    %c16_i32 = arith.constant 16 : i32
    %c0_i32 = arith.constant 0 : i32
    %28 = arith.cmpi eq, %c16_i32, %c0_i32 : i32
    %c1_i32 = arith.constant 1 : i32
    %29 = arith.select %28, %c1_i32, %c16_i32 : i32
    %30 = vector.broadcast %29 : i32 to vector<256x1xi32>
    %31 = arith.remsi %27, %30 : vector<256x1xi32>
    %c0_i32_10 = arith.constant 0 : i32
    %32 = vector.broadcast %c0_i32_10 : i32 to vector<256x1xi32>
    %33 = arith.cmpi ne, %31, %32 : vector<256x1xi32>
    %c0_i32_11 = arith.constant 0 : i32
    %34 = vector.broadcast %c0_i32_11 : i32 to vector<256x1xi32>
    %35 = arith.cmpi slt, %31, %34 : vector<256x1xi32>
    %c0_i32_12 = arith.constant 0 : i32
    %36 = arith.cmpi slt, %29, %c0_i32_12 : i32
    %37 = vector.broadcast %36 : i1 to vector<256x1xi1>
    %38 = vector.broadcast %37 : vector<256x1xi1> to vector<256x1xi1>
    %39 = arith.xori %35, %38 : vector<256x1xi1>
    %40 = arith.andi %39, %33 : vector<256x1xi1>
    %41 = vector.broadcast %29 : i32 to vector<256x1xi32>
    %42 = arith.addi %31, %41 : vector<256x1xi32>
    %43 = arith.select %40, %42, %31 : vector<256x1xi1>, vector<256x1xi32>
    %c0_i32_13 = arith.constant 0 : i32
    %44 = vector.broadcast %c0_i32_13 : i32 to vector<256x1xi32>
    %45 = arith.cmpi eq, %43, %44 : vector<256x1xi32>
    %cst_14 = arith.constant 0.000000e+00 : f32
    %46 = vector.shape_cast %45 : vector<256x1xi1> to vector<256x1xi1>
    %47 = vector.broadcast %46 : vector<256x1xi1> to vector<256x128xi1>
    %48 = vector.broadcast %cst_14 : f32 to vector<256x128xf32>
    %49 = arith.select %47, %48, %24 : vector<256x128xi1>, vector<256x128xf32>
    %c15_i32 = arith.constant 15 : i32
    %50 = vector.broadcast %c15_i32 : i32 to vector<256x1xi32>
    %51 = arith.cmpi eq, %43, %50 : vector<256x1xi32>
    %cst_15 = arith.constant 0.000000e+00 : f32
    %52 = vector.shape_cast %51 : vector<256x1xi1> to vector<256x1xi1>
    %53 = vector.broadcast %52 : vector<256x1xi1> to vector<256x128xi1>
    %54 = vector.broadcast %cst_15 : f32 to vector<256x128xf32>
    %55 = arith.select %53, %54, %26 : vector<256x128xi1>, vector<256x128xf32>
    %56 = arith.addf %49, %20 : vector<256x128xf32>
    %57 = arith.addf %56, %55 : vector<256x128xf32>
    %58 = arith.truncf %57 : vector<256x128xf32> to vector<256x128xbf16>
    %c0_16 = arith.constant 0 : index
    %c0_17 = arith.constant 0 : index
    %59 = vector.load %arg5[%c0_16, %c0_17] : memref<256x128xbf16, #tpu.memory_space<vmem>>, vector<256x128xbf16>
    tpu.vector_store %arg5[%c0_16, %c0_17], %58 {strides = array<i32>} : memref<256x128xbf16, #tpu.memory_space<vmem>>, vector<256x128xbf16>,
    %cst_18 = arith.constant dense<0.000000e+00> : vector<128xf32>
    %60 = vector.multi_reduction <add>, %57, %cst_18 [0] : vector<256x128xf32> to vector<128xf32>
    %61 = vector.shape_cast %60 : vector<128xf32> to vector<1x128xf32>
    %62 = arith.mulf %57, %57 : vector<256x128xf32>
    %cst_19 = arith.constant dense<0.000000e+00> : vector<128xf32>
    %63 = vector.multi_reduction <add>, %62, %cst_19 [0] : vector<256x128xf32> to vector<128xf32>
    %64 = vector.shape_cast %63 : vector<128xf32> to vector<1x128xf32>
    %65 = tpu.concatenate %61, %64 in 1 : vector<1x128xf32>, vector<1x128xf32> -> vector<1x256xf32>
    %c0_20 = arith.constant 0 : index
    %c0_21 = arith.constant 0 : index
    %c0_22 = arith.constant 0 : index
    %66 = vector.load %arg6[%c0_20, %c0_21, %c0_22] : memref<1x1x256xf32, #tpu.memory_space<vmem>>, vector<1x1x256xf32>
    %67 = vector.shape_cast %66 : vector<1x1x256xf32> to vector<1x256xf32>
    %68 = vector.shape_cast %65 : vector<1x256xf32> to vector<1x1x256xf32>
    tpu.vector_store %arg6[%c0_20, %c0_21, %c0_22], %68 {strides = array<i32>} : memref<1x1x256xf32, #tpu.memory_space<vmem>>, vector<1x1x256xf32>,
    return
  }
  func.func @transform_0(%arg0: i32) -> (i32, i32) {
    %c0_i32 = arith.constant 0 : i32
    %c0_i32_0 = arith.constant 0 : i32
    return %arg0, %c0_i32 : i32, i32
  }
  func.func @transform_1(%arg0: i32) -> (i32, i32) {
    %c0_i32 = arith.constant 0 : i32
    %c0_i32_0 = arith.constant 0 : i32
    %c0_i32_1 = arith.constant 0 : i32
    return %c0_i32, %c0_i32_0 : i32, i32
  }
  func.func @transform_2(%arg0: i32) -> (i32, i32) {
    %c0_i32 = arith.constant 0 : i32
    %c0_i32_0 = arith.constant 0 : i32
    %c0_i32_1 = arith.constant 0 : i32
    return %c0_i32, %c0_i32_0 : i32, i32
  }
  func.func @transform_3(%arg0: i32) -> (i32, i32) {
    %c0_i32 = arith.constant 0 : i32
    %c0_i32_0 = arith.constant 0 : i32
    %c0_i32_1 = arith.constant 0 : i32
    return %c0_i32, %c0_i32_0 : i32, i32
  }
  func.func @transform_4(%arg0: i32) -> (i32, i32) {
    %c0_i32 = arith.constant 0 : i32
    %c0_i32_0 = arith.constant 0 : i32
    return %arg0, %c0_i32 : i32, i32
  }
  func.func @transform_5(%arg0: i32) -> (i32, i32, i32) {
    %c0_i32 = arith.constant 0 : i32
    %c0_i32_0 = arith.constant 0 : i32
    %c0_i32_1 = arith.constant 0 : i32
    return %arg0, %c0_i32, %c0_i32_0 : i32, i32, i32
  }
}

module attributes {stable_mosaic.version = 11 : i64} {
  func.func @_bnrelu_conv1x1_stats_kernel(%arg0: i32, %arg1: memref<512x128xbf16, #tpu.memory_space<vmem>>, %arg2: memref<128x128xbf16, #tpu.memory_space<vmem>>, %arg3: memref<1x128xf32, #tpu.memory_space<vmem>>, %arg4: memref<1x128xf32, #tpu.memory_space<vmem>>, %arg5: memref<512x128xbf16, #tpu.memory_space<vmem>>, %arg6: memref<1x1x256xf32, #tpu.memory_space<vmem>>) attributes {dimension_semantics = [#tpu.dimension_semantics<parallel>], iteration_bounds = array<i64: 1>, scalar_prefetch = 0 : i64, scratch_operands = 0 : i64, tpu.core_type = #tpu.core_type<tc>, window_params = [{transform_indices = @transform_0, window_bounds = array<i64: 512, 128>}, {pipeline_mode = #tpu.pipeline_mode<synchronous>, transform_indices = @transform_1, window_bounds = array<i64: 128, 128>}, {pipeline_mode = #tpu.pipeline_mode<synchronous>, transform_indices = @transform_2, window_bounds = array<i64: 1, 128>}, {pipeline_mode = #tpu.pipeline_mode<synchronous>, transform_indices = @transform_3, window_bounds = array<i64: 1, 128>}, {transform_indices = @transform_4, window_bounds = array<i64: 512, 128>}, {transform_indices = @transform_5, window_bounds = array<i64: 1, 1, 256>}]} {
    %c0 = arith.constant 0 : index
    %c0_0 = arith.constant 0 : index
    %0 = vector.load %arg1[%c0, %c0_0] : memref<512x128xbf16, #tpu.memory_space<vmem>>, vector<512x128xbf16>
    %1 = arith.extf %0 : vector<512x128xbf16> to vector<512x128xf32>
    %c0_1 = arith.constant 0 : index
    %c0_2 = arith.constant 0 : index
    %2 = vector.load %arg3[%c0_1, %c0_2] : memref<1x128xf32, #tpu.memory_space<vmem>>, vector<1x128xf32>
    %3 = vector.broadcast %2 : vector<1x128xf32> to vector<512x128xf32>
    %4 = arith.mulf %1, %3 : vector<512x128xf32>
    %c0_3 = arith.constant 0 : index
    %c0_4 = arith.constant 0 : index
    %5 = vector.load %arg4[%c0_3, %c0_4] : memref<1x128xf32, #tpu.memory_space<vmem>>, vector<1x128xf32>
    %6 = vector.broadcast %5 : vector<1x128xf32> to vector<512x128xf32>
    %7 = arith.addf %4, %6 : vector<512x128xf32>
    %cst = arith.constant 0.000000e+00 : f32
    %8 = vector.broadcast %cst : f32 to vector<512x128xf32>
    %9 = arith.maximumf %7, %8 : vector<512x128xf32>
    %10 = arith.truncf %9 : vector<512x128xf32> to vector<512x128xbf16>
    %c0_5 = arith.constant 0 : index
    %c0_6 = arith.constant 0 : index
    %11 = vector.load %arg2[%c0_5, %c0_6] : memref<128x128xbf16, #tpu.memory_space<vmem>>, vector<128x128xbf16>
    %cst_7 = arith.constant dense<0.000000e+00> : vector<512x128xf32>
    %12 = tpu.matmul %10, %11, %cst_7 {dimension_numbers = #tpu.dot_dimension_numbers<[1], [0], [0], [1], [0, 0, 1, 1], [], []>} : vector<512x128xbf16>, vector<128x128xbf16>, vector<512x128xf32> -> vector<512x128xf32>
    %13 = arith.truncf %12 : vector<512x128xf32> to vector<512x128xbf16>
    %c0_8 = arith.constant 0 : index
    %c0_9 = arith.constant 0 : index
    %14 = vector.load %arg5[%c0_8, %c0_9] : memref<512x128xbf16, #tpu.memory_space<vmem>>, vector<512x128xbf16>
    tpu.vector_store %arg5[%c0_8, %c0_9], %13 {strides = array<i32>} : memref<512x128xbf16, #tpu.memory_space<vmem>>, vector<512x128xbf16>,
    %cst_10 = arith.constant dense<0.000000e+00> : vector<128xf32>
    %15 = vector.multi_reduction <add>, %12, %cst_10 [0] : vector<512x128xf32> to vector<128xf32>
    %16 = vector.shape_cast %15 : vector<128xf32> to vector<1x128xf32>
    %17 = arith.mulf %12, %12 : vector<512x128xf32>
    %cst_11 = arith.constant dense<0.000000e+00> : vector<128xf32>
    %18 = vector.multi_reduction <add>, %17, %cst_11 [0] : vector<512x128xf32> to vector<128xf32>
    %19 = vector.shape_cast %18 : vector<128xf32> to vector<1x128xf32>
    %20 = tpu.concatenate %16, %19 in 1 : vector<1x128xf32>, vector<1x128xf32> -> vector<1x256xf32>
    %c0_12 = arith.constant 0 : index
    %c0_13 = arith.constant 0 : index
    %c0_14 = arith.constant 0 : index
    %21 = vector.load %arg6[%c0_12, %c0_13, %c0_14] : memref<1x1x256xf32, #tpu.memory_space<vmem>>, vector<1x1x256xf32>
    %22 = vector.shape_cast %21 : vector<1x1x256xf32> to vector<1x256xf32>
    %23 = vector.shape_cast %20 : vector<1x256xf32> to vector<1x1x256xf32>
    tpu.vector_store %arg6[%c0_12, %c0_13, %c0_14], %23 {strides = array<i32>} : memref<1x1x256xf32, #tpu.memory_space<vmem>>, vector<1x1x256xf32>,
    return
  }
  func.func @transform_0(%arg0: i32) -> (i32, i32) {
    %c0_i32 = arith.constant 0 : i32
    %c0_i32_0 = arith.constant 0 : i32
    return %arg0, %c0_i32 : i32, i32
  }
  func.func @transform_1(%arg0: i32) -> (i32, i32) {
    %c0_i32 = arith.constant 0 : i32
    %c0_i32_0 = arith.constant 0 : i32
    %c0_i32_1 = arith.constant 0 : i32
    return %c0_i32, %c0_i32_0 : i32, i32
  }
  func.func @transform_2(%arg0: i32) -> (i32, i32) {
    %c0_i32 = arith.constant 0 : i32
    %c0_i32_0 = arith.constant 0 : i32
    %c0_i32_1 = arith.constant 0 : i32
    return %c0_i32, %c0_i32_0 : i32, i32
  }
  func.func @transform_3(%arg0: i32) -> (i32, i32) {
    %c0_i32 = arith.constant 0 : i32
    %c0_i32_0 = arith.constant 0 : i32
    %c0_i32_1 = arith.constant 0 : i32
    return %c0_i32, %c0_i32_0 : i32, i32
  }
  func.func @transform_4(%arg0: i32) -> (i32, i32) {
    %c0_i32 = arith.constant 0 : i32
    %c0_i32_0 = arith.constant 0 : i32
    return %arg0, %c0_i32 : i32, i32
  }
  func.func @transform_5(%arg0: i32) -> (i32, i32, i32) {
    %c0_i32 = arith.constant 0 : i32
    %c0_i32_0 = arith.constant 0 : i32
    %c0_i32_1 = arith.constant 0 : i32
    return %arg0, %c0_i32, %c0_i32_0 : i32, i32, i32
  }
}

module attributes {stable_mosaic.version = 11 : i64} {
  func.func @_bn_add_relu_kernel(%arg0: i32, %arg1: memref<512x128xbf16, #tpu.memory_space<vmem>>, %arg2: memref<512x128xf32, #tpu.memory_space<vmem>>, %arg3: memref<1x128xf32, #tpu.memory_space<vmem>>, %arg4: memref<1x128xf32, #tpu.memory_space<vmem>>, %arg5: memref<512x128xf32, #tpu.memory_space<vmem>>) attributes {dimension_semantics = [#tpu.dimension_semantics<parallel>], iteration_bounds = array<i64: 1>, scalar_prefetch = 0 : i64, scratch_operands = 0 : i64, tpu.core_type = #tpu.core_type<tc>, window_params = [{transform_indices = @transform_0, window_bounds = array<i64: 512, 128>}, {transform_indices = @transform_1, window_bounds = array<i64: 512, 128>}, {pipeline_mode = #tpu.pipeline_mode<synchronous>, transform_indices = @transform_2, window_bounds = array<i64: 1, 128>}, {pipeline_mode = #tpu.pipeline_mode<synchronous>, transform_indices = @transform_3, window_bounds = array<i64: 1, 128>}, {transform_indices = @transform_4, window_bounds = array<i64: 512, 128>}]} {
    %c0 = arith.constant 0 : index
    %c0_0 = arith.constant 0 : index
    %0 = vector.load %arg1[%c0, %c0_0] : memref<512x128xbf16, #tpu.memory_space<vmem>>, vector<512x128xbf16>
    %1 = arith.extf %0 : vector<512x128xbf16> to vector<512x128xf32>
    %c0_1 = arith.constant 0 : index
    %c0_2 = arith.constant 0 : index
    %2 = vector.load %arg3[%c0_1, %c0_2] : memref<1x128xf32, #tpu.memory_space<vmem>>, vector<1x128xf32>
    %3 = vector.broadcast %2 : vector<1x128xf32> to vector<512x128xf32>
    %4 = arith.mulf %1, %3 : vector<512x128xf32>
    %c0_3 = arith.constant 0 : index
    %c0_4 = arith.constant 0 : index
    %5 = vector.load %arg4[%c0_3, %c0_4] : memref<1x128xf32, #tpu.memory_space<vmem>>, vector<1x128xf32>
    %6 = vector.broadcast %5 : vector<1x128xf32> to vector<512x128xf32>
    %7 = arith.addf %4, %6 : vector<512x128xf32>
    %c0_5 = arith.constant 0 : index
    %c0_6 = arith.constant 0 : index
    %8 = vector.load %arg2[%c0_5, %c0_6] : memref<512x128xf32, #tpu.memory_space<vmem>>, vector<512x128xf32>
    %9 = arith.addf %7, %8 : vector<512x128xf32>
    %cst = arith.constant 0.000000e+00 : f32
    %10 = vector.broadcast %cst : f32 to vector<512x128xf32>
    %11 = arith.maximumf %9, %10 : vector<512x128xf32>
    %c0_7 = arith.constant 0 : index
    %c0_8 = arith.constant 0 : index
    %12 = vector.load %arg5[%c0_7, %c0_8] : memref<512x128xf32, #tpu.memory_space<vmem>>, vector<512x128xf32>
    tpu.vector_store %arg5[%c0_7, %c0_8], %11 {strides = array<i32>} : memref<512x128xf32, #tpu.memory_space<vmem>>, vector<512x128xf32>,
    return
  }
  func.func @transform_0(%arg0: i32) -> (i32, i32) {
    %c0_i32 = arith.constant 0 : i32
    %c0_i32_0 = arith.constant 0 : i32
    return %arg0, %c0_i32 : i32, i32
  }
  func.func @transform_1(%arg0: i32) -> (i32, i32) {
    %c0_i32 = arith.constant 0 : i32
    %c0_i32_0 = arith.constant 0 : i32
    return %arg0, %c0_i32 : i32, i32
  }
  func.func @transform_2(%arg0: i32) -> (i32, i32) {
    %c0_i32 = arith.constant 0 : i32
    %c0_i32_0 = arith.constant 0 : i32
    %c0_i32_1 = arith.constant 0 : i32
    return %c0_i32, %c0_i32_0 : i32, i32
  }
  func.func @transform_3(%arg0: i32) -> (i32, i32) {
    %c0_i32 = arith.constant 0 : i32
    %c0_i32_0 = arith.constant 0 : i32
    %c0_i32_1 = arith.constant 0 : i32
    return %c0_i32, %c0_i32_0 : i32, i32
  }
  func.func @transform_4(%arg0: i32) -> (i32, i32) {
    %c0_i32 = arith.constant 0 : i32
    %c0_i32_0 = arith.constant 0 : i32
    return %arg0, %c0_i32 : i32, i32
  }
}

</mosaic_0001>

<bundles_post_ra>
// kernel: bottleneck_forward.4
= control target key start
LH: loop header
LB: loop body
LE: loop exit
PB: predicated region body
PF: predicated region fallthrough
CT: control target
= control target key end

     0   :  { %s2016_s1 = inlined_call_operand.vmem [shape: bf16[128,128], index: 1, kind: input, shape index: {}]   ;;  %s2017_s0 = inlined_call_operand.vmem [shape: f32[512,128], index: 0, kind: input, shape index: {}]   ;;  %s2018_s2 = inlined_call_operand.vmem [shape: bf16[512,128], index: 2, kind: output, shape index: {0}]   ;;  %s2019_s3 = inlined_call_operand.vmem [shape: f32[1,1,256], index: 3, kind: output, shape index: {1}]  }
   0x1   :  { %v1480_v0 = vld [vmem:[%s2016_s1 + $0x38] sm:$0xff]   ;;  %v1481_v1 = vld [vmem:[%s2016_s1 + $0x30] sm:$0xff]   ;;  %v1482_v2 = vld [vmem:[%s2016_s1 + $0x28] sm:$0xff]  }
   0x2   :  { %1383 = vmatprep.subr.bf16.mxu0 %v1480_v0  ;;  %1463 = vmatprep.subr.bf16.mxu1 %v1480_v0  ;;  %v1483_v3 = vld [vmem:[%s2016_s1 + $0x20] sm:$0xff]   ;;  %v15_v5 = vld [vmem:[%s2017_s0 + $0x8] sm:$0xff]  ;;  %v1484_v7 = vld [vmem:[%s2016_s1 + $0x18] sm:$0xff]  }
   0x3   :  { %1384 = vmatpush3.bf16.msra.mxu0 %v1480_v0  ;;  %1471 = vmatpush3.bf16.msra.mxu1 %v1480_v0  ;;  %v14_v4 = vld [vmem:[%s2017_s0] sm:$0xff]  ;;  %v1485_v8 = vld [vmem:[%s2016_s1 + $0x10] sm:$0xff]   ;;  %v47_v10 = vld [vmem:[%s2017_s0 + $0x108] sm:$0xff] }
   0x4   :  { %1385 = vmatprep.subr.bf16.mxu0 %v1481_v1  ;;  %1464 = vmatprep.subr.bf16.mxu1 %v1481_v1  ;;  %v78_v6 = vpack.c.bf16 %v15_v5, %v14_v4  ;;  %v46_v9 = vld [vmem:[%s2017_s0 + $0x100] sm:$0xff]  ;;  %v1486_v11 = vld [vmem:[%s2016_s1 + $0x8] sm:$0xff]   ;;  %v16_v14 = vld [vmem:[%s2017_s0 + $0x10] sm:$0xff] }
   0x5   :  { %v94_v12 = vpack.c.bf16 %v47_v10, %v46_v9  ;;  %v1487_v13 = vld [vmem:[%s2016_s1] sm:$0xff]   ;;  %v17_v15 = vld [vmem:[%s2017_s0 + $0x18] sm:$0xff]  ;;  %v19_v17 = vld [vmem:[%s2017_s0 + $0x28] sm:$0xff] }
   0x6   :  { %1399 = vmatprep.mubr.bf16.mxu0 %v78_v6  ;;  %v18_v16 = vld [vmem:[%s2017_s0 + $0x20] sm:$0xff]  ;;  %v48_v18 = vld [vmem:[%s2017_s0 + $0x110] sm:$0xff]  ;;  %v49_v19 = vld [vmem:[%s2017_s0 + $0x118] sm:$0xff]  ;;  %v79_v22 = vpack.c.bf16 %v17_v15, %v16_v14 }
   0x7   :  { %1386 = vmatpush3.bf16.msra.mxu0 %v1481_v1  ;;  %1472 = vmatpush3.bf16.msra.mxu1 %v1481_v1  ;;  %v50_v20 = vld [vmem:[%s2017_s0 + $0x120] sm:$0xff]  ;;  %v51_v21 = vld [vmem:[%s2017_s0 + $0x128] sm:$0xff]  ;;  %v80_v23 = vpack.c.bf16 %v19_v17, %v18_v16  ;;  %v95_v24 = vpack.c.bf16 %v49_v19, %v48_v18  ;;  %v20_v26 = vld [vmem:[%s2017_s0 + $0x30] sm:$0xff] }
   0x8   :  { %1387 = vmatprep.subr.bf16.mxu0 %v1482_v2  ;;  %1465 = vmatprep.subr.bf16.mxu1 %v1482_v2  ;;  %v96_v25 = vpack.c.bf16 %v51_v21, %v50_v20  ;;  %v21_v27 = vld [vmem:[%s2017_s0 + $0x38] sm:$0xff]  ;;  %v22_v28 = vld [vmem:[%s2017_s0 + $0x40] sm:$0xff]  ;;  %v23_v29 = vld [vmem:[%s2017_s0 + $0x48] sm:$0xff] }
   0x9   :  { %1431 = vmatprep.mubr.bf16.mxu1 %v94_v12  ;;  %v52_v30 = vld [vmem:[%s2017_s0 + $0x130] sm:$0xff]  ;;  %v53_v31 = vld [vmem:[%s2017_s0 + $0x138] sm:$0xff]  ;;  %v54_v32 = vld [vmem:[%s2017_s0 + $0x140] sm:$0xff]  ;;  %v81_v34 = vpack.c.bf16 %v21_v27, %v20_v26  ;;  %v82_v35 = vpack.c.bf16 %v23_v29, %v22_v28 }
   0xa   :  { %v55_v33 = vld [vmem:[%s2017_s0 + $0x148] sm:$0xff]  ;;  %v97_v36 = vpack.c.bf16 %v53_v31, %v52_v30  ;;  %v24_v38 = vld [vmem:[%s2017_s0 + $0x50] sm:$0xff]  ;;  %v25_v39 = vld [vmem:[%s2017_s0 + $0x58] sm:$0xff] }
   0xb   :  { %1388 = vmatpush3.bf16.msra.mxu0 %v1482_v2  ;;  %1473 = vmatpush3.bf16.msra.mxu1 %v1482_v2  ;;  %v98_v37 = vpack.c.bf16 %v55_v33, %v54_v32  ;;  %v26_v40 = vld [vmem:[%s2017_s0 + $0x60] sm:$0xff]  ;;  %v27_v41 = vld [vmem:[%s2017_s0 + $0x68] sm:$0xff]  ;;  %v56_v42 = vld [vmem:[%s2017_s0 + $0x150] sm:$0xff]  ;;  %v83_v46 = vpack.c.bf16 %v25_v39, %v24_v38 }
   0xc   :  { %1389 = vmatprep.subr.bf16.mxu0 %v1483_v3  ;;  %1466 = vmatprep.subr.bf16.mxu1 %v1483_v3  ;;  %v57_v43 = vld [vmem:[%s2017_s0 + $0x158] sm:$0xff]  ;;  %v58_v44 = vld [vmem:[%s2017_s0 + $0x160] sm:$0xff]  ;;  %v59_v45 = vld [vmem:[%s2017_s0 + $0x168] sm:$0xff]  ;;  %v84_v47 = vpack.c.bf16 %v27_v41, %v26_v40 }
   0xd   :  { %v99_v48 = vpack.c.bf16 %v57_v43, %v56_v42  ;;  %v100_v49 = vpack.c.bf16 %v59_v45, %v58_v44  ;;  %v28_v50 = vld [vmem:[%s2017_s0 + $0x70] sm:$0xff]  ;;  %v29_v51 = vld [vmem:[%s2017_s0 + $0x78] sm:$0xff]  ;;  %v30_v52 = vld [vmem:[%s2017_s0 + $0x80] sm:$0xff] }
   0xe   :  { %v31_v53 = vld [vmem:[%s2017_s0 + $0x88] sm:$0xff]  ;;  %v60_v54 = vld [vmem:[%s2017_s0 + $0x170] sm:$0xff]  ;;  %v61_v55 = vld [vmem:[%s2017_s0 + $0x178] sm:$0xff]  ;;  %v85_v58 = vpack.c.bf16 %v29_v51, %v28_v50 }
   0xf   :  { %1390 = vmatpush3.bf16.msra.mxu0 %v1483_v3  ;;  %1474 = vmatpush3.bf16.msra.mxu1 %v1483_v3  ;;  %v62_v56 = vld [vmem:[%s2017_s0 + $0x180] sm:$0xff]  ;;  %v63_v57 = vld [vmem:[%s2017_s0 + $0x188] sm:$0xff]  ;;  %v86_v59 = vpack.c.bf16 %v31_v53, %v30_v52  ;;  %v101_v60 = vpack.c.bf16 %v61_v55, %v60_v54  ;;  %v32_v62 = vld [vmem:[%s2017_s0 + $0x90] sm:$0xff] }
  0x10   :  { %1391 = vmatprep.subr.bf16.mxu0 %v1484_v7  ;;  %1467 = vmatprep.subr.bf16.mxu1 %v1484_v7  ;;  %v102_v61 = vpack.c.bf16 %v63_v57, %v62_v56  ;;  %v33_v63 = vld [vmem:[%s2017_s0 + $0x98] sm:$0xff]  ;;  %v34_v0 = vld [vmem:[%s2017_s0 + $0xa0] sm:$0xff]  ;;  %v35_v1 = vld [vmem:[%s2017_s0 + $0xa8] sm:$0xff] }
  0x11   :  { %v64_v2 = vld [vmem:[%s2017_s0 + $0x190] sm:$0xff]  ;;  %v65_v3 = vld [vmem:[%s2017_s0 + $0x198] sm:$0xff]  ;;  %v66_v4 = vld [vmem:[%s2017_s0 + $0x1a0] sm:$0xff]  ;;  %v87_v6 = vpack.c.bf16 %v33_v63, %v32_v62 }
  0x12   :  { %v67_v5 = vld [vmem:[%s2017_s0 + $0x1a8] sm:$0xff]  ;;  %v36_v10 = vld [vmem:[%s2017_s0 + $0xb0] sm:$0xff]  ;;  %v38_v12 = vld [vmem:[%s2017_s0 + $0xc0] sm:$0xff] }
  0x13   :  { %1392 = vmatpush3.bf16.msra.mxu0 %v1484_v7  ;;  %1475 = vmatpush3.bf16.msra.mxu1 %v1484_v7  ;;  %v88_v7 = vpack.c.bf16 %v35_v1, %v34_v0  ;;  %v104_v9 = vpack.c.bf16 %v67_v5, %v66_v4  ;;  %v68_v14 = vld [vmem:[%s2017_s0 + $0x1b0] sm:$0xff]  ;;  %v69_v15 = vld [vmem:[%s2017_s0 + $0x1b8] sm:$0xff]  ;;  %v70_v16 = vld [vmem:[%s2017_s0 + $0x1c0] sm:$0xff] }
  0x14   :  { %1393 = vmatprep.subr.bf16.mxu0 %v1485_v8  ;;  %1468 = vmatprep.subr.bf16.mxu1 %v1485_v8  ;;  %v71_v17 = vld [vmem:[%s2017_s0 + $0x1c8] sm:$0xff]  ;;  %v105_v20 = vpack.c.bf16 %v69_v15, %v68_v14  ;;  %v72_v26 = vld [vmem:[%s2017_s0 + $0x1d0] sm:$0xff]  ;;  %v73_v27 = vld [vmem:[%s2017_s0 + $0x1d8] sm:$0xff] }
  0x15   :  { %v106_v21 = vpack.c.bf16 %v71_v17, %v70_v16  ;;  %v74_v28 = vld [vmem:[%s2017_s0 + $0x1e0] sm:$0xff]  ;;  %v75_v29 = vld [vmem:[%s2017_s0 + $0x1e8] sm:$0xff]  ;;  %v107_v32 = vpack.c.bf16 %v73_v27, %v72_v26 }
  0x16   :  { %v108_v33 = vpack.c.bf16 %v75_v29, %v74_v28 }
  0x17   :  { %1394 = vmatpush3.bf16.msra.mxu0 %v1485_v8  ;;  %1476 = vmatpush3.bf16.msra.mxu1 %v1485_v8  ;;  %v103_v8 = vpack.c.bf16 %v65_v3, %v64_v2 }
  0x18   :  { %1395 = vmatprep.subr.bf16.mxu0 %v1486_v11  ;;  %1469 = vmatprep.subr.bf16.mxu1 %v1486_v11 }
  0x1b   :  { %1396 = vmatpush3.bf16.msra.mxu0 %v1486_v11  ;;  %1477 = vmatpush3.bf16.msra.mxu1 %v1486_v11  ;;  %v37_v11 = vld [vmem:[%s2017_s0 + $0xb8] sm:$0xff] }
  0x1c   :  { %1397 = vmatprep.subr.bf16.mxu0 %v1487_v13  ;;  %1470 = vmatprep.subr.bf16.mxu1 %v1487_v13  ;;  %v89_v18 = vpack.c.bf16 %v37_v11, %v36_v10 }
  0x1f   :  { %1398 = vmatpush3.bf16.msra.mxu0 %v1487_v13  ;;  %1478 = vmatpush3.bf16.msra.mxu1 %v1487_v13  ;;  %v39_v13 = vld [vmem:[%s2017_s0 + $0xc8] sm:$0xff] }
  0x20   :  { %v90_v19 = vpack.c.bf16 %v39_v13, %v38_v12 }
  0x22   :  { %1400 = vmatmul.mubr.bf16.vlgmr.msra.gmra.mxu0 %v79_v22  ;;  %1432 = vmatmul.mubr.bf16.vlgmr.msra.gmra.mxu1 %v95_v24  ;;  %v40_v22 = vld [vmem:[%s2017_s0 + $0xd0] sm:$0xff]  ;;  %v42_v24 = vld [vmem:[%s2017_s0 + $0xe0] sm:$0xff] }
  0x23   :  { %1403 = vmatprep.mubr.bf16.mxu0 %v80_v23  ;;  %1435 = vmatprep.mubr.bf16.mxu1 %v96_v25  ;;  %v41_v23 = vld [vmem:[%s2017_s0 + $0xd8] sm:$0xff]  ;;  %v43_v25 = vld [vmem:[%s2017_s0 + $0xe8] sm:$0xff] }
  0x24   :  { %v91_v30 = vpack.c.bf16 %v41_v23, %v40_v22  ;;  %v92_v31 = vpack.c.bf16 %v43_v25, %v42_v24 }
  0x2a   :  { %1404 = vmatmul.mubr.bf16.gmra.mxu0 %v81_v34  ;;  %1436 = vmatmul.mubr.bf16.gmra.mxu1 %v97_v36  ;;  %v44_v34 = vld [vmem:[%s2017_s0 + $0xf0] sm:$0xff] }
  0x2b   :  { %1407 = vmatprep.mubr.bf16.mxu0 %v82_v35  ;;  %1439 = vmatprep.mubr.bf16.mxu1 %v98_v37  ;;  %v45_v35 = vld [vmem:[%s2017_s0 + $0xf8] sm:$0xff]  ;;  %v76_v36 = vld [vmem:[%s2017_s0 + $0x1f0] sm:$0xff] }
  0x2c   :  { %v77_v37 = vld [vmem:[%s2017_s0 + $0x1f8] sm:$0xff]  ;;  %v93_v38 = vpack.c.bf16 %v45_v35, %v44_v34 }
  0x2d   :  { %v109_v39 = vpack.c.bf16 %v77_v37, %v76_v36 }
  0x32   :  { %1408 = vmatmul.mubr.bf16.gmra.mxu0 %v83_v46  ;;  %1440 = vmatmul.mubr.bf16.gmra.mxu1 %v99_v48 }
  0x33   :  { %1411 = vmatprep.mubr.bf16.mxu0 %v84_v47  ;;  %1443 = vmatprep.mubr.bf16.mxu1 %v100_v49 }
  0x3a   :  { %1412 = vmatmul.mubr.bf16.gmra.mxu0 %v85_v58  ;;  %1444 = vmatmul.mubr.bf16.gmra.mxu1 %v101_v60 }
  0x3b   :  { %1415 = vmatprep.mubr.bf16.mxu0 %v86_v59  ;;  %1447 = vmatprep.mubr.bf16.mxu1 %v102_v61 }
  0x42   :  { %1416 = vmatmul.mubr.bf16.gmra.mxu0 %v87_v6  ;;  %1448 = vmatmul.mubr.bf16.gmra.mxu1 %v103_v8 }
  0x43   :  { %1419 = vmatprep.mubr.bf16.mxu0 %v88_v7  ;;  %1451 = vmatprep.mubr.bf16.mxu1 %v104_v9 }
  0x4a   :  { %1420 = vmatmul.mubr.bf16.gmra.mxu0 %v89_v18  ;;  %1452 = vmatmul.mubr.bf16.gmra.mxu1 %v105_v20 }
  0x4b   :  { %1423 = vmatprep.mubr.bf16.mxu0 %v90_v19  ;;  %1455 = vmatprep.mubr.bf16.mxu1 %v106_v21 }
  0x52   :  { %1424 = vmatmul.mubr.bf16.gmra.mxu0 %v91_v30  ;;  %1456 = vmatmul.mubr.bf16.gmra.mxu1 %v107_v32 }
  0x53   :  { %1427 = vmatprep.mubr.bf16.mxu0 %v92_v31  ;;  %1459 = vmatprep.mubr.bf16.mxu1 %v108_v33 }
  0x5a   :  { %1428 = vmatmul.mubr.bf16.gmra.mxu0 %v93_v38  ;;  %1460 = vmatmul.mubr.bf16.gmra.mxu1 %v109_v39 }
  0xe2   :  { %v1401_v40 = vpop.f32.mrf.mxu0  ;;  %v1725_v41 = vpop.f32.mrf.mxu1 }
  0xe3   :  { %v854_v56 = vmul.f32 %v1401_v40, %v1401_v40 }
  0xe4   :  { %v208_v42 = vpop.f32.mrf.mxu0  ;;  %v1727_v43 = vpop.f32.mrf.mxu1 }
  0xe5   :  { %v852_v49 = vmul.f32 %v208_v42, %v208_v42 }
  0xe6   :  { %v1402_v44 = vpop.f32.mrf.mxu0  ;;  %v1729_v46 = vpop.f32.mrf.mxu1 }
  0xe7   :  { %v1160_v45 = vpack.c.bf16 %v1402_v44, %v1401_v40  ;;  %v1240_v48 = vpack.c.bf16 %v1729_v46, %v1725_v41  ;;  %v855_v61 = vmul.f32 %v1402_v44, %v1402_v44 }
  0xe8   :  { %v211_v47 = vpop.f32.mrf.mxu0  ;;  %v1736_v53 = vpop.f32.mrf.mxu1 }
  0xe9   :  { %1312 = vst [vmem:[%s2018_s2 + $0x8] sm:$0xff] %v1160_v45   ;;  %v1155_v50 = vpack.c.bf16 %v211_v47, %v208_v42  ;;  %v783_v51 = vadd.f32 %v211_v47, %v208_v42  ;;  %v853_v52 = vmul.f32 %v211_v47, %v211_v47  ;;  %1328 = vst [vmem:[%s2018_s2 + $0x88] sm:$0xff] %v1240_v48  }
  0xea   :  { %v1405_v54 = vpop.f32.mrf.mxu0  ;;  %v1235_v55 = vpack.c.bf16 %v1736_v53, %v1727_v43  ;;  %v1746_v59 = vpop.f32.mrf.mxu1 }
  0xeb   :  { %1156 = vst [vmem:[%s2018_s2] sm:$0xff] %v1155_v50   ;;  %v784_v57 = vadd.f32 %v1401_v40, %v783_v51  ;;  %v916_v58 = vadd.f32 %v853_v52, %v852_v49  ;;  %v858_v16 = vmul.f32 %v1405_v54, %v1405_v54 }
  0xec   :  { %v224_v60 = vpop.f32.mrf.mxu0  ;;  %1327 = vst [vmem:[%s2018_s2 + $0x80] sm:$0xff] %v1235_v55   ;;  %v1751_v0 = vpop.f32.mrf.mxu1 }
  0xed   :  { %v917_v62 = vadd.f32 %v916_v58, %v854_v56  ;;  %v785_v63 = vadd.f32 %v1402_v44, %v784_v57  ;;  %v856_v3 = vmul.f32 %v224_v60, %v224_v60 }
  0xee   :  { %v1406_v1 = vpop.f32.mrf.mxu0  ;;  %v1753_v6 = vpop.f32.mrf.mxu1 }
  0xef   :  { %v786_v2 = vadd.f32 %v785_v63, %v224_v60  ;;  %v918_v4 = vadd.f32 %v917_v62, %v855_v61  ;;  %v1170_v5 = vpack.c.bf16 %v1406_v1, %v1405_v54  ;;  %v1250_v8 = vpack.c.bf16 %v1753_v6, %v1746_v59 }
  0xf0   :  { %v227_v7 = vpop.f32.mrf.mxu0  ;;  %v1760_v13 = vpop.f32.mrf.mxu1  ;;  %v859_v21 = vmul.f32 %v1406_v1, %v1406_v1 }
  0xf1   :  { %v919_v9 = vadd.f32 %v918_v4, %v856_v3  ;;  %1314 = vst [vmem:[%s2018_s2 + $0x18] sm:$0xff] %v1170_v5   ;;  %v1165_v10 = vpack.c.bf16 %v227_v7, %v224_v60  ;;  %v787_v11 = vadd.f32 %v786_v2, %v227_v7  ;;  %v857_v12 = vmul.f32 %v227_v7, %v227_v7 }
  0xf2   :  { %v1409_v14 = vpop.f32.mrf.mxu0  ;;  %1330 = vst [vmem:[%s2018_s2 + $0x98] sm:$0xff] %v1250_v8   ;;  %v1245_v15 = vpack.c.bf16 %v1760_v13, %v1751_v0  ;;  %v1770_v19 = vpop.f32.mrf.mxu1 }
  0xf3   :  { %1313 = vst [vmem:[%s2018_s2 + $0x10] sm:$0xff] %v1165_v10   ;;  %v788_v17 = vadd.f32 %v1405_v54, %v787_v11  ;;  %v920_v18 = vadd.f32 %v919_v9, %v857_v12  ;;  %v862_v40 = vmul.f32 %v1409_v14, %v1409_v14 }
  0xf4   :  { %v240_v20 = vpop.f32.mrf.mxu0  ;;  %1329 = vst [vmem:[%s2018_s2 + $0x90] sm:$0xff] %v1245_v15   ;;  %v1775_v24 = vpop.f32.mrf.mxu1 }
  0xf5   :  { %v921_v22 = vadd.f32 %v920_v18, %v858_v16  ;;  %v789_v23 = vadd.f32 %v1406_v1, %v788_v17  ;;  %v860_v27 = vmul.f32 %v240_v20, %v240_v20 }
  0xf6   :  { %v1410_v25 = vpop.f32.mrf.mxu0  ;;  %v1777_v30 = vpop.f32.mrf.mxu1 }
  0xf7   :  { %v790_v26 = vadd.f32 %v789_v23, %v240_v20  ;;  %v922_v28 = vadd.f32 %v921_v22, %v859_v21  ;;  %v1180_v29 = vpack.c.bf16 %v1410_v25, %v1409_v14  ;;  %v1260_v32 = vpack.c.bf16 %v1777_v30, %v1770_v19 }
  0xf8   :  { %v243_v31 = vpop.f32.mrf.mxu0  ;;  %v1784_v37 = vpop.f32.mrf.mxu1  ;;  %v863_v48 = vmul.f32 %v1410_v25, %v1410_v25 }
  0xf9   :  { %v923_v33 = vadd.f32 %v922_v28, %v860_v27  ;;  %1316 = vst [vmem:[%s2018_s2 + $0x28] sm:$0xff] %v1180_v29   ;;  %v1175_v34 = vpack.c.bf16 %v243_v31, %v240_v20  ;;  %v791_v35 = vadd.f32 %v790_v26, %v243_v31  ;;  %v861_v36 = vmul.f32 %v243_v31, %v243_v31 }
  0xfa   :  { %v1413_v38 = vpop.f32.mrf.mxu0  ;;  %1332 = vst [vmem:[%s2018_s2 + $0xa8] sm:$0xff] %v1260_v32   ;;  %v1255_v39 = vpack.c.bf16 %v1784_v37, %v1775_v24  ;;  %v1794_v45 = vpop.f32.mrf.mxu1 }
  0xfb   :  { %1315 = vst [vmem:[%s2018_s2 + $0x20] sm:$0xff] %v1175_v34   ;;  %v792_v42 = vadd.f32 %v1409_v14, %v791_v35  ;;  %v924_v44 = vadd.f32 %v923_v33, %v861_v36  ;;  %v866_v7 = vmul.f32 %v1413_v38, %v1413_v38 }
  0xfc   :  { %v256_v47 = vpop.f32.mrf.mxu0  ;;  %1331 = vst [vmem:[%s2018_s2 + $0xa0] sm:$0xff] %v1255_v39   ;;  %v1799_v51 = vpop.f32.mrf.mxu1 }
  0xfd   :  { %v925_v49 = vadd.f32 %v924_v44, %v862_v40  ;;  %v793_v50 = vadd.f32 %v1410_v25, %v792_v42  ;;  %v864_v55 = vmul.f32 %v256_v47, %v256_v47 }
  0xfe   :  { %v1414_v52 = vpop.f32.mrf.mxu0  ;;  %v1801_v58 = vpop.f32.mrf.mxu1 }
  0xff   :  { %v794_v54 = vadd.f32 %v793_v50, %v256_v47  ;;  %v926_v56 = vadd.f32 %v925_v49, %v863_v48  ;;  %v1190_v57 = vpack.c.bf16 %v1414_v52, %v1413_v38  ;;  %v1270_v61 = vpack.c.bf16 %v1801_v58, %v1794_v45 }
 0x100   :  { %v259_v60 = vpop.f32.mrf.mxu0  ;;  %v1808_v3 = vpop.f32.mrf.mxu1  ;;  %v867_v12 = vmul.f32 %v1414_v52, %v1414_v52 }
 0x101   :  { %v927_v62 = vadd.f32 %v926_v56, %v864_v55  ;;  %1318 = vst [vmem:[%s2018_s2 + $0x38] sm:$0xff] %v1190_v57   ;;  %v1185_v63 = vpack.c.bf16 %v259_v60, %v256_v47  ;;  %v795_v1 = vadd.f32 %v794_v54, %v259_v60  ;;  %v865_v2 = vmul.f32 %v259_v60, %v259_v60 }
 0x102   :  { %v1417_v4 = vpop.f32.mrf.mxu0  ;;  %1334 = vst [vmem:[%s2018_s2 + $0xb8] sm:$0xff] %v1270_v61   ;;  %v1265_v5 = vpack.c.bf16 %v1808_v3, %v1799_v51  ;;  %v1818_v10 = vpop.f32.mrf.mxu1 }
 0x103   :  { %1317 = vst [vmem:[%s2018_s2 + $0x30] sm:$0xff] %v1185_v63   ;;  %v796_v8 = vadd.f32 %v1413_v38, %v795_v1  ;;  %v928_v9 = vadd.f32 %v927_v62, %v865_v2  ;;  %v870_v35 = vmul.f32 %v1417_v4, %v1417_v4 }
 0x104   :  { %v272_v11 = vpop.f32.mrf.mxu0  ;;  %1333 = vst [vmem:[%s2018_s2 + $0xb0] sm:$0xff] %v1265_v5   ;;  %v1823_v16 = vpop.f32.mrf.mxu1 }
 0x105   :  { %v929_v14 = vadd.f32 %v928_v9, %v866_v7  ;;  %v797_v15 = vadd.f32 %v1414_v52, %v796_v8  ;;  %v868_v20 = vmul.f32 %v272_v11, %v272_v11 }
 0x106   :  { %v1418_v17 = vpop.f32.mrf.mxu0  ;;  %v1825_v23 = vpop.f32.mrf.mxu1 }
 0x107   :  { %v798_v18 = vadd.f32 %v797_v15, %v272_v11  ;;  %v930_v21 = vadd.f32 %v929_v14, %v867_v12  ;;  %v1200_v22 = vpack.c.bf16 %v1418_v17, %v1417_v4  ;;  %v1280_v26 = vpack.c.bf16 %v1825_v23, %v1818_v10 }
 0x108   :  { %v275_v25 = vpop.f32.mrf.mxu0  ;;  %v1832_v32 = vpop.f32.mrf.mxu1  ;;  %v871_v42 = vmul.f32 %v1418_v17, %v1418_v17 }
 0x109   :  { %v931_v27 = vadd.f32 %v930_v21, %v868_v20  ;;  %1320 = vst [vmem:[%s2018_s2 + $0x48] sm:$0xff] %v1200_v22   ;;  %v1195_v28 = vpack.c.bf16 %v275_v25, %v272_v11  ;;  %v799_v29 = vadd.f32 %v798_v18, %v275_v25  ;;  %v869_v31 = vmul.f32 %v275_v25, %v275_v25 }
 0x10a   :  { %v1421_v33 = vpop.f32.mrf.mxu0  ;;  %1336 = vst [vmem:[%s2018_s2 + $0xc8] sm:$0xff] %v1280_v26   ;;  %v1275_v34 = vpack.c.bf16 %v1832_v32, %v1823_v16  ;;  %v1842_v39 = vpop.f32.mrf.mxu1 }
 0x10b   :  { %1319 = vst [vmem:[%s2018_s2 + $0x40] sm:$0xff] %v1195_v28   ;;  %v800_v36 = vadd.f32 %v1417_v4, %v799_v29  ;;  %v932_v38 = vadd.f32 %v931_v27, %v869_v31  ;;  %v874_v7 = vmul.f32 %v1421_v33, %v1421_v33 }
 0x10c   :  { %v288_v40 = vpop.f32.mrf.mxu0  ;;  %1335 = vst [vmem:[%s2018_s2 + $0xc0] sm:$0xff] %v1275_v34   ;;  %v1847_v48 = vpop.f32.mrf.mxu1 }
 0x10d   :  { %v933_v44 = vadd.f32 %v932_v38, %v870_v35  ;;  %v801_v47 = vadd.f32 %v1418_v17, %v800_v36  ;;  %v872_v52 = vmul.f32 %v288_v40, %v288_v40 }
 0x10e   :  { %v1422_v49 = vpop.f32.mrf.mxu0  ;;  %v1849_v56 = vpop.f32.mrf.mxu1 }
 0x10f   :  { %v802_v50 = vadd.f32 %v801_v47, %v288_v40  ;;  %v934_v54 = vadd.f32 %v933_v44, %v871_v42  ;;  %v1210_v55 = vpack.c.bf16 %v1422_v49, %v1421_v33  ;;  %v1290_v60 = vpack.c.bf16 %v1849_v56, %v1842_v39 }
 0x110   :  { %v291_v57 = vpop.f32.mrf.mxu0  ;;  %v1856_v2 = vpop.f32.mrf.mxu1  ;;  %v875_v14 = vmul.f32 %v1422_v49, %v1422_v49 }
 0x111   :  { %v935_v61 = vadd.f32 %v934_v54, %v872_v52  ;;  %1322 = vst [vmem:[%s2018_s2 + $0x58] sm:$0xff] %v1210_v55   ;;  %v1205_v62 = vpack.c.bf16 %v291_v57, %v288_v40  ;;  %v803_v63 = vadd.f32 %v802_v50, %v291_v57  ;;  %v873_v1 = vmul.f32 %v291_v57, %v291_v57 }
 0x112   :  { %v1425_v4 = vpop.f32.mrf.mxu0  ;;  %1338 = vst [vmem:[%s2018_s2 + $0xd8] sm:$0xff] %v1290_v60   ;;  %v1285_v5 = vpack.c.bf16 %v1856_v2, %v1847_v48  ;;  %v1866_v11 = vpop.f32.mrf.mxu1 }
 0x113   :  { %1321 = vst [vmem:[%s2018_s2 + $0x50] sm:$0xff] %v1205_v62   ;;  %v804_v8 = vadd.f32 %v1421_v33, %v803_v63  ;;  %v936_v9 = vadd.f32 %v935_v61, %v873_v1  ;;  %v878_v42 = vmul.f32 %v1425_v4, %v1425_v4 }
 0x114   :  { %v304_v12 = vpop.f32.mrf.mxu0  ;;  %1337 = vst [vmem:[%s2018_s2 + $0xd0] sm:$0xff] %v1285_v5   ;;  %v1871_v18 = vpop.f32.mrf.mxu1 }
 0x115   :  { %v937_v15 = vadd.f32 %v936_v9, %v874_v7  ;;  %v805_v17 = vadd.f32 %v1422_v49, %v804_v8  ;;  %v876_v22 = vmul.f32 %v304_v12, %v304_v12 }
 0x116   :  { %v1426_v20 = vpop.f32.mrf.mxu0  ;;  %v1873_v27 = vpop.f32.mrf.mxu1 }
 0x117   :  { %v806_v21 = vadd.f32 %v805_v17, %v304_v12  ;;  %v938_v25 = vadd.f32 %v937_v15, %v875_v14  ;;  %v1220_v26 = vpack.c.bf16 %v1426_v20, %v1425_v4  ;;  %v1300_v29 = vpack.c.bf16 %v1873_v27, %v1866_v11 }
 0x118   :  { %v307_v28 = vpop.f32.mrf.mxu0  ;;  %v1880_v36 = vpop.f32.mrf.mxu1  ;;  %v879_v52 = vmul.f32 %v1426_v20, %v1426_v20 }
 0x119   :  { %v939_v31 = vadd.f32 %v938_v25, %v876_v22  ;;  %1324 = vst [vmem:[%s2018_s2 + $0x68] sm:$0xff] %v1220_v26   ;;  %v1215_v33 = vpack.c.bf16 %v307_v28, %v304_v12  ;;  %v807_v34 = vadd.f32 %v806_v21, %v307_v28  ;;  %v877_v35 = vmul.f32 %v307_v28, %v307_v28 }
 0x11a   :  { %v1429_v38 = vpop.f32.mrf.mxu0  ;;  %1340 = vst [vmem:[%s2018_s2 + $0xe8] sm:$0xff] %v1300_v29   ;;  %v1295_v40 = vpack.c.bf16 %v1880_v36, %v1871_v18  ;;  %v1890_v49 = vpop.f32.mrf.mxu1  ;;  %v884_v29 = vmul.f32 %v1727_v43, %v1727_v43 }
 0x11b   :  { %1323 = vst [vmem:[%s2018_s2 + $0x60] sm:$0xff] %v1215_v33   ;;  %v808_v44 = vadd.f32 %v1425_v4, %v807_v34  ;;  %v940_v47 = vadd.f32 %v939_v31, %v877_v35  ;;  %v885_v35 = vmul.f32 %v1736_v53, %v1736_v53 }
 0x11c   :  { %v320_v50 = vpop.f32.mrf.mxu0  ;;  %1339 = vst [vmem:[%s2018_s2 + $0xe0] sm:$0xff] %v1295_v40   ;;  %v1895_v57 = vpop.f32.mrf.mxu1  ;;  %v886_v40 = vmul.f32 %v1725_v41, %v1725_v41 }
 0x11d   :  { %v941_v54 = vadd.f32 %v940_v47, %v878_v42  ;;  %v809_v55 = vadd.f32 %v1426_v20, %v808_v44  ;;  %v880_v62 = vmul.f32 %v320_v50, %v320_v50  ;;  %v882_v20 = vmul.f32 %v1429_v38, %v1429_v38 }
 0x11e   :  { %v1430_v60 = vpop.f32.mrf.mxu0  ;;  %v1897_v5 = vpop.f32.mrf.mxu1  ;;  %v887_v47 = vmul.f32 %v1729_v46, %v1729_v46 }
 0x11f   :  { %v810_v61 = vadd.f32 %v809_v55, %v320_v50  ;;  %v942_v63 = vadd.f32 %v941_v54, %v879_v52  ;;  %v1230_v1 = vpack.c.bf16 %v1430_v60, %v1429_v38  ;;  %v1310_v7 = vpack.c.bf16 %v1897_v5, %v1890_v49 }
 0x120   :  { %v323_v4 = vpop.f32.mrf.mxu0  ;;  %v1904_v15 = vpop.f32.mrf.mxu1  ;;  %v883_v25 = vmul.f32 %v1430_v60, %v1430_v60  ;;  %v888_v54 = vmul.f32 %v1751_v0, %v1751_v0 }
 0x121   :  { %v943_v8 = vadd.f32 %v942_v63, %v880_v62  ;;  %1326 = vst [vmem:[%s2018_s2 + $0x78] sm:$0xff] %v1230_v1   ;;  %v1225_v9 = vpack.c.bf16 %v323_v4, %v320_v50  ;;  %v811_v12 = vadd.f32 %v810_v61, %v323_v4  ;;  %v881_v14 = vmul.f32 %v323_v4, %v323_v4 }
 0x122   :  { %1342 = vst [vmem:[%s2018_s2 + $0xf8] sm:$0xff] %v1310_v7   ;;  %v1305_v17 = vpack.c.bf16 %v1904_v15, %v1895_v57  ;;  %v889_v61 = vmul.f32 %v1760_v13, %v1760_v13  ;;  %v892_v7 = vmul.f32 %v1775_v24, %v1775_v24 }
 0x123   :  { %1325 = vst [vmem:[%s2018_s2 + $0x70] sm:$0xff] %v1225_v9   ;;  %v812_v21 = vadd.f32 %v1429_v38, %v811_v12  ;;  %v944_v22 = vadd.f32 %v943_v8, %v881_v14  ;;  %v893_v12 = vmul.f32 %v1784_v37, %v1784_v37 }
 0x124   :  { %1341 = vst [vmem:[%s2018_s2 + $0xf0] sm:$0xff] %v1305_v17  }
 0x125   :  { %v813_v26 = vadd.f32 %v1430_v60, %v812_v21  ;;  %v945_v28 = vadd.f32 %v944_v22, %v882_v20  ;;  %v896_v22 = vmul.f32 %v1799_v51, %v1799_v51 }
 0x127   :  { %v946_v31 = vadd.f32 %v945_v28, %v883_v25  ;;  %v814_v33 = vadd.f32 %v813_v26, %v1727_v43  ;;  %v897_v28 = vmul.f32 %v1808_v3, %v1808_v3 }
 0x129   :  { %v815_v34 = vadd.f32 %v814_v33, %v1736_v53  ;;  %v947_v38 = vadd.f32 %v946_v31, %v884_v29 }
 0x12b   :  { %v816_v42 = vadd.f32 %v1725_v41, %v815_v34  ;;  %v948_v44 = vadd.f32 %v947_v38, %v885_v35  ;;  %v890_v41 = vmul.f32 %v1746_v59, %v1746_v59  ;;  %v900_v35 = vmul.f32 %v1823_v16, %v1823_v16 }
 0x12d   :  { %v949_v50 = vadd.f32 %v948_v44, %v886_v40  ;;  %v817_v52 = vadd.f32 %v1729_v46, %v816_v42  ;;  %v891_v46 = vmul.f32 %v1753_v6, %v1753_v6  ;;  %v901_v42 = vmul.f32 %v1832_v32, %v1832_v32 }
 0x12f   :  { %v818_v43 = vadd.f32 %v817_v52, %v1751_v0  ;;  %v950_v55 = vadd.f32 %v949_v50, %v887_v47 }
 0x131   :  { %v951_v53 = vadd.f32 %v950_v55, %v888_v54  ;;  %v819_v60 = vadd.f32 %v818_v43, %v1760_v13  ;;  %v904_v43 = vmul.f32 %v1847_v48, %v1847_v48 }
 0x133   :  { %v820_v62 = vadd.f32 %v1746_v59, %v819_v60  ;;  %v952_v63 = vadd.f32 %v951_v53, %v889_v61  ;;  %v894_v59 = vmul.f32 %v1770_v19, %v1770_v19  ;;  %v905_v53 = vmul.f32 %v1856_v2, %v1856_v2 }
 0x135   :  { %v953_v1 = vadd.f32 %v952_v63, %v890_v41  ;;  %v821_v4 = vadd.f32 %v1753_v6, %v820_v62  ;;  %v895_v6 = vmul.f32 %v1777_v30, %v1777_v30  ;;  %v908_v63 = vmul.f32 %v1871_v18, %v1871_v18 }
 0x137   :  { %v822_v0 = vadd.f32 %v821_v4, %v1775_v24  ;;  %v954_v8 = vadd.f32 %v953_v1, %v891_v46  ;;  %v909_v4 = vmul.f32 %v1880_v36, %v1880_v36 }
 0x139   :  { %v955_v9 = vadd.f32 %v954_v8, %v892_v7  ;;  %v823_v13 = vadd.f32 %v822_v0, %v1784_v37 }
 0x13b   :  { %v824_v14 = vadd.f32 %v1770_v19, %v823_v13  ;;  %v956_v17 = vadd.f32 %v955_v9, %v893_v12  ;;  %v898_v19 = vmul.f32 %v1794_v45, %v1794_v45  ;;  %v912_v13 = vmul.f32 %v1895_v57, %v1895_v57 }
 0x13d   :  { %v957_v20 = vadd.f32 %v956_v17, %v894_v59  ;;  %v825_v21 = vadd.f32 %v1777_v30, %v824_v14  ;;  %v899_v30 = vmul.f32 %v1801_v58, %v1801_v58  ;;  %v913_v14 = vmul.f32 %v1904_v15, %v1904_v15 }
 0x13f   :  { %v826_v24 = vadd.f32 %v825_v21, %v1799_v51  ;;  %v958_v25 = vadd.f32 %v957_v20, %v895_v6 }
 0x141   :  { %v959_v26 = vadd.f32 %v958_v25, %v896_v22  ;;  %v827_v37 = vadd.f32 %v826_v24, %v1808_v3 }
 0x143   :  { %v828_v29 = vadd.f32 %v1794_v45, %v827_v37  ;;  %v960_v31 = vadd.f32 %v959_v26, %v897_v28  ;;  %v902_v45 = vmul.f32 %v1818_v10, %v1818_v10  ;;  %v1488_v28 = vmov 1966171168  }
 0x145   :  { %v961_v33 = vadd.f32 %v960_v31, %v898_v19  ;;  %v829_v34 = vadd.f32 %v1801_v58, %v828_v29  ;;  %v903_v58 = vmul.f32 %v1825_v23, %v1825_v23  ;;  %v991_v19 = vlaneseq }
 0x147   :  { %v830_v51 = vadd.f32 %v829_v34, %v1823_v16  ;;  %v962_v38 = vadd.f32 %v961_v33, %v899_v30  ;;  %v992_v34 = vshrl.u32 %v991_v19, 7  ;;  %vm1005_vm0 = vcmp.lt.s32.totalorder %v991_v19, 256 }
 0x149   :  { %v963_v40 = vadd.f32 %v962_v38, %v900_v35  ;;  %v831_v3 = vadd.f32 %v830_v51, %v1832_v32 }
 0x14b   :  { %v832_v44 = vadd.f32 %v1818_v10, %v831_v3  ;;  %v964_v47 = vadd.f32 %v963_v40, %v901_v42  ;;  %v906_v10 = vmul.f32 %v1842_v39, %v1842_v39 }
 0x14d   :  { %v965_v50 = vadd.f32 %v964_v47, %v902_v45  ;;  %v833_v52 = vadd.f32 %v1825_v23, %v832_v44  ;;  %v907_v23 = vmul.f32 %v1849_v56, %v1849_v56 }
 0x14f   :  { %v834_v16 = vadd.f32 %v833_v52, %v1847_v48  ;;  %v966_v54 = vadd.f32 %v965_v50, %v903_v58 }
 0x151   :  { %v967_v55 = vadd.f32 %v966_v54, %v904_v43  ;;  %v835_v32 = vadd.f32 %v834_v16, %v1856_v2 }
 0x153   :  { %v836_v60 = vadd.f32 %v1842_v39, %v835_v32  ;;  %v968_v61 = vadd.f32 %v967_v55, %v905_v53  ;;  %v910_v39 = vmul.f32 %v1866_v11, %v1866_v11 }
 0x155   :  { %v969_v41 = vadd.f32 %v968_v61, %v906_v10  ;;  %v837_v62 = vadd.f32 %v1849_v56, %v836_v60  ;;  %v911_v56 = vmul.f32 %v1873_v27, %v1873_v27 }
 0x157   :  { %v838_v48 = vadd.f32 %v837_v62, %v1871_v18  ;;  %v970_v46 = vadd.f32 %v969_v41, %v907_v23 }
 0x159   :  { %v971_v1 = vadd.f32 %v970_v46, %v908_v63  ;;  %v839_v2 = vadd.f32 %v838_v48, %v1880_v36 }
 0x15b   :  { %v840_v0 = vadd.f32 %v1866_v11, %v839_v2  ;;  %v972_v7 = vadd.f32 %v971_v1, %v909_v4  ;;  %v914_v11 = vmul.f32 %v1890_v49, %v1890_v49 }
 0x15d   :  { %v973_v8 = vadd.f32 %v972_v7, %v910_v39  ;;  %v841_v9 = vadd.f32 %v1873_v27, %v840_v0  ;;  %v915_v27 = vmul.f32 %v1897_v5, %v1897_v5 }
 0x15f   :  { %v842_v18 = vadd.f32 %v841_v9, %v1895_v57  ;;  %v974_v12 = vadd.f32 %v973_v8, %v911_v56 }
 0x161   :  { %v975_v59 = vadd.f32 %v974_v12, %v912_v13  ;;  %v843_v36 = vadd.f32 %v842_v18, %v1904_v15  ;;  %v989_v15 = vunpack.c.l.s4 %v1488_v28 }
 0x163   :  { %v844_v17 = vadd.f32 %v1890_v49, %v843_v36  ;;  %v976_v6 = vadd.f32 %v975_v59, %v913_v14  ;;  %v990_v33 = vunpack.c.0.s8 %v989_v15 }
 0x165   :  { %v845_v20 = vadd.f32 %v1897_v5, %v844_v17  ;;  %v977_v21 = vadd.f32 %v976_v6, %v914_v11  ;;  %v993_v5 = vsub.s32 %v990_v33, %v992_v34 }
 0x167   :  { %v846_v57 = vrot.slane %v845_v20, 4  ;;  %v978_v24 = vadd.f32 %v977_v21, %v915_v27 }
 0x169   :  { %v847_v22 = vadd.f32 %v846_v57, %v845_v20  ;;  %v979_v25 = vrot.slane %v978_v24, 4 }
 0x16b   :  { %v848_v26 = vrot.slane %v847_v22, 2  ;;  %v980_v37 = vadd.f32 %v979_v25, %v978_v24 }
 0x16d   :  { %v849_v29 = vadd.f32 %v848_v26, %v847_v22  ;;  %v981_v31 = vrot.slane %v980_v37, 2 }
 0x16f   :  { %v850_v30 = vrot.slane %v849_v29, 1  ;;  %v982_v49 = vadd.f32 %v981_v31, %v980_v37 }
 0x171   :  { %v983_v51 = vrot.slane %v982_v49, 1  ;;  %v851_v35 = vadd.f32 %v850_v30, %v849_v29 }
 0x173   :  { %v984_v38 = vadd.f32 %v983_v51, %v982_v49 }
 0x175   :  { %v987_v40 = vcombine.low %v851_v35, %v984_v38 }
 0x177   :  { %v994_v3 = vrot.slane %v987_v40, %v993_v5 }
 0x179   :  { %v1001_v42 = vrot.slane %v994_v3, %v993_v5 }
 0x17b   :  { %1007 = vst.msk [vmem:[%s2019_s3] sm:$0x3] %vm1005_vm0, %v1001_v42 }

// kernel: bottleneck_forward.5
= control target key start
LH: loop header
LB: loop body
LE: loop exit
PB: predicated region body
PF: predicated region fallthrough
CT: control target
= control target key end

     0   :  { %s3643_s18 = smov 0   ;;  %s4642_s0 = inlined_call_operand.vmem [shape: bf16[512,128], index: 0, kind: input, shape index: {}]   ;;  %s4643_s1 = inlined_call_operand.vmem [shape: bf16[384,384], index: 1, kind: input, shape index: {}]   ;;  %s4644_s2 = inlined_call_operand.vmem [shape: f32[1,128], index: 2, kind: input, shape index: {}]   ;;  %s4645_s3 = inlined_call_operand.vmem [shape: f32[1,128], index: 3, kind: input, shape index: {}]   ;;  %s4646_s4 = inlined_call_operand.vmem [shape: bf16[512,128], index: 4, kind: output, shape index: {0}]   ;;  %s4647_s5 = inlined_call_operand.vmem [shape: f32[2,1,256], index: 5, kind: output, shape index: {1}]  }
   0x1 LB: > { %s3649_s19 = sadd.s32 4294967295, %s3609_s18   ;;  %p2993_p0 = scmp.ge.s32.totalorder %s3609_s18, 1  ;;  %s3609_s18 = sphi %s3643_s18, %s16_s18  }
   0x2   : > { %p191_p1 = scmp.lt.s32.totalorder %s3609_s18, 3 }
   0x4   : > { %p192_p2 = pnand %p2993_p0, %p191_p1 }
   0x6   : > { %195 = sbr.rel (%p192_p2) target bundleno = 526 (0x20e), region = 36 }
   0xb   : > { %v3507_v0 = vld [vmem:[%s4643_s1 + $0xac] ss:$12 sps:$4 sm:$0xff]   ;;  %v3611_v2 = vmov 0   ;;  %v3511_v3 = vld [vmem:[%s4643_s1 + $0xa8] ss:$12 sps:$4 sm:$0xff]   ;;  %s2994_s11 = sshll.u32 %s3649_s19, 5 }
   0xc   : > { %v3509_v1 = vld [vmem:[%s4643_s1 + $0x22c] ss:$12 sps:$4 sm:$0xff]   ;;  %1135 = vmatprep.mubr.bf16.mxu1 %v3611_v2  ;;  %910 = vmatprep.subr.bf16.mxu0 %v3507_v0  ;;  %v3512_v4 = vld [vmem:[%s4643_s1 + $0x228] ss:$12 sps:$4 sm:$0xff]   ;;  %v3517_v7 = vld [vmem:[%s4643_s1 + $0x90] ss:$12 sps:$4 sm:$0xff]  }
   0xd   : > { %1103 = vmatprep.subr.bf16.mxu1 %v3509_v1  ;;  %v3513_v5 = vld [vmem:[%s4643_s1 + $0x94] ss:$12 sps:$4 sm:$0xff]   ;;  %911 = vmatpush1.bf16.msra.mxu0 %v3511_v3  ;;  %v3518_v8 = vld [vmem:[%s4643_s1 + $0x210] ss:$12 sps:$4 sm:$0xff]   ;;  %v3523_v11 = vld [vmem:[%s4643_s1 + $0x78] ss:$12 sps:$4 sm:$0xff]  }
   0xe   : > { %1104 = vmatpush1.bf16.msra.mxu1 %v3512_v4  ;;  %v3515_v6 = vld [vmem:[%s4643_s1 + $0x214] ss:$12 sps:$4 sm:$0xff]   ;;  %912 = vmatprep.subr.bf16.mxu0 %v3513_v5  ;;  %v3519_v9 = vld [vmem:[%s4643_s1 + $0x7c] ss:$12 sps:$4 sm:$0xff]   ;;  %v3524_v12 = vld [vmem:[%s4643_s1 + $0x1f8] ss:$12 sps:$4 sm:$0xff]  }
   0xf   : > { %1105 = vmatprep.subr.bf16.mxu1 %v3515_v6  ;;  %v3521_v10 = vld [vmem:[%s4643_s1 + $0x1fc] ss:$12 sps:$4 sm:$0xff]   ;;  %v3525_v13 = vld [vmem:[%s4643_s1 + $0x64] ss:$12 sps:$4 sm:$0xff]   ;;  %p224_p3 = scmp.lt.s32.totalorder %s2994_s11, 63  ;;  %vm1650_vm0 = vcmask 1040384  }
  0x10   : > { %v3527_v14 = vld [vmem:[%s4643_s1 + $0x1e4] ss:$12 sps:$4 sm:$0xff]   ;;  %v3529_v15 = vld [vmem:[%s4643_s1 + $0x60] ss:$12 sps:$4 sm:$0xff]   ;;  %v3535_v19 = vld [vmem:[%s4643_s1 + $0x48] ss:$12 sps:$4 sm:$0xff]  }
  0x11   : > { %913 = vmatpush1.bf16.msra.mxu0 %v3517_v7  ;;  %v3530_v16 = vld [vmem:[%s4643_s1 + $0x1e0] ss:$12 sps:$4 sm:$0xff]   ;;  %s4681_s11 = smov (!%p224_p3, %s2994_s11), 63  ;;  %v3536_v20 = vld [vmem:[%s4643_s1 + $0x1c8] ss:$12 sps:$4 sm:$0xff]   ;;  %p235_p4 = scmp.lt.s32.totalorder %s3649_s19, 1 }
  0x12   : > { %1106 = vmatpush1.bf16.msra.mxu1 %v3518_v8  ;;  %914 = vmatprep.subr.bf16.mxu0 %v3519_v9  ;;  %v3531_v17 = vld [vmem:[%s4643_s1 + $0x4c] ss:$12 sps:$4 sm:$0xff]   ;;  %v3537_v21 = vld [vmem:[%s4643_s1 + $0x34] ss:$12 sps:$4 sm:$0xff]   ;;  %s2995_s16 = sshll.u32 %s4681_s11, 2 }
  0x13   : > { %1107 = vmatprep.subr.bf16.mxu1 %v3521_v10  ;;  %v3533_v18 = vld [vmem:[%s4643_s1 + $0x1cc] ss:$12 sps:$4 sm:$0xff]   ;;  %v3539_v22 = vld [vmem:[%s4643_s1 + $0x1b4] ss:$12 sps:$4 sm:$0xff]   ;;  %v3541_v23 = vld [vmem:[%s4643_s1 + $0x30] ss:$12 sps:$4 sm:$0xff]   ;;  %s3732_s25 = scalar_lea.vmem %s4642_s0, %s2995_s16  ;;  %s4495_s29 = scalar_lea.vmem %s4646_s4, %s2995_s16 }
  0x14   : > { %v3542_v24 = vld [vmem:[%s4643_s1 + $0x1b0] ss:$12 sps:$4 sm:$0xff]   ;;  %v3547_v27 = vld [vmem:[%s4643_s1 + $0x18] ss:$12 sps:$4 sm:$0xff]   ;;  %v3283_v28 = vld [vmem:[%s3732_s25 + $0x8] sm:$0xff]   ;;  %s4683_s19 = smov (!%p235_p4, %s3649_s19), 1 }
  0x15   : > { %915 = vmatpush1.bf16.msra.mxu0 %v3523_v11  ;;  %v3543_v25 = vld [vmem:[%s4643_s1 + $0x1c] ss:$12 sps:$4 sm:$0xff]   ;;  %v3750_v29 = vld [vmem:[%s4644_s2] ss:$0 sm:$0xff]  ;;  %v3548_v30 = vld [vmem:[%s4643_s1 + $0x198] ss:$12 sps:$4 sm:$0xff]   ;;  %v3145_v31 = vunpack.c.l.bf16 %v3283_v28  ;;  %v3146_v32 = vunpack.c.h.bf16 %v3283_v28 }
  0x16   : > { %1108 = vmatpush1.bf16.msra.mxu1 %v3524_v12  ;;  %916 = vmatprep.subr.bf16.mxu0 %v3525_v13  ;;  %v3545_v26 = vld [vmem:[%s4643_s1 + $0x19c] ss:$12 sps:$4 sm:$0xff]   ;;  %v3549_v33 = vld [vmem:[%s4643_s1 + $0x4] ss:$12 sps:$4 sm:$0xff]   ;;  %v3761_v34 = vld [vmem:[%s4645_s3] ss:$0 sm:$0xff] }
  0x17   : > { %1109 = vmatprep.subr.bf16.mxu1 %v3527_v14  ;;  %v3551_v35 = vld [vmem:[%s4643_s1 + $0x184] ss:$12 sps:$4 sm:$0xff]   ;;  %v313_v36 = vmul.f32 %v3145_v31, %v3750_v29  ;;  %v314_v37 = vmul.f32 %v3146_v32, %v3750_v29  ;;  %v3553_v38 = vld [vmem:[%s4643_s1] ss:$12 sps:$4 sm:$0xff]   ;;  %v3285_v52 = vld [vmem:[%s3732_s25 + $0x18] sm:$0xff]   ;;  %s2998_s11 = sshll.u32 %s4683_s19, 1 }
  0x18   : > { %v3554_v39 = vld [vmem:[%s4643_s1 + $0x180] ss:$12 sps:$4 sm:$0xff]   ;;  %v3284_v43 = vld [vmem:[%s3732_s25 + $0x10] sm:$0xff]   ;;  %v3153_v55 = vunpack.c.l.bf16 %v3285_v52  ;;  %v3154_v56 = vunpack.c.h.bf16 %v3285_v52  ;;  %v3571_v62 = vld [vmem:[%s4643_s1 + $0x158] ss:$12 sps:$4 sm:$0xff]   ;;  %s238_s6 = scalar_lea.vmem %s4647_s5, %s2998_s11 }
  0x19   : > { %917 = vmatpush1.bf16.msra.mxu0 %v3529_v15  ;;  %v352_v40 = vadd.f32 %v3761_v34, %v313_v36  ;;  %v353_v41 = vadd.f32 %v3761_v34, %v314_v37  ;;  %v3555_v42 = vld [vmem:[%s4643_s1 + $0x16c] ss:$12 sps:$4 sm:$0xff]   ;;  %v3557_v46 = vld [vmem:[%s4643_s1 + $0x170] ss:$12 sps:$4 sm:$0xff]   ;;  %v3149_v47 = vunpack.c.l.bf16 %v3284_v43  ;;  %v3150_v48 = vunpack.c.h.bf16 %v3284_v43  ;;  %v3558_v53 = vld [vmem:[%s4643_s1 + $0x168] ss:$12 sps:$4 sm:$0xff]  }
  0x1a   : > { %1110 = vmatpush1.bf16.msra.mxu1 %v3530_v16  ;;  %918 = vmatprep.subr.bf16.mxu0 %v3531_v17  ;;  %v3559_v54 = vld [vmem:[%s4643_s1 + $0xb0] ss:$12 sps:$4 sm:$0xff]   ;;  %v3560_v57 = vld [vmem:[%s4643_s1 + $0x154] ss:$12 sps:$4 sm:$0xff]   ;;  %v317_v60 = vmul.f32 %v3153_v55, %v3750_v29  ;;  %v318_v61 = vmul.f32 %v3154_v56, %v3750_v29  ;;  %v3573_v3 = vld [vmem:[%s4643_s1 + $0x98] ss:$12 sps:$4 sm:$0xff]  }
  0x1b   : > { %1111 = vmatprep.subr.bf16.mxu1 %v3533_v18  ;;  %v384_v44 = vmax.f32 %v352_v40, 0.0  ;;  %v385_v45 = vmax.f32 %v353_v41, 0.0  ;;  %v315_v50 = vmul.f32 %v3149_v47, %v3750_v29  ;;  %v316_v51 = vmul.f32 %v3150_v48, %v3750_v29  ;;  %v3562_v63 = vld [vmem:[%s4643_s1 + $0x150] ss:$12 sps:$4 sm:$0xff]   ;;  %v3286_v4 = vld [vmem:[%s3732_s25 + $0x20] sm:$0xff]   ;;  %v3287_v13 = vld [vmem:[%s3732_s25 + $0x28] sm:$0xff]  }
  0x1c   : > { %v3563_v5 = vld [vmem:[%s4643_s1 + $0x13c] ss:$12 sps:$4 sm:$0xff]   ;;  %v356_v6 = vadd.f32 %v3761_v34, %v317_v60  ;;  %v3157_v7 = vunpack.c.l.bf16 %v3286_v4  ;;  %v3158_v8 = vunpack.c.h.bf16 %v3286_v4  ;;  %v3565_v10 = vld [vmem:[%s4643_s1 + $0x138] ss:$12 sps:$4 sm:$0xff]   ;;  %v357_v11 = vadd.f32 %v3761_v34, %v318_v61  ;;  %v3583_v18 = vld [vmem:[%s4643_s1 + $0x140] ss:$12 sps:$4 sm:$0xff]  }
  0x1d   : > { %919 = vmatpush1.bf16.msra.mxu0 %v3535_v19  ;;  %v3783_v49 = vpack.c.bf16 %v385_v45, %v384_v44  ;;  %v354_v58 = vadd.f32 %v3761_v34, %v315_v50  ;;  %v355_v59 = vadd.f32 %v3761_v34, %v316_v51  ;;  %v3140_v12 = vld [vmem:[%s3732_s25] sm:$0xff]   ;;  %v3585_v28 = vld [vmem:[%s4643_s1 + $0x128] ss:$12 sps:$4 sm:$0xff]   ;;  %v3569_v36 = vld [vmem:[%s4643_s1 + $0x10c] ss:$12 sps:$4 sm:$0xff]  }
  0x1e   : > { %1112 = vmatpush1.bf16.msra.mxu1 %v3536_v20  ;;  %920 = vmatprep.subr.bf16.mxu0 %v3537_v21  ;;  %v319_v14 = vmul.f32 %v3157_v7, %v3750_v29  ;;  %v320_v15 = vmul.f32 %v3158_v8, %v3750_v29  ;;  %v3141_v16 = vunpack.c.l.bf16 %v3140_v12  ;;  %v3142_v17 = vunpack.c.h.bf16 %v3140_v12  ;;  %v3566_v19 = vld [vmem:[%s4643_s1 + $0x124] ss:$12 sps:$4 sm:$0xff]   ;;  %v3586_v45 = vld [vmem:[%s4643_s1 + $0x68] ss:$12 sps:$4 sm:$0xff]   ;;  %v3874_v55 = vld [vmem:[%s3732_s25 + $0x38] sm:$0xff]  }
  0x1f   : > { %1113 = vmatprep.subr.bf16.mxu1 %v3539_v22  ;;  %v386_v0 = vmax.f32 %v354_v58, 0.0  ;;  %v387_v1 = vmax.f32 %v355_v59, 0.0  ;;  %v3161_v20 = vunpack.c.l.bf16 %v3287_v13  ;;  %v3162_v21 = vunpack.c.h.bf16 %v3287_v13  ;;  %v3584_v22 = vld [vmem:[%s4643_s1 + $0x80] ss:$12 sps:$4 sm:$0xff]   ;;  %v3588_v51 = vld [vmem:[%s4643_s1 + $0x110] ss:$12 sps:$4 sm:$0xff]  }
  0x20   : > { %v389_v31 = vmax.f32 %v357_v11, 0.0  ;;  %v359_v32 = vadd.f32 %v3761_v34, %v320_v15  ;;  %v3292_v52 = vld [vmem:[%s3732_s25 + $0x50] sm:$0xff]   ;;  %v3577_v11 = vld [vmem:[%s4643_s1 + $0xdc] ss:$12 sps:$4 sm:$0xff]  }
  0x21   : > { %921 = vmatpush1.bf16.msra.mxu0 %v3541_v23  ;;  %v3817_v9 = vpack.c.bf16 %v387_v1, %v386_v0  ;;  %v388_v23 = vmax.f32 %v356_v6, 0.0  ;;  %v321_v37 = vmul.f32 %v3161_v20, %v3750_v29  ;;  %v3574_v56 = vld [vmem:[%s4643_s1 + $0xf4] ss:$12 sps:$4 sm:$0xff]   ;;  %v3589_v59 = vld [vmem:[%s4643_s1 + $0x50] ss:$12 sps:$4 sm:$0xff]  }
  0x22   : > { %1114 = vmatpush1.bf16.msra.mxu1 %v3542_v24  ;;  %922 = vmatprep.subr.bf16.mxu0 %v3543_v25  ;;  %v311_v24 = vmul.f32 %v3141_v16, %v3750_v29  ;;  %v312_v25 = vmul.f32 %v3142_v17, %v3750_v29  ;;  %v391_v48 = vmax.f32 %v359_v32, 0.0  ;;  %v3576_v0 = vld [vmem:[%s4643_s1 + $0xf0] ss:$12 sps:$4 sm:$0xff]   ;;  %v3294_v16 = vld [vmem:[%s3732_s25 + $0x60] sm:$0xff]  }
  0x23   : > { %1115 = vmatprep.subr.bf16.mxu1 %v3545_v26  ;;  %v3288_v26 = vld [vmem:[%s3732_s25 + $0x30] sm:$0xff]   ;;  %v3863_v47 = vpack.c.bf16 %v389_v31, %v388_v23  ;;  %v3579_v17 = vld [vmem:[%s4643_s1 + $0xd8] ss:$12 sps:$4 sm:$0xff]   ;;  %v3594_v23 = vld [vmem:[%s4643_s1 + $0xe0] ss:$12 sps:$4 sm:$0xff]  }
  0x24   : > { %v3165_v41 = vunpack.c.l.bf16 %v3288_v26  ;;  %v3166_v44 = vunpack.c.h.bf16 %v3288_v26 }
  0x25   : > { %923 = vmatpush1.bf16.msra.mxu0 %v3547_v27  ;;  %v358_v27 = vadd.f32 %v3761_v34, %v319_v14 }
  0x26   : > { %1116 = vmatpush1.bf16.msra.mxu1 %v3548_v30  ;;  %924 = vmatprep.subr.bf16.mxu0 %v3549_v33  ;;  %v3568_v30 = vld [vmem:[%s4643_s1 + $0x120] ss:$12 sps:$4 sm:$0xff]   ;;  %v350_v33 = vadd.f32 %v3761_v34, %v311_v24  ;;  %v324_v60 = vmul.f32 %v3166_v44, %v3750_v29 }
  0x27   : > { %1117 = vmatprep.subr.bf16.mxu1 %v3551_v35  ;;  %v351_v35 = vadd.f32 %v3761_v34, %v312_v25  ;;  %v390_v43 = vmax.f32 %v358_v27, 0.0 }
  0x29   : > { %925 = vmatpush1.bf16.msra.mxu0 %v3553_v38  ;;  %v322_v38 = vmul.f32 %v3162_v21, %v3750_v29  ;;  %v383_v40 = vmax.f32 %v351_v35, 0.0  ;;  %v3890_v1 = vpack.c.bf16 %v391_v48, %v390_v43  ;;  %v3189_v35 = vunpack.c.l.bf16 %v3294_v16 }
  0x2a   : > { %1118 = vmatpush1.bf16.msra.mxu1 %v3554_v39  ;;  %926 = vmatprep.subr.bf16.mxu0 %v3555_v42  ;;  %v382_v39 = vmax.f32 %v350_v33, 0.0  ;;  %v3572_v42 = vld [vmem:[%s4643_s1 + $0x108] ss:$12 sps:$4 sm:$0xff]  }
  0x2b   : > { %3313 = vmatprep.subr.bf16.mxu1 %v3557_v46  ;;  %v3291_v46 = vld [vmem:[%s3732_s25 + $0x48] sm:$0xff]  }
  0x2c   : > { %v3865_v50 = vpack.c.bf16 %v383_v40, %v382_v39  ;;  %v3177_v58 = vunpack.c.l.bf16 %v3291_v46  ;;  %v3178_v61 = vunpack.c.h.bf16 %v3291_v46  ;;  %v3190_v39 = vunpack.c.h.bf16 %v3294_v16  ;;  %v3595_v40 = vld [vmem:[%s4643_s1 + $0x20] ss:$12 sps:$4 sm:$0xff]  }
  0x2d   : > { %1136 = vmatmul.mubr.bf16.vlgmr.msra.gmra.mxu1 %v3783_v49  ;;  %927 = vmatpush2.bf16.msra.mxu0 %v3558_v53  ;;  %v360_v53 = vadd.f32 %v3761_v34, %v321_v37 }
  0x2e   : > { %3314 = vmatpush3.bf16.msra.mxu1 %v3559_v54  ;;  %928 = vmatprep.subr.bf16.mxu0 %v3560_v57  ;;  %v361_v54 = vadd.f32 %v3761_v34, %v322_v38  ;;  %v323_v57 = vmul.f32 %v3165_v41, %v3750_v29  ;;  %v329_v4 = vmul.f32 %v3177_v58, %v3750_v29  ;;  %v3296_v41 = vld [vmem:[%s3732_s25 + $0x70] sm:$0xff]  }
  0x2f   : > { %1145 = vmatprep.mubr.bf16.mxu1 %v3611_v2  ;;  %3315 = vmatprep.subr.bf16.mxu1 %v3571_v62  ;;  %v3181_v62 = vunpack.c.l.bf16 %v3292_v52  ;;  %v392_v6 = vmax.f32 %v360_v53, 0.0  ;;  %v330_v8 = vmul.f32 %v3178_v61, %v3750_v29  ;;  %v3197_v61 = vunpack.c.l.bf16 %v3296_v41 }
  0x30   : > { %942 = vmatprep.mubr.bf16.mxu0 %v3865_v50  ;;  %v393_v7 = vmax.f32 %v361_v54, 0.0  ;;  %v3903_v12 = vadd.f32 %v3761_v34, %v323_v57  ;;  %v368_v13 = vadd.f32 %v3761_v34, %v329_v4  ;;  %v3297_v54 = vld [vmem:[%s3732_s25 + $0x78] sm:$0xff]   ;;  %v3198_v4 = vunpack.c.h.bf16 %v3296_v41 }
  0x31   : > { %929 = vmatpush2.bf16.msra.mxu0 %v3562_v63  ;;  %v3293_v63 = vld [vmem:[%s3732_s25 + $0x58] sm:$0xff]   ;;  %v331_v14 = vmul.f32 %v3181_v62, %v3750_v29  ;;  %v369_v20 = vadd.f32 %v3761_v34, %v330_v8  ;;  %v339_v8 = vmul.f32 %v3197_v61, %v3750_v29 }
  0x32   : > { %3316 = vmatpush3.bf16.msra.mxu1 %v3573_v3  ;;  %930 = vmatprep.subr.bf16.mxu0 %v3563_v5  ;;  %v3169_v3 = vunpack.c.l.bf16 %v3874_v55  ;;  %v3591_v5 = vld [vmem:[%s4643_s1 + $0xf8] ss:$12 sps:$4 sm:$0xff]   ;;  %v3185_v15 = vunpack.c.l.bf16 %v3293_v63  ;;  %v400_v24 = vmax.f32 %v368_v13, 0.0  ;;  %v3186_v26 = vunpack.c.h.bf16 %v3293_v63  ;;  %v3587_v57 = vld [vmem:[%s4643_s1 + $0x230] ss:$12 sps:$4 sm:$0xff]  }
  0x33   : > { %3317 = vmatprep.subr.bf16.mxu1 %v3583_v18  ;;  %v3912_v18 = vadd.f32 %v3761_v34, %v324_v60  ;;  %v370_v25 = vadd.f32 %v3761_v34, %v331_v14  ;;  %v3929_v31 = vpack.c.bf16 %v393_v7, %v392_v6  ;;  %v401_v32 = vmax.f32 %v369_v20, 0.0 }
  0x34   : > { %v333_v27 = vmul.f32 %v3185_v15, %v3750_v29  ;;  %v334_v37 = vmul.f32 %v3186_v26, %v3750_v29  ;;  %v340_v15 = vmul.f32 %v3198_v4, %v3750_v29  ;;  %v3202_v20 = vunpack.c.h.bf16 %v3297_v54 }
  0x35   : > { %1146 = vmatmul.mubr.bf16.gmra.mxu1 %v3817_v9  ;;  %931 = vmatpush2.bf16.msra.mxu0 %v3565_v10  ;;  %v3182_v10 = vunpack.c.h.bf16 %v3292_v52  ;;  %v3941_v43 = vpack.c.bf16 %v401_v32, %v400_v24  ;;  %v336_v52 = vmul.f32 %v3190_v39, %v3750_v29  ;;  %v394_v26 = vmax.f32 %v3903_v12, 0.0 }
  0x36   : > { %1155 = vmatprep.mubr.bf16.mxu1 %v3611_v2  ;;  %932 = vmatprep.subr.bf16.mxu0 %v3566_v19  ;;  %v3170_v19 = vunpack.c.h.bf16 %v3874_v55  ;;  %v372_v38 = vadd.f32 %v3761_v34, %v333_v27  ;;  %v373_v48 = vadd.f32 %v3761_v34, %v334_v37  ;;  %v3590_v27 = vld [vmem:[%s4643_s1 + $0x218] ss:$12 sps:$4 sm:$0xff]   ;;  %v3593_v55 = vld [vmem:[%s4643_s1 + $0x200] ss:$12 sps:$4 sm:$0xff]  }
  0x37   : > { %3318 = vmatpush3.bf16.msra.mxu1 %v3584_v22  ;;  %v332_v21 = vmul.f32 %v3182_v10, %v3750_v29  ;;  %v3592_v22 = vld [vmem:[%s4643_s1 + $0x38] ss:$12 sps:$4 sm:$0xff]   ;;  %v375_v63 = vadd.f32 %v3761_v34, %v336_v52  ;;  %v3201_v10 = vunpack.c.l.bf16 %v3297_v54  ;;  %v3599_v54 = vld [vmem:[%s4643_s1 + $0x1d0] ss:$12 sps:$4 sm:$0xff]  }
  0x38   : > { %3319 = vmatprep.subr.bf16.mxu1 %v3585_v28  ;;  %v3295_v28 = vld [vmem:[%s3732_s25 + $0x68] sm:$0xff]   ;;  %v405_v62 = vmax.f32 %v373_v48, 0.0  ;;  %v326_v12 = vmul.f32 %v3170_v19, %v3750_v29 }
  0x39   : > { %933 = vmatpush2.bf16.msra.mxu0 %v3568_v30  ;;  %v3580_v30 = vld [vmem:[%s4643_s1 + $0xc4] ss:$12 sps:$4 sm:$0xff]   ;;  %v371_v33 = vadd.f32 %v3761_v34, %v332_v21  ;;  %v3193_v46 = vunpack.c.l.bf16 %v3295_v28  ;;  %v3194_v53 = vunpack.c.h.bf16 %v3295_v28  ;;  %v407_v13 = vmax.f32 %v375_v63, 0.0  ;;  %v3602_v63 = vld [vmem:[%s4643_s1 + $0x188] ss:$12 sps:$4 sm:$0xff]  }
  0x3a   : > { %934 = vmatprep.subr.bf16.mxu0 %v3569_v36  ;;  %v402_v36 = vmax.f32 %v370_v25, 0.0  ;;  %v341_v21 = vmul.f32 %v3201_v10, %v3750_v29  ;;  %v379_v25 = vadd.f32 %v3761_v34, %v340_v15  ;;  %v4648_v10 = vlaneseq }
  0x3b   : > { %3320 = vmatpush3.bf16.msra.mxu1 %v3586_v45  ;;  %v403_v44 = vmax.f32 %v371_v33, 0.0  ;;  %v335_v45 = vmul.f32 %v3189_v35, %v3750_v29  ;;  %v337_v60 = vmul.f32 %v3193_v46, %v3750_v29  ;;  %v3290_v33 = vld [vmem:[%s3732_s25 + $0x40] sm:$0xff]   ;;  %v3596_v46 = vld [vmem:[%s4643_s1 + $0x1e8] ss:$12 sps:$4 sm:$0xff]  }
  0x3c   : > { %3321 = vmatprep.subr.bf16.mxu1 %v3588_v51  ;;  %v404_v51 = vmax.f32 %v372_v38, 0.0  ;;  %v380_v32 = vadd.f32 %v3761_v34, %v341_v21 }
  0x3d   : > { %1156 = vmatmul.mubr.bf16.gmra.mxu1 %v3863_v47  ;;  %935 = vmatpush2.bf16.msra.mxu0 %v3572_v42  ;;  %v3582_v42 = vld [vmem:[%s4643_s1 + $0xc0] ss:$12 sps:$4 sm:$0xff]   ;;  %v3955_v58 = vpack.c.bf16 %v403_v44, %v402_v36  ;;  %v376_v7 = vadd.f32 %v3761_v34, %v337_v60  ;;  %v411_v36 = vmax.f32 %v379_v25, 0.0  ;;  %v3174_v44 = vunpack.c.h.bf16 %v3290_v33 }
  0x3e   : > { %1165 = vmatprep.mubr.bf16.mxu1 %v3611_v2  ;;  %936 = vmatprep.subr.bf16.mxu0 %v3574_v56  ;;  %v3597_v56 = vld [vmem:[%s4643_s1 + $0xc8] ss:$12 sps:$4 sm:$0xff]   ;;  %v412_v38 = vmax.f32 %v380_v32, 0.0 }
  0x3f   : > { %3322 = vmatpush3.bf16.msra.mxu1 %v3589_v59  ;;  %v374_v59 = vadd.f32 %v3761_v34, %v335_v45  ;;  %v408_v16 = vmax.f32 %v376_v7, 0.0 }
  0x40   : > { %3323 = vmatprep.subr.bf16.mxu1 %v3591_v5  ;;  %v3598_v5 = vld [vmem:[%s4643_s1 + $0x8] ss:$12 sps:$4 sm:$0xff]  }
  0x41   : > { %937 = vmatpush2.bf16.msra.mxu0 %v3576_v0  ;;  %v338_v0 = vmul.f32 %v3194_v53, %v3750_v29  ;;  %v406_v6 = vmax.f32 %v374_v59, 0.0  ;;  %v328_v53 = vmul.f32 %v3174_v44, %v3750_v29 }
  0x42   : > { %938 = vmatprep.subr.bf16.mxu0 %v3577_v11  ;;  %v3966_v11 = vpack.c.bf16 %v405_v62, %v404_v51 }
  0x43   : > { %3324 = vmatpush3.bf16.msra.mxu1 %v3592_v22  ;;  %v377_v14 = vadd.f32 %v3761_v34, %v338_v0  ;;  %v325_v22 = vmul.f32 %v3169_v3, %v3750_v29  ;;  %v395_v3 = vmax.f32 %v3912_v18, 0.0  ;;  %v367_v59 = vadd.f32 %v3761_v34, %v328_v53 }
  0x44   : > { %3325 = vmatprep.subr.bf16.mxu1 %v3594_v23  ;;  %v3975_v23 = vpack.c.bf16 %v407_v13, %v406_v6 }
  0x45   : > { %1166 = vmatmul.mubr.bf16.gmra.mxu1 %v3890_v1  ;;  %939 = vmatpush2.bf16.msra.mxu0 %v3579_v17  ;;  %v378_v17 = vadd.f32 %v3761_v34, %v339_v8  ;;  %v409_v24 = vmax.f32 %v377_v14, 0.0  ;;  %v4001_v19 = vpack.c.bf16 %v395_v3, %v394_v26  ;;  %v364_v41 = vadd.f32 %v3761_v34, %v325_v22 }
  0x46   : > { %1175 = vmatprep.mubr.bf16.mxu1 %v3611_v2  ;;  %940 = vmatprep.subr.bf16.mxu0 %v3580_v30  ;;  %v342_v30 = vmul.f32 %v3202_v20, %v3750_v29  ;;  %v399_v61 = vmax.f32 %v367_v59, 0.0  ;;  %v4136_v14 = vshrl.u32 %v4648_v10, 7 }
  0x47   : > { %3326 = vmatpush3.bf16.msra.mxu1 %v3595_v40  ;;  %v410_v28 = vmax.f32 %v378_v17, 0.0  ;;  %v3991_v35 = vpack.c.bf16 %v409_v24, %v408_v16  ;;  %v3173_v40 = vunpack.c.l.bf16 %v3290_v33  ;;  %v396_v48 = vmax.f32 %v364_v41, 0.0 }
  0x48   : > { %3327 = vmatprep.subr.bf16.mxu1 %v3597_v56  ;;  %v381_v37 = vadd.f32 %v3761_v34, %v342_v30  ;;  %v1913_v17 = vand.u32 15, %v4136_v14  ;;  %v1879_v26 = vadd.s32 16, %v4136_v14 }
  0x49   : > { %941 = vmatpush2.bf16.msra.mxu0 %v3582_v42  ;;  %v3996_v39 = vpack.c.bf16 %v411_v36, %v410_v28  ;;  %v365_v42 = vadd.f32 %v3761_v34, %v326_v12  ;;  %v327_v52 = vmul.f32 %v3173_v40, %v3750_v29  ;;  %v3600_v29 = vld [vmem:[%s4643_s1 + $0x1b8] ss:$12 sps:$4 sm:$0xff]  }
  0x4a   : > { %3449 = vmatprep.subr.bf16.mxu0 %v3587_v57  ;;  %v413_v18 = vmax.f32 %v381_v37, 0.0  ;;  %vm2293_vm1 = vcmp.eq.s32.totalorder %v1913_v17, 0 }
  0x4b   : > { %3328 = vmatpush3.bf16.msra.mxu1 %v3598_v5  ;;  %v397_v51 = vmax.f32 %v365_v42, 0.0 }
  0x4c   : > { %943 = vmatmul.mubr.bf16.vlgmr.msra.gmra.mxu0 %v3611_v2  ;;  %v4005_v45 = vpack.c.bf16 %v413_v18, %v412_v38  ;;  %v1927_v38 = vand.u32 15, %v1879_v26 }
  0x4d   : > { %1176 = vmatmul.mubr.bf16.gmra.mxu1 %v3929_v31  ;;  %952 = vmatprep.mubr.bf16.mxu0 %v3783_v49  ;;  %v4019_v56 = vpack.c.bf16 %v397_v51, %v396_v48  ;;  %v1881_v51 = vadd.s32 32, %v4136_v14 }
  0x4e   : > { %1185 = vmatprep.mubr.bf16.mxu1 %v3611_v2  ;;  %3450 = vmatpush3.bf16.msra.mxu0 %v3587_v57  ;;  %v366_v57 = vadd.f32 %v3761_v34, %v327_v52  ;;  %v3601_v34 = vld [vmem:[%s4643_s1 + $0x1a0] ss:$12 sps:$4 sm:$0xff]   ;;  %vm2295_vm2 = vcmp.eq.s32.totalorder %v1927_v38, 0 }
  0x4f   : > { %3451 = vmatprep.subr.bf16.mxu0 %v3590_v27 }
  0x50   : > { %v398_v60 = vmax.f32 %v366_v57, 0.0 }
  0x52   : > { %3452 = vmatpush3.bf16.msra.mxu0 %v3590_v27  ;;  %v4033_v62 = vpack.c.bf16 %v399_v61, %v398_v60 }
  0x53   : > { %3453 = vmatprep.subr.bf16.mxu0 %v3593_v55 }
  0x54   : > { %953 = vmatmul.mubr.bf16.gmra.mxu0 %v3865_v50 }
  0x55   : > { %1186 = vmatmul.mubr.bf16.gmra.mxu1 %v4001_v19  ;;  %962 = vmatprep.mubr.bf16.mxu0 %v3817_v9 }
  0x56   : > { %1195 = vmatprep.mubr.bf16.mxu1 %v3611_v2  ;;  %3454 = vmatpush3.bf16.msra.mxu0 %v3593_v55 }
  0x57   : > { %3455 = vmatprep.subr.bf16.mxu0 %v3596_v46 }
  0x5a   : > { %3456 = vmatpush3.bf16.msra.mxu0 %v3596_v46 }
  0x5b   : > { %3457 = vmatprep.subr.bf16.mxu0 %v3599_v54 }
  0x5c   : > { %963 = vmatmul.mubr.bf16.gmra.mxu0 %v3783_v49 }
  0x5d   : > { %1196 = vmatmul.mubr.bf16.gmra.mxu1 %v4019_v56  ;;  %972 = vmatprep.mubr.bf16.mxu0 %v3863_v47 }
  0x5e   : > { %1205 = vmatprep.mubr.bf16.mxu1 %v3611_v2  ;;  %3458 = vmatpush3.bf16.msra.mxu0 %v3599_v54 }
  0x5f   : > { %3459 = vmatprep.subr.bf16.mxu0 %v3600_v29 }
  0x62   : > { %3460 = vmatpush3.bf16.msra.mxu0 %v3600_v29 }
  0x63   : > { %3461 = vmatprep.subr.bf16.mxu0 %v3601_v34 }
  0x64   : > { %973 = vmatmul.mubr.bf16.gmra.mxu0 %v3817_v9 }
  0x65   : > { %1206 = vmatmul.mubr.bf16.gmra.mxu1 %v4033_v62  ;;  %982 = vmatprep.mubr.bf16.mxu0 %v3890_v1 }
  0x66   : > { %1215 = vmatprep.mubr.bf16.mxu1 %v3611_v2  ;;  %3462 = vmatpush3.bf16.msra.mxu0 %v3601_v34  ;;  %v1941_v34 = vand.u32 15, %v1881_v51 }
  0x67   : > { %3463 = vmatprep.subr.bf16.mxu0 %v3602_v63 }
  0x68   : > { %vm2297_vm3 = vcmp.eq.s32.totalorder %v1941_v34, 0 }
  0x6a   : > { %3464 = vmatpush3.bf16.msra.mxu0 %v3602_v63 }
  0x6c   : > { %983 = vmatmul.mubr.bf16.gmra.mxu0 %v3863_v47 }
  0x6d   : > { %1216 = vmatmul.mubr.bf16.gmra.mxu1 %v3941_v43  ;;  %992 = vmatprep.mubr.bf16.mxu0 %v3929_v31 }
  0x6e   : > { %1225 = vmatprep.mubr.bf16.mxu1 %v3611_v2 }
  0x74   : > { %993 = vmatmul.mubr.bf16.gmra.mxu0 %v3890_v1 }
  0x75   : > { %1226 = vmatmul.mubr.bf16.gmra.mxu1 %v3955_v58  ;;  %1002 = vmatprep.mubr.bf16.mxu0 %v4001_v19 }
  0x76   : > { %1235 = vmatprep.mubr.bf16.mxu1 %v3611_v2 }
  0x7c   : > { %1003 = vmatmul.mubr.bf16.gmra.mxu0 %v3929_v31 }
  0x7d   : > { %1236 = vmatmul.mubr.bf16.gmra.mxu1 %v3966_v11  ;;  %1012 = vmatprep.mubr.bf16.mxu0 %v4019_v56 }
  0x7e   : > { %1245 = vmatprep.mubr.bf16.mxu1 %v3611_v2 }
  0x84   : > { %1013 = vmatmul.mubr.bf16.gmra.mxu0 %v4001_v19 }
  0x85   : > { %1246 = vmatmul.mubr.bf16.gmra.mxu1 %v3975_v23  ;;  %1022 = vmatprep.mubr.bf16.mxu0 %v4033_v62 }
  0x86   : > { %1255 = vmatprep.mubr.bf16.mxu1 %v3611_v2 }
  0x8c   : > { %1023 = vmatmul.mubr.bf16.gmra.mxu0 %v4019_v56 }
  0x8d   : > { %1256 = vmatmul.mubr.bf16.gmra.mxu1 %v3991_v35  ;;  %1032 = vmatprep.mubr.bf16.mxu0 %v3941_v43 }
  0x8e   : > { %1265 = vmatprep.mubr.bf16.mxu1 %v3611_v2 }
  0x94   : > { %1033 = vmatmul.mubr.bf16.gmra.mxu0 %v4033_v62 }
  0x95   : > { %1266 = vmatmul.mubr.bf16.gmra.mxu1 %v3996_v39  ;;  %1042 = vmatprep.mubr.bf16.mxu0 %v3955_v58 }
  0x96   : > { %1275 = vmatprep.mubr.bf16.mxu1 %v3611_v2 }
  0x9c   : > { %1043 = vmatmul.mubr.bf16.gmra.mxu0 %v3941_v43 }
  0x9d   : > { %1276 = vmatmul.mubr.bf16.gmra.mxu1 %v4005_v45  ;;  %1052 = vmatprep.mubr.bf16.mxu0 %v3966_v11 }
  0x9e   : > { %1285 = vmatprep.mubr.bf16.mxu1 %v3611_v2 }
  0xa4   : > { %1053 = vmatmul.mubr.bf16.gmra.mxu0 %v3955_v58 }
  0xa5   : > { %1286 = vmatmul.mubr.bf16.gmra.mxu1 %v3611_v2  ;;  %1062 = vmatprep.mubr.bf16.mxu0 %v3975_v23 }
  0xa6   : > { %1328 = vmatprep.mubr.bf16.mxu1 %v3865_v50 }
  0xac   : > { %1063 = vmatmul.mubr.bf16.gmra.mxu0 %v3966_v11 }
  0xad   : > { %1329 = vmatmul.mubr.bf16.vlgmr.msra.gmra.mxu1 %v3611_v2  ;;  %1072 = vmatprep.mubr.bf16.mxu0 %v3991_v35 }
  0xae   : > { %1336 = vmatprep.mubr.bf16.mxu1 %v3783_v49 }
  0xb4   : > { %1073 = vmatmul.mubr.bf16.gmra.mxu0 %v3975_v23 }
  0xb5   : > { %1337 = vmatmul.mubr.bf16.gmra.mxu1 %v3865_v50  ;;  %1082 = vmatprep.mubr.bf16.mxu0 %v3996_v39 }
  0xb6   : > { %1344 = vmatprep.mubr.bf16.mxu1 %v3817_v9 }
  0xbc   : > { %1083 = vmatmul.mubr.bf16.gmra.mxu0 %v3991_v35 }
  0xbd   : > { %1345 = vmatmul.mubr.bf16.gmra.mxu1 %v3783_v49  ;;  %1092 = vmatprep.mubr.bf16.mxu0 %v4005_v45 }
  0xbe   : > { %1352 = vmatprep.mubr.bf16.mxu1 %v3863_v47 }
  0xc4   : > { %1093 = vmatmul.mubr.bf16.gmra.mxu0 %v3996_v39 }
  0xc5   : > { %1353 = vmatmul.mubr.bf16.gmra.mxu1 %v3817_v9  ;;  %3465 = vmatprep.mubr.bf16.mxu0 %v3783_v49 }
  0xc6   : > { %1360 = vmatprep.mubr.bf16.mxu1 %v3890_v1 }
  0xcc   : > { %3466 = vmatmul.mubr.bf16.vlgmr.msra.gmra.mxu0 %v3817_v9 }
  0xcd   : > { %1361 = vmatmul.mubr.bf16.gmra.mxu1 %v3863_v47  ;;  %3469 = vmatprep.mubr.bf16.mxu0 %v3863_v47 }
  0xce   : > { %1368 = vmatprep.mubr.bf16.mxu1 %v3929_v31 }
  0xd4   : > { %3470 = vmatmul.mubr.bf16.gmra.mxu0 %v3890_v1 }
  0xd5   : > { %1369 = vmatmul.mubr.bf16.gmra.mxu1 %v3890_v1  ;;  %3473 = vmatprep.mubr.bf16.mxu0 %v3929_v31 }
  0xd6   : > { %1376 = vmatprep.mubr.bf16.mxu1 %v4001_v19 }
  0xdc   : > { %3474 = vmatmul.mubr.bf16.gmra.mxu0 %v4001_v19 }
  0xdd   : > { %1377 = vmatmul.mubr.bf16.gmra.mxu1 %v3929_v31  ;;  %3477 = vmatprep.mubr.bf16.mxu0 %v4019_v56 }
  0xde   : > { %1384 = vmatprep.mubr.bf16.mxu1 %v4019_v56 }
  0xe4   : > { %3478 = vmatmul.mubr.bf16.gmra.mxu0 %v4033_v62 }
  0xe5   : > { %1385 = vmatmul.mubr.bf16.gmra.mxu1 %v4001_v19  ;;  %3481 = vmatprep.mubr.bf16.mxu0 %v3941_v43 }
  0xe6   : > { %1392 = vmatprep.mubr.bf16.mxu1 %v4033_v62 }
  0xec   : > { %3482 = vmatmul.mubr.bf16.gmra.mxu0 %v3955_v58 }
  0xed   : > { %v1137_v49 = vpop.f32.mrf.mxu1  ;;  %1393 = vmatmul.mubr.bf16.gmra.mxu1 %v4019_v56  ;;  %3485 = vmatprep.mubr.bf16.mxu0 %v3966_v11 }
  0xee   : > { %1400 = vmatprep.mubr.bf16.mxu1 %v3941_v43 }
  0xef   : > { %v1139_v9 = vpop.f32.mrf.mxu1 }
  0xf1   : > { %v1141_v47 = vpop.f32.mrf.mxu1 }
  0xf3   : > { %v1143_v50 = vpop.f32.mrf.mxu1 }
  0xf4   : > { %3486 = vmatmul.mubr.bf16.gmra.mxu0 %v3975_v23 }
  0xf5   : > { %v1147_v1 = vpop.f32.mrf.mxu1  ;;  %1401 = vmatmul.mubr.bf16.gmra.mxu1 %v4033_v62  ;;  %3489 = vmatprep.mubr.bf16.mxu0 %v3991_v35 }
  0xf6   : > { %1408 = vmatprep.mubr.bf16.mxu1 %v3955_v58 }
  0xf7   : > { %v1149_v31 = vpop.f32.mrf.mxu1 }
  0xf9   : > { %v1151_v0 = vpop.f32.mrf.mxu1 }
  0xfb   : > { %v4114_v4 = vpop.f32.mrf.mxu1 }
  0xfc   : > { %3490 = vmatmul.mubr.bf16.gmra.mxu0 %v3996_v39 }
  0xfd   : > { %v4116_v5 = vpop.f32.mrf.mxu1  ;;  %1409 = vmatmul.mubr.bf16.gmra.mxu1 %v3941_v43  ;;  %3493 = vmatprep.mubr.bf16.mxu0 %v4005_v45 }
  0xfe   : > { %1416 = vmatprep.mubr.bf16.mxu1 %v3966_v11 }
  0xff   : > { %v4122_v6 = vpop.f32.mrf.mxu1 }
 0x101   : > { %v4124_v7 = vpop.f32.mrf.mxu1 }
 0x103   : > { %v4126_v8 = vpop.f32.mrf.mxu1 }
 0x104   : > { %3494 = vmatmul.mubr.bf16.gmra.mxu0 %v3611_v2 }
 0x105   : > { %v4128_v13 = vpop.f32.mrf.mxu1  ;;  %1417 = vmatmul.mubr.bf16.gmra.mxu1 %v3955_v58 }
 0x106   : > { %1424 = vmatprep.mubr.bf16.mxu1 %v3975_v23 }
 0x107   : > { %v4133_v43 = vpop.f32.mrf.mxu1 }
 0x109   : > { %v4138_v15 = vpop.f32.mrf.mxu1 }
 0x10b   : > { %v4140_v16 = vpop.f32.mrf.mxu1 }
 0x10c   : > { %v944_v20 = vpop.f32.mrf.mxu0 }
 0x10d   : > { %v4143_v21 = vpop.f32.mrf.mxu1  ;;  %1425 = vmatmul.mubr.bf16.gmra.mxu1 %v3966_v11  ;;  %v1138_v58 = vadd.f32 %v1137_v49, %v944_v20 }
 0x10e   : > { %1432 = vmatprep.mubr.bf16.mxu1 %v3991_v35  ;;  %v946_v2 = vpop.f32.mrf.mxu0 }
 0x10f   : > { %v4147_v22 = vpop.f32.mrf.mxu1  ;;  %v1651_v24 = vrot.slane %v1138_v58, 7  ;;  %v1140_v25 = vadd.f32 %v1139_v9, %v946_v2 }
 0x110   : > { %v948_v27 = vpop.f32.mrf.mxu0 }
 0x111   : > { %v4150_v28 = vpop.f32.mrf.mxu1  ;;  %v1746_v30 = vsel %vm1650_vm0, 0.0, %v1651_v24  ;;  %v1142_v32 = vadd.f32 %v1141_v47, %v948_v27 }
 0x112   : > { %v2389_v3 = vsel %vm2293_vm1, 0.0, %v1746_v30  ;;  %v950_v11 = vpop.f32.mrf.mxu0 }
 0x113   : > { %v4153_v12 = vpop.f32.mrf.mxu1  ;;  %v4155_v33 = vadd.f32 %v2389_v3, %v1140_v25  ;;  %v1652_v36 = vrot.slane %v1142_v32, 7  ;;  %v1144_v37 = vadd.f32 %v1143_v50, %v950_v11 }
 0x114   : > { %v954_v40 = vpop.f32.mrf.mxu0 }
 0x115   : > { %v4157_v55 = vpop.f32.mrf.mxu1  ;;  %1433 = vmatmul.mubr.bf16.gmra.mxu1 %v3975_v23  ;;  %v1653_v18 = vsel %vm1650_vm0, %v1651_v24, %v1652_v36  ;;  %v1148_v19 = vadd.f32 %v1147_v1, %v954_v40 }
 0x116   : > { %1440 = vmatprep.mubr.bf16.mxu1 %v3996_v39  ;;  %v4162_v41 = vadd.f32 %v1653_v18, %v1144_v37  ;;  %v956_v42 = vpop.f32.mrf.mxu0 }
 0x117   : > { %v4164_v44 = vpop.f32.mrf.mxu1  ;;  %v1654_v46 = vrot.slane %v1148_v19, 7  ;;  %v1150_v48 = vadd.f32 %v1149_v31, %v956_v42 }
 0x118   : > { %v958_v52 = vpop.f32.mrf.mxu0 }
 0x119   : > { %v4167_v53 = vpop.f32.mrf.mxu1  ;;  %v1655_v23 = vsel %vm1650_vm0, %v1652_v36, %v1654_v46  ;;  %v1152_v54 = vadd.f32 %v1151_v0, %v958_v52 }
 0x11a   : > { %v2391_v56 = vsel %vm2295_vm2, 0.0, %v1655_v23  ;;  %v960_v57 = vpop.f32.mrf.mxu0 }
 0x11b   : > { %v4170_v59 = vpop.f32.mrf.mxu1  ;;  %v4172_v29 = vadd.f32 %v2391_v56, %v1150_v48  ;;  %v1656_v60 = vrot.slane %v1152_v54, 7  ;;  %v1154_v61 = vadd.f32 %v4114_v4, %v960_v57  ;;  %v1883_v4 = vadd.s32 48, %v4136_v14 }
 0x11c   : > { %v964_v62 = vpop.f32.mrf.mxu0 }
 0x11d   : > { %v4175_v63 = vpop.f32.mrf.mxu1  ;;  %1441 = vmatmul.mubr.bf16.gmra.mxu1 %v3991_v35  ;;  %v1657_v49 = vsel %vm1650_vm0, %v1654_v46, %v1656_v60  ;;  %v1158_v9 = vadd.f32 %v4116_v5, %v964_v62 }
 0x11e   : > { %1448 = vmatprep.mubr.bf16.mxu1 %v4005_v45  ;;  %v4181_v47 = vadd.f32 %v1657_v49, %v1154_v61  ;;  %v966_v50 = vpop.f32.mrf.mxu0  ;;  %v1887_v49 = vadd.s32 80, %v4136_v14 }
 0x11f   : > { %v4183_v1 = vpop.f32.mrf.mxu1  ;;  %v1658_v31 = vrot.slane %v1158_v9, 7  ;;  %v1160_v0 = vadd.f32 %v4122_v6, %v966_v50  ;;  %v1955_v6 = vand.u32 15, %v1883_v4 }
 0x120   : > { %v968_v17 = vpop.f32.mrf.mxu0 }
 0x121   : > { %v4187_v20 = vpop.f32.mrf.mxu1  ;;  %v1659_v35 = vsel %vm1650_vm0, %v1656_v60, %v1658_v31  ;;  %v1162_v5 = vadd.f32 %v4124_v7, %v968_v17  ;;  %vm2299_vm4 = vcmp.eq.s32.totalorder %v1955_v6, 0 }
 0x122   : > { %v2393_v58 = vsel %vm2297_vm3, 0.0, %v1659_v35  ;;  %v970_v45 = vpop.f32.mrf.mxu0 }
 0x123   : > { %v4191_v2 = vpop.f32.mrf.mxu1  ;;  %v4193_v24 = vadd.f32 %v2393_v58, %v1160_v0  ;;  %v1660_v25 = vrot.slane %v1162_v5, 7  ;;  %v1164_v26 = vadd.f32 %v4126_v8, %v970_v45  ;;  %v1885_v8 = vadd.s32 64, %v4136_v14 }
 0x124   : > { %v974_v27 = vpop.f32.mrf.mxu0 }
 0x125   : > { %v4196_v30 = vpop.f32.mrf.mxu1  ;;  %1449 = vmatmul.mubr.bf16.gmra.mxu1 %v3996_v39  ;;  %v1661_v32 = vsel %vm1650_vm0, %v1658_v31, %v1660_v25  ;;  %v1168_v3 = vadd.f32 %v4128_v13, %v974_v27 }
 0x126   : > { %v4201_v7 = vadd.f32 %v1661_v32, %v1164_v26  ;;  %v976_v11 = vpop.f32.mrf.mxu0 }
 0x127   : > { %v4203_v36 = vpop.f32.mrf.mxu1  ;;  %v1662_v37 = vrot.slane %v1168_v3, 7  ;;  %v1170_v38 = vadd.f32 %v4133_v43, %v976_v11  ;;  %v1969_v43 = vand.u32 15, %v1885_v8  ;;  %v1889_v11 = vadd.s32 96, %v4136_v14 }
 0x128   : > { %v978_v40 = vpop.f32.mrf.mxu0 }
 0x129   : > { %v4207_v18 = vpop.f32.mrf.mxu1  ;;  %v1663_v39 = vsel %vm1650_vm0, %v1660_v25, %v1662_v37  ;;  %v1172_v19 = vadd.f32 %v4138_v15, %v978_v40  ;;  %vm2301_vm5 = vcmp.eq.s32.totalorder %v1969_v43, 0 }
 0x12a   : > { %v2395_v42 = vsel %vm2299_vm4, 0.0, %v1663_v39  ;;  %v980_v13 = vpop.f32.mrf.mxu0 }
 0x12b   : > { %v4211_v46 = vpop.f32.mrf.mxu1  ;;  %v4213_v48 = vadd.f32 %v2395_v42, %v1170_v38  ;;  %v1664_v51 = vrot.slane %v1172_v19, 7  ;;  %v1174_v52 = vadd.f32 %v4140_v16, %v980_v13 }
 0x12c   : > { %v984_v23 = vpop.f32.mrf.mxu0 }
 0x12d   : > { %v4216_v54 = vpop.f32.mrf.mxu1  ;;  %v1665_v56 = vsel %vm1650_vm0, %v1662_v37, %v1664_v51  ;;  %v1178_v57 = vadd.f32 %v4143_v21, %v984_v23 }
 0x12e   : > { %v4220_v60 = vadd.f32 %v1665_v56, %v1174_v52  ;;  %v986_v15 = vpop.f32.mrf.mxu0 }
 0x12f   : > { %v4222_v61 = vpop.f32.mrf.mxu1  ;;  %v1666_v34 = vrot.slane %v1178_v57, 7  ;;  %v1180_v62 = vadd.f32 %v4147_v22, %v986_v15  ;;  %v1983_v22 = vand.u32 15, %v1887_v49 }
 0x130   : > { %v988_v16 = vpop.f32.mrf.mxu0 }
 0x131   : > { %v4226_v9 = vpop.f32.mrf.mxu1  ;;  %v1667_v50 = vsel %vm1650_vm0, %v1664_v51, %v1666_v34  ;;  %v1182_v31 = vadd.f32 %v4150_v28, %v988_v16  ;;  %vm2303_vm6 = vcmp.eq.s32.totalorder %v1983_v22, 0 }
 0x132   : > { %v2397_v0 = vsel %vm2301_vm5, 0.0, %v1667_v50  ;;  %v990_v21 = vpop.f32.mrf.mxu0 }
 0x133   : > { %v4230_v4 = vpop.f32.mrf.mxu1  ;;  %v4232_v17 = vadd.f32 %v2397_v0, %v1180_v62  ;;  %v1668_v35 = vrot.slane %v1182_v31, 7  ;;  %v1184_v5 = vadd.f32 %v4153_v12, %v990_v21  ;;  %v1891_v62 = vadd.s32 112, %v4136_v14 }
 0x134   : > { %v994_v58 = vpop.f32.mrf.mxu0 }
 0x135   : > { %v4235_v45 = vpop.f32.mrf.mxu1  ;;  %v1669_v25 = vsel %vm1650_vm0, %v1666_v34, %v1668_v35  ;;  %v1188_v26 = vadd.f32 %v4157_v55, %v994_v58 }
 0x136   : > { %v4239_v6 = vadd.f32 %v1669_v25, %v1184_v5  ;;  %v996_v28 = vpop.f32.mrf.mxu0 }
 0x137   : > { %v4241_v27 = vpop.f32.mrf.mxu1  ;;  %v1670_v32 = vrot.slane %v1188_v26, 7  ;;  %v1190_v3 = vadd.f32 %v4164_v44, %v996_v28  ;;  %v1997_v44 = vand.u32 15, %v1889_v11 }
 0x138   : > { %v998_v12 = vpop.f32.mrf.mxu0 }
 0x139   : > { %v4245_v37 = vpop.f32.mrf.mxu1  ;;  %v1671_v38 = vsel %vm1650_vm0, %v1668_v35, %v1670_v32  ;;  %v1192_v8 = vadd.f32 %v4167_v53, %v998_v12  ;;  %vm2305_vm7 = vcmp.eq.s32.totalorder %v1997_v44, 0  ;;  %v1893_v12 = vadd.s32 128, %v4136_v14 }
 0x13a   : > { %v2399_v40 = vsel %vm2303_vm6, 0.0, %v1671_v38  ;;  %v1000_v55 = vpop.f32.mrf.mxu0 }
 0x13b   : > { %v4249_v39 = vpop.f32.mrf.mxu1  ;;  %v4251_v19 = vadd.f32 %v2399_v40, %v1190_v3  ;;  %v1672_v42 = vrot.slane %v1192_v8, 7  ;;  %v1194_v13 = vadd.f32 %v4170_v59, %v1000_v55 }
 0x13c   : > { %v1004_v51 = vpop.f32.mrf.mxu0 }
 0x13d   : > { %v4254_v52 = vpop.f32.mrf.mxu1  ;;  %v1673_v43 = vsel %vm1650_vm0, %v1670_v32, %v1672_v42  ;;  %v1198_v23 = vadd.f32 %v4175_v63, %v1004_v51 }
 0x13e   : > { %v4258_v56 = vadd.f32 %v1673_v43, %v1194_v13  ;;  %v1006_v53 = vpop.f32.mrf.mxu0 }
 0x13f   : > { %v4260_v57 = vpop.f32.mrf.mxu1  ;;  %v1674_v15 = vrot.slane %v1198_v23, 7  ;;  %v1200_v34 = vadd.f32 %v4183_v1, %v1006_v53  ;;  %v2011_v1 = vand.u32 15, %v1891_v62 }
 0x140   : > { %v1008_v59 = vpop.f32.mrf.mxu0 }
 0x141   : > { %v4264_v49 = vpop.f32.mrf.mxu1  ;;  %v1675_v16 = vsel %vm1650_vm0, %v1672_v42, %v1674_v15  ;;  %v1202_v50 = vadd.f32 %v4187_v20, %v1008_v59  ;;  %vm2307_vm8 = vcmp.eq.s32.totalorder %v2011_v1, 0 }
 0x142   : > { %v2401_v31 = vsel %vm2305_vm7, 0.0, %v1675_v16  ;;  %v1010_v63 = vpop.f32.mrf.mxu0 }
 0x143   : > { %v4268_v0 = vpop.f32.mrf.mxu1  ;;  %v4270_v21 = vadd.f32 %v2401_v31, %v1200_v34  ;;  %v1676_v35 = vrot.slane %v1202_v50, 7  ;;  %v1204_v5 = vadd.f32 %v4191_v2, %v1010_v63  ;;  %v1895_v50 = vadd.s32 144, %v4136_v14 }
 0x144   : > { %v1014_v22 = vpop.f32.mrf.mxu0 }
 0x145   : > { %v4273_v58 = vpop.f32.mrf.mxu1  ;;  %v1677_v25 = vsel %vm1650_vm0, %v1674_v15, %v1676_v35  ;;  %v1208_v26 = vadd.f32 %v4196_v30, %v1014_v22 }
 0x146   : > { %v4277_v28 = vadd.f32 %v1677_v25, %v1204_v5  ;;  %v1016_v20 = vpop.f32.mrf.mxu0 }
 0x147   : > { %v4279_v32 = vpop.f32.mrf.mxu1  ;;  %v1678_v3 = vrot.slane %v1208_v26, 7  ;;  %v1210_v11 = vadd.f32 %v4203_v36, %v1016_v20  ;;  %v2025_v36 = vand.u32 15, %v1893_v12 }
 0x148   : > { %v1018_v2 = vpop.f32.mrf.mxu0 }
 0x149   : > { %v4283_v38 = vpop.f32.mrf.mxu1  ;;  %v1679_v8 = vsel %vm1650_vm0, %v1676_v35, %v1678_v3  ;;  %v1212_v40 = vadd.f32 %v4207_v18, %v1018_v2  ;;  %vm2309_vm9 = vcmp.eq.s32.totalorder %v2025_v36, 0 }
 0x14a   : > { %v2403_v55 = vsel %vm2307_vm8, 0.0, %v1679_v8  ;;  %v1020_v30 = vpop.f32.mrf.mxu0 }
 0x14b   : > { %v4287_v42 = vpop.f32.mrf.mxu1  ;;  %v4289_v13 = vadd.f32 %v2403_v55, %v1210_v11  ;;  %v1680_v44 = vrot.slane %v1212_v40, 7  ;;  %v1214_v51 = vadd.f32 %v4211_v46, %v1020_v30  ;;  %v1897_v30 = vadd.s32 160, %v4136_v14 }
 0x14c   : > { %v1024_v43 = vpop.f32.mrf.mxu0 }
 0x14d   : > { %v4292_v23 = vpop.f32.mrf.mxu1  ;;  %v1681_v53 = vsel %vm1650_vm0, %v1678_v3, %v1680_v44  ;;  %v1218_v15 = vadd.f32 %v4216_v54, %v1024_v43 }
 0x14e   : > { %v4296_v34 = vadd.f32 %v1681_v53, %v1214_v51  ;;  %v1026_v18 = vpop.f32.mrf.mxu0 }
 0x14f   : > { %v4298_v62 = vpop.f32.mrf.mxu1  ;;  %v1682_v59 = vrot.slane %v1218_v15, 7  ;;  %v1220_v16 = vadd.f32 %v4222_v61, %v1026_v18  ;;  %v2039_v61 = vand.u32 15, %v1895_v50 }
 0x150   : > { %v1028_v46 = vpop.f32.mrf.mxu0 }
 0x151   : > { %v4302_v31 = vpop.f32.mrf.mxu1  ;;  %v1683_v63 = vsel %vm1650_vm0, %v1680_v44, %v1682_v59  ;;  %v1222_v35 = vadd.f32 %v4226_v9, %v1028_v46  ;;  %vm2311_vm10 = vcmp.eq.s32.totalorder %v2039_v61, 0 }
 0x152   : > { %v2405_v5 = vsel %vm2309_vm9, 0.0, %v1683_v63  ;;  %v1030_v54 = vpop.f32.mrf.mxu0 }
 0x153   : > { %v4306_v1 = vpop.f32.mrf.mxu1  ;;  %v4308_v22 = vadd.f32 %v2405_v5, %v1220_v16  ;;  %v1684_v25 = vrot.slane %v1222_v35, 7  ;;  %v1224_v26 = vadd.f32 %v4230_v4, %v1030_v54 }
 0x154   : > { %v1034_v20 = vpop.f32.mrf.mxu0 }
 0x155   : > { %v4311_v3 = vpop.f32.mrf.mxu1  ;;  %v1685_v11 = vsel %vm1650_vm0, %v1682_v59, %v1684_v25  ;;  %v1228_v12 = vadd.f32 %v4235_v45, %v1034_v20 }
 0x156   : > { %v4315_v2 = vadd.f32 %v1685_v11, %v1224_v26  ;;  %v1036_v9 = vpop.f32.mrf.mxu0  ;;  %v1899_v26 = vadd.s32 176, %v4136_v14 }
 0x157   : > { %v4317_v8 = vpop.f32.mrf.mxu1  ;;  %v1686_v40 = vrot.slane %v1228_v12, 7  ;;  %v1230_v55 = vadd.f32 %v4241_v27, %v1036_v9  ;;  %v2053_v27 = vand.u32 15, %v1897_v30 }
 0x158   : > { %v1038_v4 = vpop.f32.mrf.mxu0 }
 0x159   : > { %v4321_v44 = vpop.f32.mrf.mxu1  ;;  %v1687_v51 = vsel %vm1650_vm0, %v1684_v25, %v1686_v40  ;;  %v1232_v36 = vadd.f32 %v4245_v37, %v1038_v4  ;;  %vm2313_vm11 = vcmp.eq.s32.totalorder %v2053_v27, 0 }
 0x15a   : > { %v2407_v43 = vsel %vm2311_vm10, 0.0, %v1687_v51  ;;  %v1040_v45 = vpop.f32.mrf.mxu0 }
 0x15b   : > { %v4325_v53 = vpop.f32.mrf.mxu1  ;;  %v4327_v15 = vadd.f32 %v2407_v43, %v1230_v55  ;;  %v1688_v18 = vrot.slane %v1232_v36, 7  ;;  %v1234_v59 = vadd.f32 %v4249_v39, %v1040_v45 }
 0x15c   : > { %v1044_v16 = vpop.f32.mrf.mxu0 }
 0x15d   : > { %v4330_v50 = vpop.f32.mrf.mxu1  ;;  %v1689_v46 = vsel %vm1650_vm0, %v1686_v40, %v1688_v18  ;;  %v1238_v63 = vadd.f32 %v4254_v52, %v1044_v16  ;;  %v1901_v16 = vadd.s32 192, %v4136_v14 }
 0x15e   : > { %v4334_v35 = vadd.f32 %v1689_v46, %v1234_v59  ;;  %v1046_v37 = vpop.f32.mrf.mxu0 }
 0x15f   : > { %v4336_v5 = vpop.f32.mrf.mxu1  ;;  %v1690_v54 = vrot.slane %v1238_v63, 7  ;;  %v1240_v25 = vadd.f32 %v4260_v57, %v1046_v37  ;;  %v2067_v57 = vand.u32 15, %v1899_v26 }
 0x160   : > { %v1048_v39 = vpop.f32.mrf.mxu0 }
 0x161   : > { %v4340_v61 = vpop.f32.mrf.mxu1  ;;  %v1691_v20 = vsel %vm1650_vm0, %v1688_v18, %v1690_v54  ;;  %v1242_v11 = vadd.f32 %v4264_v49, %v1048_v39  ;;  %vm2315_vm12 = vcmp.eq.s32.totalorder %v2067_v57, 0 }
 0x162   : > { %v2409_v12 = vsel %vm2313_vm11, 0.0, %v1691_v20  ;;  %v1050_v52 = vpop.f32.mrf.mxu0 }
 0x163   : > { %v4344_v9 = vpop.f32.mrf.mxu1  ;;  %v4346_v40 = vadd.f32 %v2409_v12, %v1240_v25  ;;  %v1692_v55 = vrot.slane %v1242_v11, 7  ;;  %v1244_v30 = vadd.f32 %v4268_v0, %v1050_v52 }
 0x164   : > { %v1054_v4 = vpop.f32.mrf.mxu0 }
 0x165   : > { %v4349_v51 = vpop.f32.mrf.mxu1  ;;  %v1693_v36 = vsel %vm1650_vm0, %v1690_v54, %v1692_v55  ;;  %v1248_v43 = vadd.f32 %v4273_v58, %v1054_v4 }
 0x166   : > { %v4353_v45 = vadd.f32 %v1693_v36, %v1244_v30  ;;  %v1056_v49 = vpop.f32.mrf.mxu0 }
 0x167   : > { %v4355_v18 = vpop.f32.mrf.mxu1  ;;  %v1694_v59 = vrot.slane %v1248_v43, 7  ;;  %v1250_v27 = vadd.f32 %v4279_v32, %v1056_v49  ;;  %v2081_v32 = vand.u32 15, %v1901_v16  ;;  %v1903_v43 = vadd.s32 208, %v4136_v14 }
 0x168   : > { %v1058_v0 = vpop.f32.mrf.mxu0 }
 0x169   : > { %v4359_v46 = vpop.f32.mrf.mxu1  ;;  %v1695_v63 = vsel %vm1650_vm0, %v1692_v55, %v1694_v59  ;;  %v1252_v37 = vadd.f32 %v4283_v38, %v1058_v0  ;;  %vm2317_vm13 = vcmp.eq.s32.totalorder %v2081_v32, 0 }
 0x16a   : > { %v2411_v54 = vsel %vm2315_vm12, 0.0, %v1695_v63  ;;  %v1060_v58 = vpop.f32.mrf.mxu0 }
 0x16b   : > { %v4363_v25 = vpop.f32.mrf.mxu1  ;;  %v4365_v26 = vadd.f32 %v2411_v54, %v1250_v27  ;;  %v1696_v39 = vrot.slane %v1252_v37, 7  ;;  %v1254_v20 = vadd.f32 %v4287_v42, %v1060_v58 }
 0x16c   : > { %v1064_v11 = vpop.f32.mrf.mxu0 }
 0x16d   : > { %v4368_v12 = vpop.f32.mrf.mxu1  ;;  %v1697_v52 = vsel %vm1650_vm0, %v1694_v59, %v1696_v39  ;;  %v1258_v30 = vadd.f32 %v4292_v23, %v1064_v11 }
 0x16e   : > { %v4372_v55 = vadd.f32 %v1697_v52, %v1254_v20  ;;  %v1066_v38 = vpop.f32.mrf.mxu0 }
 0x16f   : > { %v4374_v57 = vpop.f32.mrf.mxu1  ;;  %v1698_v4 = vrot.slane %v1258_v30, 7  ;;  %v1260_v36 = vadd.f32 %v4298_v62, %v1066_v38  ;;  %v2095_v62 = vand.u32 15, %v1903_v43 }
 0x170   : > { %v1068_v42 = vpop.f32.mrf.mxu0 }
 0x171   : > { %v4378_v49 = vpop.f32.mrf.mxu1  ;;  %v1699_v27 = vsel %vm1650_vm0, %v1696_v39, %v1698_v4  ;;  %v1262_v59 = vadd.f32 %v4302_v31, %v1068_v42  ;;  %vm2319_vm14 = vcmp.eq.s32.totalorder %v2095_v62, 0 }
 0x172   : > { %v2413_v16 = vsel %vm2317_vm13, 0.0, %v1699_v27  ;;  %v1070_v23 = vpop.f32.mrf.mxu0 }
 0x173   : > { %v4382_v0 = vpop.f32.mrf.mxu1  ;;  %v4384_v63 = vadd.f32 %v2413_v16, %v1260_v36  ;;  %v1700_v37 = vrot.slane %v1262_v59, 7  ;;  %v1264_v54 = vadd.f32 %v4306_v1, %v1070_v23  ;;  %v1905_v36 = vadd.s32 224, %v4136_v14 }
 0x174   : > { %v1074_v58 = vpop.f32.mrf.mxu0 }
 0x175   : > { %v4387_v20 = vpop.f32.mrf.mxu1  ;;  %v1701_v32 = vsel %vm1650_vm0, %v1698_v4, %v1700_v37  ;;  %v1268_v11 = vadd.f32 %v4311_v3, %v1074_v58  ;;  %v2109_v58 = vand.u32 15, %v1905_v36 }
 0x176   : > { %v4391_v39 = vadd.f32 %v1701_v32, %v1264_v54  ;;  %v1076_v31 = vpop.f32.mrf.mxu0 }
 0x177   : > { %v3336_v52 = vpop.f32.mrf.mxu1  ;;  %v1702_v30 = vrot.slane %v1268_v11, 7  ;;  %v1270_v38 = vadd.f32 %v4317_v8, %v1076_v31  ;;  %vm2321_vm15 = vcmp.eq.s32.totalorder %v2109_v58, 0 }
 0x178   : > { %v1078_v42 = vpop.f32.mrf.mxu0 }
 0x179   : > { %v4395_v1 = vpop.f32.mrf.mxu1  ;;  %v1703_v43 = vsel %vm1650_vm0, %v1700_v37, %v1702_v30  ;;  %v1272_v27 = vadd.f32 %v4321_v44, %v1078_v42 }
 0x17a   : > { %v2415_v4 = vsel %vm2319_vm14, 0.0, %v1703_v43  ;;  %v1080_v59 = vpop.f32.mrf.mxu0  ;;  %v1907_v43 = vadd.s32 240, %v4136_v14 }
 0x17b   : > { %v3339_v3 = vpop.f32.mrf.mxu1  ;;  %v4399_v16 = vadd.f32 %v2415_v4, %v1270_v38  ;;  %v1704_v23 = vrot.slane %v1272_v27, 7  ;;  %v1274_v54 = vadd.f32 %v4325_v53, %v1080_v59 }
 0x17c   : > { %v1084_v8 = vpop.f32.mrf.mxu0 }
 0x17d   : > { %v4402_v62 = vpop.f32.mrf.mxu1  ;;  %v1705_v32 = vsel %vm1650_vm0, %v1702_v30, %v1704_v23  ;;  %v1278_v11 = vadd.f32 %v4330_v50, %v1084_v8 }
 0x17e   : > { %v4406_v31 = vadd.f32 %v1705_v32, %v1274_v54  ;;  %v1086_v37 = vpop.f32.mrf.mxu0 }
 0x17f   : > { %v4408_v44 = vpop.f32.mrf.mxu1  ;;  %v1706_v42 = vrot.slane %v1278_v11, 7  ;;  %v1280_v38 = vadd.f32 %v4336_v5, %v1086_v37  ;;  %v2123_v5 = vand.u32 15, %v1907_v43 }
 0x180   : > { %4649 = vst [vmem:[#allocation2_spill] sm:$0xff] %v4406_v31  ;;  %v1088_v53 = vpop.f32.mrf.mxu0 }
 0x181   : > { %v4412_v36 = vpop.f32.mrf.mxu1  ;;  %v1707_v27 = vsel %vm1650_vm0, %v1704_v23, %v1706_v42  ;;  %v1282_v30 = vadd.f32 %v4340_v61, %v1088_v53  ;;  %vm2323_vm1 = vcmp.eq.s32.totalorder %v2123_v5, 0 }
 0x182   : > { %v2417_v4 = vsel %vm2321_vm15, 0.0, %v1707_v27  ;;  %v1090_v50 = vpop.f32.mrf.mxu0 }
 0x183   : > { %v4416_v59 = vpop.f32.mrf.mxu1  ;;  %v4418_v54 = vadd.f32 %v2417_v4, %v1280_v38  ;;  %v1708_v8 = vrot.slane %v1282_v30, 7  ;;  %v1284_v32 = vadd.f32 %v4344_v9, %v1090_v50 }
 0x184   : > { %v1094_v58 = vpop.f32.mrf.mxu0 }
 0x185   : > { %4650 = vst [vmem:[#allocation3_spill] sm:$0xff] %v4418_v54  ;;  %v3347_v11 = vpop.f32.mrf.mxu1  ;;  %v1709_v37 = vsel %vm1650_vm0, %v1706_v42, %v1708_v8  ;;  %v1288_v10 = vadd.f32 %v4349_v51, %v1094_v58 }
 0x186   : > { %v4423_v31 = vadd.f32 %v1709_v37, %v1284_v32  ;;  %v1096_v23 = vpop.f32.mrf.mxu0 }
 0x187   : > { %v3348_v61 = vpop.f32.mrf.mxu1  ;;  %v1710_v53 = vrot.slane %v1288_v10, 7  ;;  %v1290_v27 = vadd.f32 %v4355_v18, %v1096_v23  ;;  %v1878_v10 = vadd.s32 8, %v4136_v14  ;;  %v3337_v18 = vadd.f32 %v3336_v52, %v4387_v20 }
 0x188   : > { %4651 = vst [vmem:[#allocation4_spill] sm:$0xff] %v4423_v31  ;;  %v1098_v38 = vpop.f32.mrf.mxu0  ;;  %v1884_v52 = vadd.s32 56, %v4136_v14 }
 0x189   : > { %v3350_v4 = vpop.f32.mrf.mxu1  ;;  %v1711_v30 = vsel %vm1650_vm0, %v1708_v8, %v1710_v53  ;;  %v1292_v9 = vadd.f32 %v4359_v46, %v1098_v38  ;;  %v1880_v38 = vadd.s32 24, %v4136_v14  ;;  %v1920_v20 = vand.u32 15, %v1878_v10 }
 0x18a   : > { %v2419_v43 = vsel %vm2323_vm1, 0.0, %v1711_v30  ;;  %v1100_v50 = vpop.f32.mrf.mxu0  ;;  %v3331_v30 = vadd.f32 %v4374_v57, %v4368_v12  ;;  %v4449_v57 = vadd.s32 72, %v4136_v14  ;;  %v4452_v10 = vadd.s32 88, %v4136_v14 }
 0x18b   : > { %v3351_v54 = vpop.f32.mrf.mxu1  ;;  %v4428_v42 = vadd.f32 %v2419_v43, %v1290_v27  ;;  %v1712_v51 = vrot.slane %v1292_v9, 7  ;;  %v1294_v32 = vadd.f32 %v4363_v25, %v1100_v50  ;;  %v1882_v27 = vadd.s32 40, %v4136_v14 }
 0x18c   : > { %v3467_v37 = vpop.f32.mrf.mxu0  ;;  %v3340_v25 = vadd.f32 %v3339_v3, %v4395_v1  ;;  %vm4454_vm2 = vcmp.eq.s32.totalorder %v1920_v20, 15 }
 0x18d   : > { %4652 = vst [vmem:[#allocation5_spill] sm:$0xff] %v4428_v42  ;;  %v3353_v58 = vpop.f32.mrf.mxu1  ;;  %v1713_v5 = vsel %vm1650_vm0, %v1710_v53, %v1712_v51  ;;  %v1500_v9 = vadd.f32 %v3467_v37, %v3337_v18  ;;  %v3334_v53 = vadd.f32 %v4382_v0, %v4378_v49  ;;  %vm1779_vm0 = vcmask 1046528  }
 0x18e   : > { %v4434_v23 = vadd.f32 %v1713_v5, %v1294_v32  ;;  %v1491_v46 = vpop.f32.mrf.mxu0  ;;  %v1934_v42 = vand.u32 15, %v1880_v38  ;;  %v1948_v12 = vand.u32 15, %v1882_v27  ;;  %v3349_v18 = vadd.f32 %v3348_v61, %v3347_v11 }
 0x18f   : > { %v3354_v8 = vpop.f32.mrf.mxu1  ;;  %v1492_v51 = vadd.f32 %v3331_v30, %v1491_v46  ;;  %v1783_v1 = vrot.slane %v1500_v9, 1  ;;  %v1962_v30 = vand.u32 15, %v1884_v52  ;;  %v1976_v52 = vand.u32 15, %v4449_v57 }
 0x190   : > { %4653 = vst [vmem:[#allocation6_spill] sm:$0xff] %v4434_v23  ;;  %v3468_v50 = vpop.f32.mrf.mxu0  ;;  %vm4466_vm3 = vcmp.eq.s32.totalorder %v1934_v42, 15  ;;  %vm4473_vm4 = vcmp.eq.s32.totalorder %v1948_v12, 15 }
 0x191   : > { %v4441_v43 = vpop.f32.mrf.mxu1  ;;  %v1503_v32 = vadd.f32 %v3468_v50, %v3340_v25  ;;  %v1780_v25 = vrot.slane %v1492_v51, 1  ;;  %v4460_v50 = vadd.s32 104, %v4136_v14  ;;  %vm4485_vm5 = vcmp.eq.s32.totalorder %v1962_v30, 15 }
 0x192   : > { %v1494_v23 = vpop.f32.mrf.mxu0  ;;  %vm4506_vm6 = vcmp.eq.s32.totalorder %v1976_v52, 15 }
 0x193   : > { %v4446_v5 = vpop.f32.mrf.mxu1  ;;  %v1785_v3 = vrot.slane %v1503_v32, 1  ;;  %v1495_v37 = vadd.f32 %v3334_v53, %v1494_v23  ;;  %v3343_v23 = vadd.f32 %v4408_v44, %v4402_v62  ;;  %v3352_v53 = vadd.f32 %v3351_v54, %v3350_v4 }
 0x194   : > { %v3471_v46 = vpop.f32.mrf.mxu0 }
 0x195   : > { %v3359_v0 = vpop.f32.mrf.mxu1  ;;  %v1786_v38 = vsel %vm1779_vm0, %v1783_v1, %v1785_v3  ;;  %v1781_v27 = vrot.slane %v1495_v37, 1  ;;  %v4464_v9 = vadd.f32 %v3471_v46, %v3349_v18  ;;  %v3346_v46 = vadd.f32 %v4416_v59, %v4412_v36 }
 0x196   : > { %v1507_v61 = vpop.f32.mrf.mxu0  ;;  %v2583_v44 = vadd.f32 %v4172_v29, %v1786_v38  ;;  %v3355_v38 = vadd.f32 %v3354_v8, %v3353_v58 }
 0x197   : > { %v3360_v11 = vpop.f32.mrf.mxu1  ;;  %v1782_v51 = vsel %vm1779_vm0, %v1780_v25, %v1781_v27  ;;  %v1784_v32 = vsel %vm1779_vm0, %v1781_v27, %v1783_v1  ;;  %v1508_v57 = vadd.f32 %v3343_v23, %v1507_v61  ;;  %v1791_v36 = vrot.slane %v4464_v9, 1 }
 0x198   : > { %v2518_v42 = vsel %vm4454_vm2, 0.0, %v1784_v32  ;;  %v2581_v18 = vadd.f32 %v4155_v33, %v1782_v51  ;;  %v3472_v4 = vpop.f32.mrf.mxu0  ;;  %v3361_v51 = vadd.f32 %v3360_v11, %v3359_v0 }
 0x199   : > { %v3362_v54 = vpop.f32.mrf.mxu1  ;;  %v2582_v12 = vadd.f32 %v4162_v41, %v2518_v42  ;;  %v1519_v1 = vadd.f32 %v3472_v4, %v3352_v53  ;;  %v1787_v59 = vrot.slane %v1508_v57, 1  ;;  %v2812_v53 = vmul.f32 %v2583_v44, %v2583_v44 }
 0x19a   : > { %v2810_v33 = vmul.f32 %v2581_v18, %v2581_v18  ;;  %v1510_v49 = vpop.f32.mrf.mxu0 }
 0x19b   : > { %v3363_v41 = vpop.f32.mrf.mxu1  ;;  %v3206_v30 = vpack.c.bf16 %v2582_v12, %v2581_v18  ;;  %v2773_v27 = vadd.f32 %v2582_v12, %v2581_v18  ;;  %v2811_v23 = vmul.f32 %v2582_v12, %v2582_v12  ;;  %v1793_v61 = vrot.slane %v1519_v1, 1 }
 0x19c   : > { %v1788_v58 = vsel %vm1779_vm0, %v1785_v3, %v1787_v59  ;;  %v1511_v8 = vadd.f32 %v3346_v46, %v1510_v49  ;;  %v3475_v42 = vpop.f32.mrf.mxu0  ;;  %v3358_v18 = vadd.f32 %v4446_v5, %v4441_v43  ;;  %v4511_v46 = vadd.s32 120, %v4136_v14 }
 0x19d   : > { %v3365_v32 = vpop.f32.mrf.mxu1  ;;  %3207 = vst [vmem:[%s4495_s29] sm:$0xff] %v3206_v30   ;;  %v2774_v4 = vadd.f32 %v2773_v27, %v2583_v44  ;;  %v2842_v29 = vadd.f32 %v2811_v23, %v2810_v33  ;;  %v2520_v9 = vsel %vm4466_vm3, 0.0, %v1788_v58  ;;  %v1794_v57 = vsel %vm1779_vm0, %v1791_v36, %v1793_v61 }
 0x19e   : > { %v2584_v12 = vadd.f32 %v4181_v47, %v2520_v9  ;;  %v1789_v1 = vrot.slane %v1511_v8, 1  ;;  %v1523_v11 = vpop.f32.mrf.mxu0  ;;  %v3364_v33 = vadd.f32 %v3363_v41, %v3362_v54  ;;  %v1532_v49 = vadd.f32 %v3475_v42, %v3361_v51 }
 0x19f   : > { %v3366_v0 = vpop.f32.mrf.mxu1  ;;  %v2843_v20 = vadd.f32 %v2842_v29, %v2812_v53  ;;  %v1524_v30 = vadd.f32 %v3355_v38, %v1523_v11  ;;  %v2587_v47 = vadd.f32 %v4213_v48, %v1794_v57 }
 0x1a0   : > { %v3211_v27 = vpack.c.bf16 %v2584_v12, %v2583_v44  ;;  %v2775_v23 = vadd.f32 %v2774_v4, %v2584_v12  ;;  %v2813_v43 = vmul.f32 %v2584_v12, %v2584_v12  ;;  %v3476_v58 = vpop.f32.mrf.mxu0  ;;  %v1790_v52 = vsel %vm1779_vm0, %v1787_v59, %v1789_v1 }
 0x1a1   : > { %v3368_v5 = vpop.f32.mrf.mxu1  ;;  %v1792_v8 = vsel %vm1779_vm0, %v1789_v1, %v1791_v36  ;;  %v3367_v9 = vadd.f32 %v3366_v0, %v3365_v32  ;;  %v1795_v62 = vrot.slane %v1524_v30, 1  ;;  %v2585_v29 = vadd.f32 %v4193_v24, %v1790_v52 }
 0x1a2   : > { %3298 = vst [vmem:[%s4495_s29 + $0x8] sm:$0xff] %v3211_v27   ;;  %v2844_v31 = vadd.f32 %v2843_v20, %v2813_v43  ;;  %v2522_v54 = vsel %vm4473_vm4, 0.0, %v1792_v8  ;;  %v1535_v44 = vadd.f32 %v3476_v58, %v3364_v33  ;;  %v1526_v41 = vpop.f32.mrf.mxu0  ;;  %v1799_v53 = vrot.slane %v1532_v49, 1 }
 0x1a3   : > { %v3369_v38 = vpop.f32.mrf.mxu1  ;;  %v2586_v48 = vadd.f32 %v4201_v7, %v2522_v54  ;;  %v1796_v51 = vsel %vm1779_vm0, %v1793_v61, %v1795_v62  ;;  %v1527_v59 = vadd.f32 %v3358_v18, %v1526_v41  ;;  %v4664_v36 = vand.u32 15, %v4452_v10 }
 0x1a4   : > { %v2776_v42 = vadd.f32 %v2775_v23, %v2585_v29  ;;  %v2814_v37 = vmul.f32 %v2585_v29, %v2585_v29  ;;  %v2524_v24 = vsel %vm4485_vm5, 0.0, %v1796_v51  ;;  %v1801_v4 = vrot.slane %v1535_v44, 1  ;;  %v3479_v12 = vpop.f32.mrf.mxu0 }
 0x1a5   : > { %vm4524_vm7 = vcmp.eq.s32.totalorder %v4664_v36, 15  ;;  %v3371_v57 = vpop.f32.mrf.mxu1  ;;  %v3216_v7 = vpack.c.bf16 %v2586_v48, %v2585_v29  ;;  %v2815_v1 = vmul.f32 %v2586_v48, %v2586_v48  ;;  %v2588_v61 = vadd.f32 %v4220_v60, %v2524_v24 }
 0x1a6   : > { %v1797_v18 = vrot.slane %v1527_v59, 1  ;;  %v4667_v10 = vand.u32 15, %v4460_v50  ;;  %v2816_v11 = vmul.f32 %v2587_v47, %v2587_v47  ;;  %v2777_v20 = vadd.f32 %v2776_v42, %v2586_v48  ;;  %v1539_v30 = vpop.f32.mrf.mxu0 }
 0x1a7   : > { %v2845_v25 = vadd.f32 %v2844_v31, %v2814_v37  ;;  %v1802_v33 = vsel %vm1779_vm0, %v1799_v53, %v1801_v4  ;;  %v3372_v49 = vpop.f32.mrf.mxu1  ;;  %3299 = vst [vmem:[%s4495_s29 + $0x10] sm:$0xff] %v3216_v7   ;;  %v3221_v27 = vpack.c.bf16 %v2588_v61, %v2587_v47  ;;  %v2817_v23 = vmul.f32 %v2588_v61, %v2588_v61 }
 0x1a8   : > { %vm4533_vm8 = vcmp.eq.s32.totalorder %v4667_v10, 15  ;;  %v3370_v43 = vadd.f32 %v3369_v38, %v3368_v5  ;;  %v1798_v60 = vsel %vm1779_vm0, %v1795_v62, %v1797_v18  ;;  %v2778_v50 = vadd.f32 %v2777_v20, %v2587_v47  ;;  %v3480_v29 = vpop.f32.mrf.mxu0 }
 0x1a9   : > { %v2846_v58 = vadd.f32 %v2845_v25, %v2815_v1  ;;  %v1800_v52 = vsel %vm1779_vm0, %v1797_v18, %v1799_v53  ;;  %v2589_v8 = vadd.f32 %v4232_v17, %v1798_v60  ;;  %v3374_v54 = vpop.f32.mrf.mxu1  ;;  %3300 = vst [vmem:[%s4495_s29 + $0x18] sm:$0xff] %v3221_v27   ;;  %v2591_v31 = vadd.f32 %v4251_v19, %v1802_v33 }
 0x1aa   : > { %v2526_v44 = vsel %vm4506_vm6, 0.0, %v1800_v52  ;;  %v3373_v41 = vadd.f32 %v3372_v49, %v3371_v57  ;;  %v1540_v48 = vadd.f32 %v3367_v9, %v1539_v30  ;;  %v2779_v51 = vadd.f32 %v2778_v50, %v2588_v61  ;;  %v1542_v59 = vpop.f32.mrf.mxu0 }
 0x1ab   : > { %v2847_v5 = vadd.f32 %v2846_v58, %v2816_v11  ;;  %v2590_v62 = vadd.f32 %v4239_v6, %v2526_v44  ;;  %v2818_v38 = vmul.f32 %v2589_v8, %v2589_v8  ;;  %v3375_v47 = vpop.f32.mrf.mxu1  ;;  %v1543_v42 = vadd.f32 %v3370_v43, %v1542_v59 }
 0x1ac   : > { %v1548_v53 = vadd.f32 %v3479_v12, %v3373_v41  ;;  %v1803_v17 = vrot.slane %v1540_v48, 1  ;;  %v3376_v36 = vadd.f32 %v3375_v47, %v3374_v54  ;;  %v2780_v19 = vadd.f32 %v2779_v51, %v2589_v8  ;;  %v3483_v1 = vpop.f32.mrf.mxu0 }
 0x1ad   : > { %v2848_v37 = vadd.f32 %v2847_v5, %v2817_v23  ;;  %v3226_v24 = vpack.c.bf16 %v2590_v62, %v2589_v8  ;;  %v2819_v7 = vmul.f32 %v2590_v62, %v2590_v62  ;;  %v3377_v3 = vpop.f32.mrf.mxu1  ;;  %v1805_v18 = vrot.slane %v1543_v42, 1 }
 0x1ae   : > { %v1807_v57 = vrot.slane %v1548_v53, 1  ;;  %v1804_v9 = vsel %vm1779_vm0, %v1801_v4, %v1803_v17  ;;  %v1551_v61 = vadd.f32 %v3480_v29, %v3376_v36  ;;  %v2820_v6 = vmul.f32 %v2591_v31, %v2591_v31  ;;  %v1555_v25 = vpop.f32.mrf.mxu0 }
 0x1af   : > { %3301 = vst [vmem:[%s4495_s29 + $0x20] sm:$0xff] %v3226_v24   ;;  %v2781_v10 = vadd.f32 %v2780_v19, %v2590_v62  ;;  %v2849_v11 = vadd.f32 %v2848_v37, %v2818_v38  ;;  %v2528_v12 = vsel %vm4524_vm7, 0.0, %v1804_v9  ;;  %v3378_v20 = vpop.f32.mrf.mxu1  ;;  %v1806_v30 = vsel %vm1779_vm0, %v1803_v17, %v1805_v18 }
 0x1b0   : > { %v2592_v33 = vadd.f32 %v4258_v56, %v2528_v12  ;;  %v1809_v49 = vrot.slane %v1551_v61, 1  ;;  %v1808_v27 = vsel %vm1779_vm0, %v1805_v18, %v1807_v57  ;;  %v2593_v60 = vadd.f32 %v4270_v21, %v1806_v30  ;;  %v3484_v32 = vpop.f32.mrf.mxu0 }
 0x1b1   : > { %v2850_v23 = vadd.f32 %v2849_v11, %v2819_v7  ;;  %v2782_v4 = vadd.f32 %v2781_v10, %v2591_v31  ;;  %v2530_v43 = vsel %vm4533_vm8, 0.0, %v1808_v27  ;;  %v3380_v58 = vpop.f32.mrf.mxu1  ;;  %v2018_v41 = vand.u32 15, %v4511_v46 }
 0x1b2   : > { %v3231_v50 = vpack.c.bf16 %v2592_v33, %v2591_v31  ;;  %v2821_v52 = vmul.f32 %v2592_v33, %v2592_v33  ;;  %v1810_v8 = vsel %vm1779_vm0, %v1807_v57, %v1809_v49  ;;  %v2594_v56 = vadd.f32 %v4277_v28, %v2530_v43  ;;  %v1558_v51 = vpop.f32.mrf.mxu0 }
 0x1b3   : > { %v2783_v54 = vadd.f32 %v2782_v4, %v2592_v33  ;;  %v2851_v29 = vadd.f32 %v2850_v23, %v2820_v6  ;;  %v2822_v44 = vmul.f32 %v2593_v60, %v2593_v60  ;;  %v3381_v48 = vpop.f32.mrf.mxu1  ;;  %v3379_v5 = vadd.f32 %v3378_v20, %v3377_v3 }
 0x1b4   : > { %3302 = vst [vmem:[%s4495_s29 + $0x28] sm:$0xff] %v3231_v50   ;;  %v3236_v0 = vpack.c.bf16 %v2594_v56, %v2593_v60  ;;  %v3382_v21 = vadd.f32 %v3381_v48, %v3380_v58  ;;  %v1894_v62 = vadd.s32 136, %v4136_v14  ;;  %v2595_v38 = vadd.f32 %v4289_v13, %v1810_v8  ;;  %v4568_v24 = vpop.f32.mrf.mxu0 }
 0x1b5   : > { %v2852_v31 = vadd.f32 %v2851_v29, %v2821_v52  ;;  %v2784_v47 = vadd.f32 %v2783_v54, %v2593_v60  ;;  %v2823_v59 = vmul.f32 %v2594_v56, %v2594_v56  ;;  %v3383_v28 = vpop.f32.mrf.mxu1  ;;  %v1556_v53 = vadd.f32 %v3379_v5, %v1555_v25 }
 0x1b6   : > { %3303 = vst [vmem:[%s4495_s29 + $0x30] sm:$0xff] %v3236_v0   ;;  %v1559_v17 = vadd.f32 %v3382_v21, %v1558_v51  ;;  %vm4564_vm9 = vcmp.eq.s32.totalorder %v2018_v41, 15  ;;  %v2032_v57 = vand.u32 15, %v1894_v62  ;;  %v2824_v13 = vmul.f32 %v2595_v38, %v2595_v38  ;;  %v1571_v30 = vpop.f32.mrf.mxu0 }
 0x1b7   : > { %v2785_v36 = vadd.f32 %v2784_v47, %v2594_v56  ;;  %v2853_v42 = vadd.f32 %v2852_v31, %v2822_v44  ;;  %v3384_v37 = vpop.f32.mrf.mxu1  ;;  %v1811_v19 = vrot.slane %v1556_v53, 1  ;;  %v1898_v53 = vadd.s32 168, %v4136_v14 }
 0x1b8   : > { %v1813_v7 = vrot.slane %v1559_v17, 1  ;;  %v3385_v3 = vadd.f32 %v3384_v37, %v3383_v28  ;;  %vm4576_vm10 = vcmp.eq.s32.totalorder %v2032_v57, 15  ;;  %v3488_v54 = vpop.f32.mrf.mxu0 }
 0x1b9   : > { %v2854_v9 = vadd.f32 %v2853_v42, %v2823_v59  ;;  %v2786_v61 = vadd.f32 %v2785_v36, %v2595_v38  ;;  %v3386_v18 = vpop.f32.mrf.mxu1  ;;  %v1812_v6 = vsel %vm1779_vm0, %v1809_v49, %v1811_v19 }
 0x1ba   : > { %v1814_v10 = vsel %vm1779_vm0, %v1811_v19, %v1813_v7  ;;  %v1564_v11 = vadd.f32 %v3483_v1, %v3385_v3  ;;  %v2532_v12 = vsel %vm4564_vm9, 0.0, %v1812_v6  ;;  %v1896_v1 = vadd.s32 152, %v4136_v14  ;;  %v1574_v28 = vpop.f32.mrf.mxu0 }
 0x1bb   : > { %v2855_v20 = vadd.f32 %v2854_v9, %v2824_v13  ;;  %v2597_v25 = vadd.f32 %v4308_v22, %v1814_v10  ;;  %v3387_v33 = vpop.f32.mrf.mxu1  ;;  %v2596_v27 = vadd.f32 %v4296_v34, %v2532_v12  ;;  %v2060_v13 = vand.u32 15, %v1898_v53 }
 0x1bc   : > { %v1815_v23 = vrot.slane %v1564_v11, 1  ;;  %v3388_v49 = vadd.f32 %v3387_v33, %v3386_v18  ;;  %v2046_v5 = vand.u32 15, %v1896_v1  ;;  %v4591_v9 = vpop.f32.mrf.mxu0 }
 0x1bd   : > { %v2826_v43 = vmul.f32 %v2597_v25, %v2597_v25  ;;  %v3389_v60 = vpop.f32.mrf.mxu1  ;;  %v3241_v58 = vpack.c.bf16 %v2596_v27, %v2595_v38  ;;  %v2787_v50 = vadd.f32 %v2786_v61, %v2596_v27  ;;  %v2825_v52 = vmul.f32 %v2596_v27, %v2596_v27 }
 0x1be   : > { %v1816_v22 = vsel %vm1779_vm0, %v1813_v7, %v1815_v23  ;;  %v1567_v56 = vadd.f32 %v3484_v32, %v3388_v49  ;;  %vm2440_vm11 = vcmp.eq.s32.totalorder %v2046_v5, 15  ;;  %v1587_v4 = vpop.f32.mrf.mxu0  ;;  %vm2442_vm12 = vcmp.eq.s32.totalorder %v2060_v13, 15 }
 0x1bf   : > { %v2534_v8 = vsel %vm4576_vm10, 0.0, %v1816_v22  ;;  %v3390_v34 = vpop.f32.mrf.mxu1  ;;  %3304 = vst [vmem:[%s4495_s29 + $0x38] sm:$0xff] %v3241_v58   ;;  %v2856_v29 = vadd.f32 %v2855_v20, %v2825_v52  ;;  %v2788_v44 = vadd.f32 %v2787_v50, %v2597_v25  ;;  %v1900_v50 = vadd.s32 184, %v4136_v14 }
 0x1c0   : > { %v2598_v41 = vadd.f32 %v4315_v2, %v2534_v8  ;;  %v3391_v48 = vadd.f32 %v3390_v34, %v3389_v60  ;;  %v1817_v51 = vrot.slane %v1567_v56, 1 }
 0x1c1   : > { %v3392_v0 = vpop.f32.mrf.mxu1  ;;  %v2857_v21 = vadd.f32 %v2856_v29, %v2826_v43 }
 0x1c2   : > { %v3246_v62 = vpack.c.bf16 %v2598_v41, %v2597_v25  ;;  %v2789_v31 = vadd.f32 %v2788_v44, %v2598_v41  ;;  %v2827_v38 = vmul.f32 %v2598_v41, %v2598_v41  ;;  %v1818_v47 = vsel %vm1779_vm0, %v1815_v23, %v1817_v51 }
 0x1c3   : > { %v1572_v59 = vadd.f32 %v3391_v48, %v1571_v30  ;;  %v3393_v32 = vpop.f32.mrf.mxu1  ;;  %v2599_v36 = vadd.f32 %v4327_v15, %v1818_v47  ;;  %v2074_v48 = vand.u32 15, %v1900_v50 }
 0x1c4   : > { %3305 = vst [vmem:[%s4495_s29 + $0x40] sm:$0xff] %v3246_v62   ;;  %v2858_v17 = vadd.f32 %v2857_v21, %v2827_v38  ;;  %v3394_v2 = vadd.f32 %v3393_v32, %v3392_v0  ;;  %v1902_v32 = vadd.s32 200, %v4136_v14 }
 0x1c5   : > { %v1819_v42 = vrot.slane %v1572_v59, 1  ;;  %v3395_v46 = vpop.f32.mrf.mxu1  ;;  %v2790_v37 = vadd.f32 %v2789_v31, %v2599_v36  ;;  %v2828_v19 = vmul.f32 %v2599_v36, %v2599_v36  ;;  %vm2444_vm13 = vcmp.eq.s32.totalorder %v2074_v48, 15 }
 0x1c6   : > { %v1575_v7 = vadd.f32 %v3394_v2, %v1574_v28 }
 0x1c7   : > { %v1820_v3 = vsel %vm1779_vm0, %v1817_v51, %v1819_v42  ;;  %v3396_v57 = vpop.f32.mrf.mxu1  ;;  %v2859_v61 = vadd.f32 %v2858_v17, %v2828_v19 }
 0x1c8   : > { %v2536_v18 = vsel %vm2440_vm11, 0.0, %v1820_v3  ;;  %v1821_v6 = vrot.slane %v1575_v7, 1  ;;  %v3397_v10 = vadd.f32 %v3396_v57, %v3395_v46  ;;  %v2088_v7 = vand.u32 15, %v1902_v32 }
 0x1c9   : > { %v2600_v15 = vadd.f32 %v4334_v35, %v2536_v18  ;;  %v3398_v11 = vpop.f32.mrf.mxu1 }
 0x1ca   : > { %v1822_v12 = vsel %vm1779_vm0, %v1819_v42, %v1821_v6  ;;  %v1580_v20 = vadd.f32 %v4568_v24, %v3397_v10  ;;  %vm2446_vm14 = vcmp.eq.s32.totalorder %v2088_v7, 15 }
 0x1cb   : > { %v3251_v25 = vpack.c.bf16 %v2600_v15, %v2599_v36  ;;  %v2791_v33 = vadd.f32 %v2790_v37, %v2600_v15  ;;  %v2829_v30 = vmul.f32 %v2600_v15, %v2600_v15  ;;  %v2601_v27 = vadd.f32 %v4346_v40, %v1822_v12  ;;  %v3399_v23 = vpop.f32.mrf.mxu1  ;;  %v3492_v40 = vpop.f32.mrf.mxu0 }
 0x1cc   : > { %v1823_v49 = vrot.slane %v1580_v20, 1  ;;  %v3400_v43 = vadd.f32 %v3399_v23, %v3398_v11 }
 0x1cd   : > { %3306 = vst [vmem:[%s4495_s29 + $0x48] sm:$0xff] %v3251_v25   ;;  %v2860_v60 = vadd.f32 %v2859_v61, %v2829_v30  ;;  %v2792_v1 = vadd.f32 %v2791_v33, %v2601_v27  ;;  %v2830_v58 = vmul.f32 %v2601_v27, %v2601_v27  ;;  %v3401_v35 = vpop.f32.mrf.mxu1  ;;  %v1590_v38 = vpop.f32.mrf.mxu0 }
 0x1ce   : > { %v1824_v52 = vsel %vm1779_vm0, %v1821_v6, %v1823_v49  ;;  %v1583_v24 = vadd.f32 %v3488_v54, %v3400_v43 }
 0x1cf   : > { %v2861_v22 = vadd.f32 %v2860_v60, %v2830_v58  ;;  %v2538_v8 = vsel %vm2442_vm12, 0.0, %v1824_v52  ;;  %v3402_v56 = vpop.f32.mrf.mxu1  ;;  %v3495_v13 = vpop.f32.mrf.mxu0 }
 0x1d0   : > { %v2602_v34 = vadd.f32 %v4353_v45, %v2538_v8  ;;  %v1825_v29 = vrot.slane %v1583_v24, 1  ;;  %v3403_v44 = vadd.f32 %v3402_v56, %v3401_v35 }
 0x1d1   : > { %v3404_v41 = vpop.f32.mrf.mxu1  ;;  %v1603_v23 = vpop.f32.mrf.mxu0 }
 0x1d2   : > { %v3256_v51 = vpack.c.bf16 %v2602_v34, %v2601_v27  ;;  %v2793_v0 = vadd.f32 %v2792_v1, %v2602_v34  ;;  %v2831_v5 = vmul.f32 %v2602_v34, %v2602_v34  ;;  %v1826_v21 = vsel %vm1779_vm0, %v1823_v49, %v1825_v29 }
 0x1d3   : > { %v2603_v62 = vadd.f32 %v4365_v26, %v1826_v21  ;;  %v1588_v31 = vadd.f32 %v3403_v44, %v1587_v4  ;;  %v3405_v54 = vpop.f32.mrf.mxu1  ;;  %v1904_v4 = vadd.s32 216, %v4136_v14  ;;  %v3496_v24 = vpop.f32.mrf.mxu0 }
 0x1d4   : > { %3307 = vst [vmem:[%s4495_s29 + $0x50] sm:$0xff] %v3256_v51   ;;  %v2862_v47 = vadd.f32 %v2861_v22, %v2831_v5  ;;  %v3406_v59 = vadd.f32 %v3405_v54, %v3404_v41  ;;  %v1906_v51 = vadd.s32 232, %v4136_v14 }
 0x1d5   : > { %v2794_v45 = vadd.f32 %v2793_v0, %v2603_v62  ;;  %v2832_v28 = vmul.f32 %v2603_v62, %v2603_v62  ;;  %v1827_v53 = vrot.slane %v1588_v31, 1  ;;  %v3407_v17 = vpop.f32.mrf.mxu1  ;;  %v2102_v50 = vand.u32 15, %v1904_v4  ;;  %v1606_v21 = vpop.f32.mrf.mxu0 }
 0x1d6   : > { %v1591_v36 = vadd.f32 %v3406_v59, %v1590_v38 }
 0x1d7   : > { %v2863_v2 = vadd.f32 %v2862_v47, %v2832_v28  ;;  %v1828_v42 = vsel %vm1779_vm0, %v1825_v29, %v1827_v53  ;;  %v3408_v46 = vpop.f32.mrf.mxu1  ;;  %vm2448_vm15 = vcmp.eq.s32.totalorder %v2102_v50, 15  ;;  %v4674_v28 = vld [vmem:[#allocation2_spill] sm:$0xff] }
 0x1d8   : > { %v2540_v37 = vsel %vm2444_vm13, 0.0, %v1828_v42  ;;  %v1829_v26 = vrot.slane %v1591_v36, 1  ;;  %v3409_v19 = vadd.f32 %v3408_v46, %v3407_v17  ;;  %v1908_v36 = vadd.s32 248, %v4136_v14 }
 0x1d9   : > { %v2604_v3 = vadd.f32 %v4372_v55, %v2540_v37  ;;  %v3410_v57 = vpop.f32.mrf.mxu1 }
 0x1da   : > { %v1830_v61 = vsel %vm1779_vm0, %v1827_v53, %v1829_v26  ;;  %v1596_v18 = vadd.f32 %v4591_v9, %v3409_v19  ;;  %v4675_v19 = vld [vmem:[#allocation3_spill] sm:$0xff] }
 0x1db   : > { %v3261_v6 = vpack.c.bf16 %v2604_v3, %v2603_v62  ;;  %v2795_v10 = vadd.f32 %v2794_v45, %v2604_v3  ;;  %v2833_v15 = vmul.f32 %v2604_v3, %v2604_v3  ;;  %v2605_v11 = vadd.f32 %v4384_v63, %v1830_v61  ;;  %v3411_v12 = vpop.f32.mrf.mxu1 }
 0x1dc   : > { %v1831_v20 = vrot.slane %v1596_v18, 1  ;;  %v3412_v25 = vadd.f32 %v3411_v12, %v3410_v57  ;;  %v2116_v45 = vand.u32 15, %v1906_v51 }
 0x1dd   : > { %3308 = vst [vmem:[%s4495_s29 + $0x58] sm:$0xff] %v3261_v6   ;;  %v2864_v33 = vadd.f32 %v2863_v2, %v2833_v15  ;;  %v2796_v30 = vadd.f32 %v2795_v10, %v2605_v11  ;;  %v2834_v27 = vmul.f32 %v2605_v11, %v2605_v11  ;;  %v3413_v55 = vpop.f32.mrf.mxu1  ;;  %v2130_v15 = vand.u32 15, %v1908_v36 }
 0x1de   : > { %v1832_v49 = vsel %vm1779_vm0, %v1829_v26, %v1831_v20  ;;  %v1599_v9 = vadd.f32 %v3492_v40, %v3412_v25  ;;  %vm2450_vm1 = vcmp.eq.s32.totalorder %v2116_v45, 15  ;;  %v4676_v25 = vld [vmem:[#allocation4_spill] sm:$0xff] }
 0x1df   : > { %v2865_v43 = vadd.f32 %v2864_v33, %v2834_v27  ;;  %v2542_v60 = vsel %vm2446_vm14, 0.0, %v1832_v49  ;;  %v3414_v1 = vpop.f32.mrf.mxu1  ;;  %vm2452_vm2 = vcmp.eq.s32.totalorder %v2130_v15, 15 }
 0x1e0   : > { %v2606_v63 = vadd.f32 %v4391_v39, %v2542_v60  ;;  %v1833_v58 = vrot.slane %v1599_v9, 1  ;;  %v3415_v35 = vadd.f32 %v3414_v1, %v3413_v55  ;;  %v4677_v9 = vld [vmem:[#allocation5_spill] sm:$0xff] }
 0x1e1   : > { %v3416_v52 = vpop.f32.mrf.mxu1 }
 0x1e2   : > { %v3266_v22 = vpack.c.bf16 %v2606_v63, %v2605_v11  ;;  %v2797_v8 = vadd.f32 %v2796_v30, %v2606_v63  ;;  %v2835_v56 = vmul.f32 %v2606_v63, %v2606_v63  ;;  %v1834_v34 = vsel %vm1779_vm0, %v1831_v20, %v1833_v58  ;;  %v4678_v63 = vld [vmem:[#allocation6_spill] sm:$0xff] }
 0x1e3   : > { %v2607_v29 = vadd.f32 %v4399_v16, %v1834_v34  ;;  %v1604_v44 = vadd.f32 %v3415_v35, %v1603_v23  ;;  %v3417_v40 = vpop.f32.mrf.mxu1 }
 0x1e4   : > { %3309 = vst [vmem:[%s4495_s29 + $0x60] sm:$0xff] %v3266_v22   ;;  %v2866_v41 = vadd.f32 %v2865_v43, %v2835_v56  ;;  %v3418_v48 = vadd.f32 %v3417_v40, %v3416_v52 }
 0x1e5   : > { %v2798_v39 = vadd.f32 %v2797_v8, %v2607_v29  ;;  %v2836_v0 = vmul.f32 %v2607_v29, %v2607_v29  ;;  %v1835_v5 = vrot.slane %v1604_v44, 1  ;;  %v3419_v62 = vpop.f32.mrf.mxu1 }
 0x1e6   : > { %v1607_v31 = vadd.f32 %v3418_v48, %v1606_v21  ;;  %v3612_v48 = vmov 1966171168  }
 0x1e7   : > { %v2867_v54 = vadd.f32 %v2866_v41, %v2836_v0  ;;  %v1836_v38 = vsel %vm1779_vm0, %v1833_v58, %v1835_v5  ;;  %v3420_v47 = vpop.f32.mrf.mxu1  ;;  %v2883_v51 = vunpack.c.l.s4 %v3612_v48 }
 0x1e8   : > { %v2544_v59 = vsel %vm2448_vm15, 0.0, %v1836_v38  ;;  %v1837_v16 = vrot.slane %v1607_v31, 1  ;;  %v3421_v32 = vadd.f32 %v3420_v47, %v3419_v62 }
 0x1e9   : > { %v2608_v53 = vadd.f32 %v4674_v28, %v2544_v59  ;;  %v3422_v17 = vpop.f32.mrf.mxu1  ;;  %v2884_v62 = vunpack.c.0.s8 %v2883_v51 }
 0x1ea   : > { %v1838_v2 = vsel %vm1779_vm0, %v1835_v5, %v1837_v16  ;;  %v1612_v42 = vadd.f32 %v3495_v13, %v3421_v32  ;;  %v4679_v32 = vlaneseq }
 0x1eb   : > { %v3271_v46 = vpack.c.bf16 %v2608_v53, %v2607_v29  ;;  %v2799_v37 = vadd.f32 %v2798_v39, %v2608_v53  ;;  %v2837_v26 = vmul.f32 %v2608_v53, %v2608_v53  ;;  %v2609_v7 = vadd.f32 %v4675_v19, %v1838_v2  ;;  %v3423_v3 = vpop.f32.mrf.mxu1 }
 0x1ec   : > { %v1839_v57 = vrot.slane %v1612_v42, 1  ;;  %v3424_v61 = vadd.f32 %v3423_v3, %v3422_v17  ;;  %v2887_v47 = vsub.s32 %v2884_v62, %v4136_v14 }
 0x1ed   : > { %3310 = vst [vmem:[%s4495_s29 + $0x68] sm:$0xff] %v3271_v46   ;;  %v2868_v18 = vadd.f32 %v2867_v54, %v2837_v26  ;;  %v2800_v6 = vadd.f32 %v2799_v37, %v2609_v7  ;;  %v2838_v10 = vmul.f32 %v2609_v7, %v2609_v7 }
 0x1ee   : > { %v1840_v11 = vsel %vm1779_vm0, %v1837_v16, %v1839_v57  ;;  %v1615_v12 = vadd.f32 %v3496_v24, %v3424_v61 }
 0x1ef   : > { %v2869_v20 = vadd.f32 %v2868_v18, %v2838_v10  ;;  %v2546_v13 = vsel %vm2450_vm1, 0.0, %v1840_v11 }
 0x1f0   : > { %v2610_v33 = vadd.f32 %v4676_v25, %v2546_v13  ;;  %v1841_v30 = vrot.slane %v1615_v12, 1 }
 0x1f2   : > { %v3276_v27 = vpack.c.bf16 %v2610_v33, %v2609_v7  ;;  %v2801_v55 = vadd.f32 %v2800_v6, %v2610_v33  ;;  %v2839_v23 = vmul.f32 %v2610_v33, %v2610_v33  ;;  %v1842_v4 = vsel %vm1779_vm0, %v1839_v57, %v1841_v30 }
 0x1f3   : > { %v1875_v49 = vsel %vm1779_vm0, %v1841_v30, 0.0  ;;  %v2611_v43 = vadd.f32 %v4677_v9, %v1842_v4  ;;  %vm2899_vm0 = vcmp.lt.s32.totalorder %v4679_v32, 256 }
 0x1f4   : > { %3311 = vst [vmem:[%s4495_s29 + $0x70] sm:$0xff] %v3276_v27   ;;  %v2870_v60 = vadd.f32 %v2869_v20, %v2839_v23  ;;  %v2548_v1 = vsel %vm2452_vm2, 0.0, %v1875_v49 }
 0x1f5   : > { %v2612_v58 = vadd.f32 %v4678_v63, %v2548_v1  ;;  %v2802_v35 = vadd.f32 %v2801_v55, %v2611_v43  ;;  %v2840_v50 = vmul.f32 %v2611_v43, %v2611_v43 }
 0x1f7   : > { %v3281_v52 = vpack.c.bf16 %v2612_v58, %v2611_v43  ;;  %v2803_v24 = vadd.f32 %v2802_v35, %v2612_v58  ;;  %v2841_v22 = vmul.f32 %v2612_v58, %v2612_v58  ;;  %v2871_v8 = vadd.f32 %v2870_v60, %v2840_v50 }
 0x1f9   : > { %3312 = vst [vmem:[%s4495_s29 + $0x78] sm:$0xff] %v3281_v52   ;;  %v2804_v56 = vrot.slane %v2803_v24, 4  ;;  %v2872_v34 = vadd.f32 %v2871_v8, %v2841_v22 }
 0x1fb   : > { %v2805_v29 = vadd.f32 %v2804_v56, %v2803_v24  ;;  %v2873_v44 = vrot.slane %v2872_v34, 4 }
 0x1fd   : > { %v2806_v40 = vrot.slane %v2805_v29, 2  ;;  %v2874_v41 = vadd.f32 %v2873_v44, %v2872_v34 }
 0x1ff   : > { %v2807_v39 = vadd.f32 %v2806_v40, %v2805_v29  ;;  %v2875_v0 = vrot.slane %v2874_v41, 2 }
 0x201   : > { %v2808_v5 = vrot.slane %v2807_v39, 1  ;;  %v2876_v21 = vadd.f32 %v2875_v0, %v2874_v41 }
 0x203   : > { %v2877_v31 = vrot.slane %v2876_v21, 1  ;;  %v2809_v54 = vadd.f32 %v2808_v5, %v2807_v39 }
 0x205   : > { %v2878_v38 = vadd.f32 %v2877_v31, %v2876_v21 }
 0x207   : > { %v2881_v59 = vcombine.low %v2809_v54, %v2878_v38 }
 0x209   : > { %v2888_v16 = vrot.slane %v2881_v59, %v2887_v47 }
 0x20b   : > { %v2895_v45 = vrot.slane %v2888_v16, %v2887_v47 }
 0x20d   : > { %2901 = vst.msk [vmem:[%s238_s6] sm:$0x3] %vm2899_vm0, %v2895_v45 }
 0x20e PF: > { %s16_s18 = sadd.s32 1, %s3609_s18  }
 0x20f   : > { %p13_p5 = scmp.ge.s32.totalorder %s16_s18, 4  }
 0x211   :  { %15 = sbr.rel (!%p13_p5) target bundleno = 1 (0x1), region = 78 }

// kernel: bottleneck_forward.7
= control target key start
LH: loop header
LB: loop body
LE: loop exit
PB: predicated region body
PF: predicated region fallthrough
CT: control target
= control target key end

     0   :  { %s1351_s0 = inlined_call_operand.vmem [shape: bf16[512,128], index: 0, kind: input, shape index: {}]   ;;  %s1352_s2 = inlined_call_operand.vmem [shape: f32[1,128], index: 2, kind: input, shape index: {}]   ;;  %s1353_s3 = inlined_call_operand.vmem [shape: f32[1,128], index: 3, kind: input, shape index: {}]   ;;  %s1354_s1 = inlined_call_operand.vmem [shape: f32[512,128], index: 1, kind: input, shape index: {}]   ;;  %s1355_s4 = inlined_call_operand.vmem [shape: f32[512,128], index: 4, kind: output, shape index: {}]  }
   0x1   :  { %v550_v0 = vld [vmem:[%s1351_s0] sm:$0xff]   ;;  %v677_v4 = vld [vmem:[%s1351_s0 + $0x8] sm:$0xff]   ;;  %v678_v8 = vld [vmem:[%s1351_s0 + $0x10] sm:$0xff]  }
   0x2   :  { %v739_v1 = vld [vmem:[%s1352_s2] ss:$0 sm:$0xff]  ;;  %v551_v2 = vunpack.c.l.bf16 %v550_v0  ;;  %v552_v3 = vunpack.c.h.bf16 %v550_v0  ;;  %v555_v6 = vunpack.c.l.bf16 %v677_v4  ;;  %v556_v7 = vunpack.c.h.bf16 %v677_v4  ;;  %v679_v13 = vld [vmem:[%s1351_s0 + $0x18] sm:$0xff]   ;;  %v288_v15 = vld [vmem:[%s1354_s1 + $0x8] sm:$0xff] }
   0x3   :  { %v747_v5 = vld [vmem:[%s1353_s3] ss:$0 sm:$0xff]  ;;  %v559_v11 = vunpack.c.l.bf16 %v678_v8  ;;  %v560_v12 = vunpack.c.h.bf16 %v678_v8  ;;  %v563_v18 = vunpack.c.l.bf16 %v679_v13  ;;  %v564_v19 = vunpack.c.h.bf16 %v679_v13  ;;  %v289_v22 = vld [vmem:[%s1354_s1 + $0x10] sm:$0xff]  ;;  %v290_v23 = vld [vmem:[%s1354_s1 + $0x18] sm:$0xff] }
   0x4   :  { %v152_v9 = vmul.f32 %v551_v2, %v739_v1  ;;  %v153_v10 = vmul.f32 %v552_v3, %v739_v1  ;;  %v287_v14 = vld [vmem:[%s1354_s1] sm:$0xff]  ;;  %v154_v16 = vmul.f32 %v555_v6, %v739_v1  ;;  %v155_v17 = vmul.f32 %v556_v7, %v739_v1  ;;  %v292_v29 = vld [vmem:[%s1354_s1 + $0x28] sm:$0xff]  ;;  %v293_v36 = vld [vmem:[%s1354_s1 + $0x30] sm:$0xff] }
   0x5   :  { %v156_v24 = vmul.f32 %v559_v11, %v739_v1  ;;  %v157_v25 = vmul.f32 %v560_v12, %v739_v1  ;;  %v291_v28 = vld [vmem:[%s1354_s1 + $0x20] sm:$0xff]  ;;  %v158_v30 = vmul.f32 %v563_v18, %v739_v1  ;;  %v159_v31 = vmul.f32 %v564_v19, %v739_v1  ;;  %v294_v37 = vld [vmem:[%s1354_s1 + $0x38] sm:$0xff]  ;;  %v681_v47 = vld [vmem:[%s1351_s0 + $0x28] sm:$0xff]  }
   0x6   :  { %v223_v20 = vadd.f32 %v747_v5, %v152_v9  ;;  %v224_v21 = vadd.f32 %v747_v5, %v153_v10  ;;  %v225_v26 = vadd.f32 %v747_v5, %v154_v16  ;;  %v226_v27 = vadd.f32 %v747_v5, %v155_v17  ;;  %v680_v42 = vld [vmem:[%s1351_s0 + $0x20] sm:$0xff]   ;;  %v682_v52 = vld [vmem:[%s1351_s0 + $0x30] sm:$0xff]   ;;  %v683_v57 = vld [vmem:[%s1351_s0 + $0x38] sm:$0xff]  }
   0x7   :  { %v227_v34 = vadd.f32 %v747_v5, %v156_v24  ;;  %v228_v35 = vadd.f32 %v747_v5, %v157_v25  ;;  %v229_v40 = vadd.f32 %v747_v5, %v158_v30  ;;  %v230_v41 = vadd.f32 %v747_v5, %v159_v31  ;;  %v295_v3 = vld [vmem:[%s1354_s1 + $0x40] sm:$0xff]  ;;  %v296_v4 = vld [vmem:[%s1354_s1 + $0x48] sm:$0xff]  ;;  %v297_v12 = vld [vmem:[%s1354_s1 + $0x50] sm:$0xff] }
   0x8   :  { %v351_v32 = vadd.f32 %v287_v14, %v223_v20  ;;  %v352_v33 = vadd.f32 %v288_v15, %v224_v21  ;;  %v353_v38 = vadd.f32 %v289_v22, %v225_v26  ;;  %v354_v39 = vadd.f32 %v290_v23, %v226_v27  ;;  %v298_v13 = vld [vmem:[%s1354_s1 + $0x58] sm:$0xff]  ;;  %v299_v18 = vld [vmem:[%s1354_s1 + $0x60] sm:$0xff]  ;;  %v300_v19 = vld [vmem:[%s1354_s1 + $0x68] sm:$0xff] }
   0x9   :  { %v355_v45 = vadd.f32 %v291_v28, %v227_v34  ;;  %v356_v46 = vadd.f32 %v292_v29, %v228_v35  ;;  %v357_v50 = vadd.f32 %v293_v36, %v229_v40  ;;  %v358_v51 = vadd.f32 %v294_v37, %v230_v41  ;;  %v301_v26 = vld [vmem:[%s1354_s1 + $0x70] sm:$0xff]  ;;  %v302_v27 = vld [vmem:[%s1354_s1 + $0x78] sm:$0xff]  ;;  %v685_v37 = vld [vmem:[%s1351_s0 + $0x48] sm:$0xff]  }
   0xa   :  { %v415_v43 = vmax.f32 %v351_v32, 0.0  ;;  %v416_v44 = vmax.f32 %v352_v33, 0.0  ;;  %v417_v48 = vmax.f32 %v353_v38, 0.0  ;;  %v418_v49 = vmax.f32 %v354_v39, 0.0  ;;  %v684_v32 = vld [vmem:[%s1351_s0 + $0x40] sm:$0xff]  }
   0xb   :  { %v419_v53 = vmax.f32 %v355_v45, 0.0  ;;  %v420_v54 = vmax.f32 %v356_v46, 0.0  ;;  %v567_v55 = vunpack.c.l.bf16 %v680_v42  ;;  %v568_v56 = vunpack.c.h.bf16 %v680_v42  ;;  %v686_v42 = vld [vmem:[%s1351_s0 + $0x50] sm:$0xff]  }
   0xc   :  { %479 = vst [vmem:[%s1355_s4] sm:$0xff] %v415_v43  ;;  %480 = vst [vmem:[%s1355_s4 + $0x8] sm:$0xff] %v416_v44  ;;  %v421_v58 = vmax.f32 %v357_v50, 0.0  ;;  %v422_v59 = vmax.f32 %v358_v51, 0.0  ;;  %v571_v60 = vunpack.c.l.bf16 %v681_v47  ;;  %v572_v61 = vunpack.c.h.bf16 %v681_v47  ;;  %v687_v47 = vld [vmem:[%s1351_s0 + $0x58] sm:$0xff]  }
   0xd   :  { %481 = vst [vmem:[%s1355_s4 + $0x10] sm:$0xff] %v417_v48  ;;  %482 = vst [vmem:[%s1355_s4 + $0x18] sm:$0xff] %v418_v49  ;;  %v160_v62 = vmul.f32 %v567_v55, %v739_v1  ;;  %v161_v63 = vmul.f32 %v568_v56, %v739_v1  ;;  %v575_v0 = vunpack.c.l.bf16 %v682_v52  ;;  %v576_v2 = vunpack.c.h.bf16 %v682_v52  ;;  %v303_v56 = vld [vmem:[%s1354_s1 + $0x80] sm:$0xff] }
   0xe   :  { %483 = vst [vmem:[%s1355_s4 + $0x20] sm:$0xff] %v419_v53  ;;  %484 = vst [vmem:[%s1355_s4 + $0x28] sm:$0xff] %v420_v54  ;;  %v162_v6 = vmul.f32 %v571_v60, %v739_v1  ;;  %v163_v7 = vmul.f32 %v572_v61, %v739_v1  ;;  %v579_v8 = vunpack.c.l.bf16 %v683_v57  ;;  %v580_v9 = vunpack.c.h.bf16 %v683_v57  ;;  %v304_v57 = vld [vmem:[%s1354_s1 + $0x88] sm:$0xff] }
   0xf   :  { %485 = vst [vmem:[%s1355_s4 + $0x30] sm:$0xff] %v421_v58  ;;  %486 = vst [vmem:[%s1355_s4 + $0x38] sm:$0xff] %v422_v59  ;;  %v231_v10 = vadd.f32 %v747_v5, %v160_v62  ;;  %v232_v11 = vadd.f32 %v747_v5, %v161_v63  ;;  %v164_v14 = vmul.f32 %v575_v0, %v739_v1  ;;  %v583_v45 = vunpack.c.l.bf16 %v684_v32  ;;  %v305_v0 = vld [vmem:[%s1354_s1 + $0x90] sm:$0xff] }
  0x10   :  { %v165_v15 = vmul.f32 %v576_v2, %v739_v1  ;;  %v233_v16 = vadd.f32 %v747_v5, %v162_v6  ;;  %v234_v17 = vadd.f32 %v747_v5, %v163_v7  ;;  %v166_v20 = vmul.f32 %v579_v8, %v739_v1  ;;  %v306_v2 = vld [vmem:[%s1354_s1 + $0x98] sm:$0xff]  ;;  %v307_v8 = vld [vmem:[%s1354_s1 + $0xa0] sm:$0xff] }
  0x11   :  { %v167_v21 = vmul.f32 %v580_v9, %v739_v1  ;;  %v359_v22 = vadd.f32 %v295_v3, %v231_v10  ;;  %v360_v23 = vadd.f32 %v296_v4, %v232_v11  ;;  %v235_v24 = vadd.f32 %v747_v5, %v164_v14  ;;  %v308_v9 = vld [vmem:[%s1354_s1 + $0xa8] sm:$0xff] }
  0x12   :  { %v236_v25 = vadd.f32 %v747_v5, %v165_v15  ;;  %v361_v28 = vadd.f32 %v297_v12, %v233_v16  ;;  %v362_v29 = vadd.f32 %v298_v13, %v234_v17  ;;  %v237_v30 = vadd.f32 %v747_v5, %v166_v20  ;;  %v309_v16 = vld [vmem:[%s1354_s1 + $0xb0] sm:$0xff]  ;;  %v310_v17 = vld [vmem:[%s1354_s1 + $0xb8] sm:$0xff] }
  0x13   :  { %v238_v31 = vadd.f32 %v747_v5, %v167_v21  ;;  %v423_v33 = vmax.f32 %v359_v22, 0.0  ;;  %v424_v34 = vmax.f32 %v360_v23, 0.0  ;;  %v363_v35 = vadd.f32 %v299_v18, %v235_v24  ;;  %v688_v22 = vld [vmem:[%s1351_s0 + $0x60] sm:$0xff]  }
  0x14   :  { %v364_v36 = vadd.f32 %v300_v19, %v236_v25  ;;  %v425_v38 = vmax.f32 %v361_v28, 0.0  ;;  %v426_v39 = vmax.f32 %v362_v29, 0.0  ;;  %v365_v40 = vadd.f32 %v301_v26, %v237_v30 }
  0x15   :  { %v366_v41 = vadd.f32 %v302_v27, %v238_v31  ;;  %487 = vst [vmem:[%s1355_s4 + $0x40] sm:$0xff] %v423_v33  ;;  %488 = vst [vmem:[%s1355_s4 + $0x48] sm:$0xff] %v424_v34  ;;  %v427_v43 = vmax.f32 %v363_v35, 0.0  ;;  %v584_v46 = vunpack.c.h.bf16 %v684_v32  ;;  %v587_v50 = vunpack.c.l.bf16 %v685_v37  ;;  %v689_v27 = vld [vmem:[%s1351_s0 + $0x68] sm:$0xff]   ;;  %v690_v32 = vld [vmem:[%s1351_s0 + $0x70] sm:$0xff]  }
  0x16   :  { %v428_v44 = vmax.f32 %v364_v36, 0.0  ;;  %489 = vst [vmem:[%s1355_s4 + $0x50] sm:$0xff] %v425_v38  ;;  %490 = vst [vmem:[%s1355_s4 + $0x58] sm:$0xff] %v426_v39  ;;  %v429_v48 = vmax.f32 %v365_v40, 0.0  ;;  %v588_v51 = vunpack.c.h.bf16 %v685_v37  ;;  %v168_v52 = vmul.f32 %v583_v45, %v739_v1  ;;  %v691_v37 = vld [vmem:[%s1351_s0 + $0x78] sm:$0xff]  }
  0x17   :  { %v430_v49 = vmax.f32 %v366_v41, 0.0  ;;  %491 = vst [vmem:[%s1355_s4 + $0x60] sm:$0xff] %v427_v43  ;;  %v169_v53 = vmul.f32 %v584_v46, %v739_v1  ;;  %v591_v54 = vunpack.c.l.bf16 %v686_v42  ;;  %v592_v55 = vunpack.c.h.bf16 %v686_v42  ;;  %v311_v46 = vld [vmem:[%s1354_s1 + $0xc0] sm:$0xff] }
  0x18   :  { %492 = vst [vmem:[%s1355_s4 + $0x68] sm:$0xff] %v428_v44  ;;  %493 = vst [vmem:[%s1355_s4 + $0x70] sm:$0xff] %v429_v48  ;;  %v170_v58 = vmul.f32 %v587_v50, %v739_v1  ;;  %v171_v59 = vmul.f32 %v588_v51, %v739_v1  ;;  %v595_v60 = vunpack.c.l.bf16 %v687_v47  ;;  %v596_v61 = vunpack.c.h.bf16 %v687_v47  ;;  %v312_v47 = vld [vmem:[%s1354_s1 + $0xc8] sm:$0xff] }
  0x19   :  { %494 = vst [vmem:[%s1355_s4 + $0x78] sm:$0xff] %v430_v49  ;;  %v239_v62 = vadd.f32 %v747_v5, %v168_v52  ;;  %v240_v63 = vadd.f32 %v747_v5, %v169_v53  ;;  %v172_v3 = vmul.f32 %v591_v54, %v739_v1  ;;  %v173_v4 = vmul.f32 %v592_v55, %v739_v1  ;;  %v313_v54 = vld [vmem:[%s1354_s1 + $0xd0] sm:$0xff]  ;;  %v314_v55 = vld [vmem:[%s1354_s1 + $0xd8] sm:$0xff] }
  0x1a   :  { %v241_v6 = vadd.f32 %v747_v5, %v170_v58  ;;  %v242_v7 = vadd.f32 %v747_v5, %v171_v59  ;;  %v174_v10 = vmul.f32 %v595_v60, %v739_v1  ;;  %v175_v11 = vmul.f32 %v596_v61, %v739_v1  ;;  %v315_v60 = vld [vmem:[%s1354_s1 + $0xe0] sm:$0xff]  ;;  %v316_v61 = vld [vmem:[%s1354_s1 + $0xe8] sm:$0xff] }
  0x1b   :  { %v367_v12 = vadd.f32 %v303_v56, %v239_v62  ;;  %v368_v13 = vadd.f32 %v304_v57, %v240_v63  ;;  %v243_v14 = vadd.f32 %v747_v5, %v172_v3  ;;  %v244_v15 = vadd.f32 %v747_v5, %v173_v4 }
  0x1c   :  { %v369_v18 = vadd.f32 %v305_v0, %v241_v6  ;;  %v370_v19 = vadd.f32 %v306_v2, %v242_v7  ;;  %v245_v20 = vadd.f32 %v747_v5, %v174_v10  ;;  %v246_v21 = vadd.f32 %v747_v5, %v175_v11  ;;  %v317_v6 = vld [vmem:[%s1354_s1 + $0xf0] sm:$0xff]  ;;  %v318_v7 = vld [vmem:[%s1354_s1 + $0xf8] sm:$0xff] }
  0x1d   :  { %v431_v23 = vmax.f32 %v367_v12, 0.0  ;;  %v432_v24 = vmax.f32 %v368_v13, 0.0  ;;  %v371_v25 = vadd.f32 %v307_v8, %v243_v14  ;;  %v372_v26 = vadd.f32 %v308_v9, %v244_v15  ;;  %v692_v12 = vld [vmem:[%s1351_s0 + $0x80] sm:$0xff]  }
  0x1e   :  { %v433_v28 = vmax.f32 %v369_v18, 0.0  ;;  %v434_v29 = vmax.f32 %v370_v19, 0.0  ;;  %v373_v30 = vadd.f32 %v309_v16, %v245_v20  ;;  %v374_v31 = vadd.f32 %v310_v17, %v246_v21  ;;  %v693_v17 = vld [vmem:[%s1351_s0 + $0x88] sm:$0xff]  }
  0x1f   :  { %495 = vst [vmem:[%s1355_s4 + $0x80] sm:$0xff] %v431_v23  ;;  %496 = vst [vmem:[%s1355_s4 + $0x88] sm:$0xff] %v432_v24  ;;  %v435_v33 = vmax.f32 %v371_v25, 0.0  ;;  %v436_v34 = vmax.f32 %v372_v26, 0.0  ;;  %v599_v35 = vunpack.c.l.bf16 %v688_v22  ;;  %v600_v36 = vunpack.c.h.bf16 %v688_v22  ;;  %v694_v22 = vld [vmem:[%s1351_s0 + $0x90] sm:$0xff]  }
  0x20   :  { %497 = vst [vmem:[%s1355_s4 + $0x90] sm:$0xff] %v433_v28  ;;  %498 = vst [vmem:[%s1355_s4 + $0x98] sm:$0xff] %v434_v29  ;;  %v437_v38 = vmax.f32 %v373_v30, 0.0  ;;  %v438_v39 = vmax.f32 %v374_v31, 0.0  ;;  %v603_v40 = vunpack.c.l.bf16 %v689_v27  ;;  %v604_v41 = vunpack.c.h.bf16 %v689_v27  ;;  %v695_v27 = vld [vmem:[%s1351_s0 + $0x98] sm:$0xff]  }
  0x21   :  { %499 = vst [vmem:[%s1355_s4 + $0xa0] sm:$0xff] %v435_v33  ;;  %500 = vst [vmem:[%s1355_s4 + $0xa8] sm:$0xff] %v436_v34  ;;  %v176_v42 = vmul.f32 %v599_v35, %v739_v1  ;;  %v177_v43 = vmul.f32 %v600_v36, %v739_v1  ;;  %v607_v44 = vunpack.c.l.bf16 %v690_v32  ;;  %v608_v45 = vunpack.c.h.bf16 %v690_v32  ;;  %v319_v36 = vld [vmem:[%s1354_s1 + $0x100] sm:$0xff] }
  0x22   :  { %501 = vst [vmem:[%s1355_s4 + $0xb0] sm:$0xff] %v437_v38  ;;  %502 = vst [vmem:[%s1355_s4 + $0xb8] sm:$0xff] %v438_v39  ;;  %v178_v48 = vmul.f32 %v603_v40, %v739_v1  ;;  %v179_v49 = vmul.f32 %v604_v41, %v739_v1  ;;  %v611_v50 = vunpack.c.l.bf16 %v691_v37  ;;  %v612_v51 = vunpack.c.h.bf16 %v691_v37  ;;  %v320_v37 = vld [vmem:[%s1354_s1 + $0x108] sm:$0xff] }
  0x23   :  { %v247_v52 = vadd.f32 %v747_v5, %v176_v42  ;;  %v248_v53 = vadd.f32 %v747_v5, %v177_v43  ;;  %v180_v56 = vmul.f32 %v607_v44, %v739_v1  ;;  %v181_v57 = vmul.f32 %v608_v45, %v739_v1  ;;  %v321_v44 = vld [vmem:[%s1354_s1 + $0x110] sm:$0xff]  ;;  %v322_v45 = vld [vmem:[%s1354_s1 + $0x118] sm:$0xff] }
  0x24   :  { %v249_v58 = vadd.f32 %v747_v5, %v178_v48  ;;  %v250_v59 = vadd.f32 %v747_v5, %v179_v49  ;;  %v182_v62 = vmul.f32 %v611_v50, %v739_v1  ;;  %v183_v63 = vmul.f32 %v612_v51, %v739_v1  ;;  %v323_v50 = vld [vmem:[%s1354_s1 + $0x120] sm:$0xff]  ;;  %v324_v51 = vld [vmem:[%s1354_s1 + $0x128] sm:$0xff] }
  0x25   :  { %v375_v0 = vadd.f32 %v311_v46, %v247_v52  ;;  %v376_v2 = vadd.f32 %v312_v47, %v248_v53  ;;  %v251_v3 = vadd.f32 %v747_v5, %v180_v56  ;;  %v252_v4 = vadd.f32 %v747_v5, %v181_v57 }
  0x26   :  { %v377_v8 = vadd.f32 %v313_v54, %v249_v58  ;;  %v378_v9 = vadd.f32 %v314_v55, %v250_v59  ;;  %v253_v10 = vadd.f32 %v747_v5, %v182_v62  ;;  %v254_v11 = vadd.f32 %v747_v5, %v183_v63  ;;  %v325_v58 = vld [vmem:[%s1354_s1 + $0x130] sm:$0xff]  ;;  %v326_v59 = vld [vmem:[%s1354_s1 + $0x138] sm:$0xff] }
  0x27   :  { %v439_v13 = vmax.f32 %v375_v0, 0.0  ;;  %v440_v14 = vmax.f32 %v376_v2, 0.0  ;;  %v379_v15 = vadd.f32 %v315_v60, %v251_v3  ;;  %v380_v16 = vadd.f32 %v316_v61, %v252_v4  ;;  %v696_v0 = vld [vmem:[%s1351_s0 + $0xa0] sm:$0xff]  }
  0x28   :  { %v441_v18 = vmax.f32 %v377_v8, 0.0  ;;  %v442_v19 = vmax.f32 %v378_v9, 0.0  ;;  %v381_v20 = vadd.f32 %v317_v6, %v253_v10  ;;  %v382_v21 = vadd.f32 %v318_v7, %v254_v11  ;;  %v697_v7 = vld [vmem:[%s1351_s0 + $0xa8] sm:$0xff]  }
  0x29   :  { %503 = vst [vmem:[%s1355_s4 + $0xc0] sm:$0xff] %v439_v13  ;;  %504 = vst [vmem:[%s1355_s4 + $0xc8] sm:$0xff] %v440_v14  ;;  %v443_v23 = vmax.f32 %v379_v15, 0.0  ;;  %v444_v24 = vmax.f32 %v380_v16, 0.0  ;;  %v615_v25 = vunpack.c.l.bf16 %v692_v12  ;;  %v616_v26 = vunpack.c.h.bf16 %v692_v12  ;;  %v698_v12 = vld [vmem:[%s1351_s0 + $0xb0] sm:$0xff]  }
  0x2a   :  { %505 = vst [vmem:[%s1355_s4 + $0xd0] sm:$0xff] %v441_v18  ;;  %506 = vst [vmem:[%s1355_s4 + $0xd8] sm:$0xff] %v442_v19  ;;  %v445_v28 = vmax.f32 %v381_v20, 0.0  ;;  %v446_v29 = vmax.f32 %v382_v21, 0.0  ;;  %v619_v30 = vunpack.c.l.bf16 %v693_v17  ;;  %v620_v31 = vunpack.c.h.bf16 %v693_v17  ;;  %v699_v17 = vld [vmem:[%s1351_s0 + $0xb8] sm:$0xff]  }
  0x2b   :  { %507 = vst [vmem:[%s1355_s4 + $0xe0] sm:$0xff] %v443_v23  ;;  %508 = vst [vmem:[%s1355_s4 + $0xe8] sm:$0xff] %v444_v24  ;;  %v184_v32 = vmul.f32 %v615_v25, %v739_v1  ;;  %v185_v33 = vmul.f32 %v616_v26, %v739_v1  ;;  %v623_v34 = vunpack.c.l.bf16 %v694_v22  ;;  %v624_v35 = vunpack.c.h.bf16 %v694_v22  ;;  %v327_v26 = vld [vmem:[%s1354_s1 + $0x140] sm:$0xff] }
  0x2c   :  { %509 = vst [vmem:[%s1355_s4 + $0xf0] sm:$0xff] %v445_v28  ;;  %510 = vst [vmem:[%s1355_s4 + $0xf8] sm:$0xff] %v446_v29  ;;  %v186_v38 = vmul.f32 %v619_v30, %v739_v1  ;;  %v187_v39 = vmul.f32 %v620_v31, %v739_v1  ;;  %v627_v40 = vunpack.c.l.bf16 %v695_v27  ;;  %v628_v41 = vunpack.c.h.bf16 %v695_v27  ;;  %v328_v27 = vld [vmem:[%s1354_s1 + $0x148] sm:$0xff] }
  0x2d   :  { %v255_v42 = vadd.f32 %v747_v5, %v184_v32  ;;  %v256_v43 = vadd.f32 %v747_v5, %v185_v33  ;;  %v188_v46 = vmul.f32 %v623_v34, %v739_v1  ;;  %v189_v47 = vmul.f32 %v624_v35, %v739_v1  ;;  %v329_v34 = vld [vmem:[%s1354_s1 + $0x150] sm:$0xff]  ;;  %v330_v35 = vld [vmem:[%s1354_s1 + $0x158] sm:$0xff] }
  0x2e   :  { %v257_v48 = vadd.f32 %v747_v5, %v186_v38  ;;  %v258_v49 = vadd.f32 %v747_v5, %v187_v39  ;;  %v190_v52 = vmul.f32 %v627_v40, %v739_v1  ;;  %v191_v53 = vmul.f32 %v628_v41, %v739_v1  ;;  %v331_v40 = vld [vmem:[%s1354_s1 + $0x160] sm:$0xff]  ;;  %v332_v41 = vld [vmem:[%s1354_s1 + $0x168] sm:$0xff] }
  0x2f   :  { %v383_v54 = vadd.f32 %v319_v36, %v255_v42  ;;  %v384_v55 = vadd.f32 %v320_v37, %v256_v43  ;;  %v259_v56 = vadd.f32 %v747_v5, %v188_v46  ;;  %v260_v57 = vadd.f32 %v747_v5, %v189_v47 }
  0x30   :  { %v385_v60 = vadd.f32 %v321_v44, %v257_v48  ;;  %v386_v61 = vadd.f32 %v322_v45, %v258_v49  ;;  %v261_v62 = vadd.f32 %v747_v5, %v190_v52  ;;  %v262_v63 = vadd.f32 %v747_v5, %v191_v53  ;;  %v333_v48 = vld [vmem:[%s1354_s1 + $0x170] sm:$0xff]  ;;  %v334_v49 = vld [vmem:[%s1354_s1 + $0x178] sm:$0xff] }
  0x31   :  { %v447_v2 = vmax.f32 %v383_v54, 0.0  ;;  %v448_v3 = vmax.f32 %v384_v55, 0.0  ;;  %v387_v4 = vadd.f32 %v323_v50, %v259_v56  ;;  %v388_v6 = vadd.f32 %v324_v51, %v260_v57  ;;  %v700_v54 = vld [vmem:[%s1351_s0 + $0xc0] sm:$0xff]  }
  0x32   :  { %v449_v8 = vmax.f32 %v385_v60, 0.0  ;;  %v450_v9 = vmax.f32 %v386_v61, 0.0  ;;  %v389_v10 = vadd.f32 %v325_v58, %v261_v62  ;;  %v390_v11 = vadd.f32 %v326_v59, %v262_v63  ;;  %v701_v59 = vld [vmem:[%s1351_s0 + $0xc8] sm:$0xff]  }
  0x33   :  { %511 = vst [vmem:[%s1355_s4 + $0x100] sm:$0xff] %v447_v2  ;;  %512 = vst [vmem:[%s1355_s4 + $0x108] sm:$0xff] %v448_v3  ;;  %v451_v13 = vmax.f32 %v387_v4, 0.0  ;;  %v452_v14 = vmax.f32 %v388_v6, 0.0  ;;  %v631_v15 = vunpack.c.l.bf16 %v696_v0  ;;  %v632_v16 = vunpack.c.h.bf16 %v696_v0  ;;  %v702_v0 = vld [vmem:[%s1351_s0 + $0xd0] sm:$0xff]  }
  0x34   :  { %513 = vst [vmem:[%s1355_s4 + $0x110] sm:$0xff] %v449_v8  ;;  %514 = vst [vmem:[%s1355_s4 + $0x118] sm:$0xff] %v450_v9  ;;  %v453_v18 = vmax.f32 %v389_v10, 0.0  ;;  %v454_v19 = vmax.f32 %v390_v11, 0.0  ;;  %v635_v20 = vunpack.c.l.bf16 %v697_v7  ;;  %v636_v21 = vunpack.c.h.bf16 %v697_v7  ;;  %v703_v7 = vld [vmem:[%s1351_s0 + $0xd8] sm:$0xff]  }
  0x35   :  { %515 = vst [vmem:[%s1355_s4 + $0x120] sm:$0xff] %v451_v13  ;;  %516 = vst [vmem:[%s1355_s4 + $0x128] sm:$0xff] %v452_v14  ;;  %v192_v22 = vmul.f32 %v631_v15, %v739_v1  ;;  %v193_v23 = vmul.f32 %v632_v16, %v739_v1  ;;  %v639_v24 = vunpack.c.l.bf16 %v698_v12  ;;  %v640_v25 = vunpack.c.h.bf16 %v698_v12  ;;  %v335_v16 = vld [vmem:[%s1354_s1 + $0x180] sm:$0xff] }
  0x36   :  { %517 = vst [vmem:[%s1355_s4 + $0x130] sm:$0xff] %v453_v18  ;;  %518 = vst [vmem:[%s1355_s4 + $0x138] sm:$0xff] %v454_v19  ;;  %v194_v28 = vmul.f32 %v635_v20, %v739_v1  ;;  %v195_v29 = vmul.f32 %v636_v21, %v739_v1  ;;  %v643_v30 = vunpack.c.l.bf16 %v699_v17  ;;  %v644_v31 = vunpack.c.h.bf16 %v699_v17  ;;  %v336_v17 = vld [vmem:[%s1354_s1 + $0x188] sm:$0xff] }
  0x37   :  { %v263_v32 = vadd.f32 %v747_v5, %v192_v22  ;;  %v264_v33 = vadd.f32 %v747_v5, %v193_v23  ;;  %v196_v36 = vmul.f32 %v639_v24, %v739_v1  ;;  %v197_v37 = vmul.f32 %v640_v25, %v739_v1  ;;  %v337_v24 = vld [vmem:[%s1354_s1 + $0x190] sm:$0xff]  ;;  %v338_v25 = vld [vmem:[%s1354_s1 + $0x198] sm:$0xff] }
  0x38   :  { %v265_v38 = vadd.f32 %v747_v5, %v194_v28  ;;  %v266_v39 = vadd.f32 %v747_v5, %v195_v29  ;;  %v198_v42 = vmul.f32 %v643_v30, %v739_v1  ;;  %v199_v43 = vmul.f32 %v644_v31, %v739_v1  ;;  %v339_v30 = vld [vmem:[%s1354_s1 + $0x1a0] sm:$0xff]  ;;  %v340_v31 = vld [vmem:[%s1354_s1 + $0x1a8] sm:$0xff] }
  0x39   :  { %v391_v44 = vadd.f32 %v327_v26, %v263_v32  ;;  %v392_v45 = vadd.f32 %v328_v27, %v264_v33  ;;  %v267_v46 = vadd.f32 %v747_v5, %v196_v36  ;;  %v268_v47 = vadd.f32 %v747_v5, %v197_v37 }
  0x3a   :  { %v393_v50 = vadd.f32 %v329_v34, %v265_v38  ;;  %v394_v51 = vadd.f32 %v330_v35, %v266_v39  ;;  %v269_v52 = vadd.f32 %v747_v5, %v198_v42  ;;  %v270_v53 = vadd.f32 %v747_v5, %v199_v43  ;;  %v341_v38 = vld [vmem:[%s1354_s1 + $0x1b0] sm:$0xff]  ;;  %v342_v39 = vld [vmem:[%s1354_s1 + $0x1b8] sm:$0xff] }
  0x3b   :  { %v455_v55 = vmax.f32 %v391_v44, 0.0  ;;  %v456_v56 = vmax.f32 %v392_v45, 0.0  ;;  %v395_v57 = vadd.f32 %v331_v40, %v267_v46  ;;  %v396_v58 = vadd.f32 %v332_v41, %v268_v47  ;;  %v704_v44 = vld [vmem:[%s1351_s0 + $0xe0] sm:$0xff]  }
  0x3c   :  { %v457_v60 = vmax.f32 %v393_v50, 0.0  ;;  %v458_v61 = vmax.f32 %v394_v51, 0.0  ;;  %v397_v62 = vadd.f32 %v333_v48, %v269_v52  ;;  %v398_v63 = vadd.f32 %v334_v49, %v270_v53  ;;  %v705_v49 = vld [vmem:[%s1351_s0 + $0xe8] sm:$0xff]  }
  0x3d   :  { %519 = vst [vmem:[%s1355_s4 + $0x140] sm:$0xff] %v455_v55  ;;  %520 = vst [vmem:[%s1355_s4 + $0x148] sm:$0xff] %v456_v56  ;;  %v459_v2 = vmax.f32 %v395_v57, 0.0  ;;  %v460_v3 = vmax.f32 %v396_v58, 0.0  ;;  %v647_v4 = vunpack.c.l.bf16 %v700_v54  ;;  %v648_v6 = vunpack.c.h.bf16 %v700_v54  ;;  %v706_v54 = vld [vmem:[%s1351_s0 + $0xf0] sm:$0xff]  }
  0x3e   :  { %521 = vst [vmem:[%s1355_s4 + $0x150] sm:$0xff] %v457_v60  ;;  %522 = vst [vmem:[%s1355_s4 + $0x158] sm:$0xff] %v458_v61  ;;  %v461_v8 = vmax.f32 %v397_v62, 0.0  ;;  %v462_v9 = vmax.f32 %v398_v63, 0.0  ;;  %v651_v10 = vunpack.c.l.bf16 %v701_v59  ;;  %v652_v11 = vunpack.c.h.bf16 %v701_v59  ;;  %v707_v59 = vld [vmem:[%s1351_s0 + $0xf8] sm:$0xff]  }
  0x3f   :  { %523 = vst [vmem:[%s1355_s4 + $0x160] sm:$0xff] %v459_v2  ;;  %524 = vst [vmem:[%s1355_s4 + $0x168] sm:$0xff] %v460_v3  ;;  %v200_v12 = vmul.f32 %v647_v4, %v739_v1  ;;  %v201_v13 = vmul.f32 %v648_v6, %v739_v1  ;;  %v655_v14 = vunpack.c.l.bf16 %v702_v0  ;;  %v656_v15 = vunpack.c.h.bf16 %v702_v0  ;;  %v343_v6 = vld [vmem:[%s1354_s1 + $0x1c0] sm:$0xff] }
  0x40   :  { %525 = vst [vmem:[%s1355_s4 + $0x170] sm:$0xff] %v461_v8  ;;  %526 = vst [vmem:[%s1355_s4 + $0x178] sm:$0xff] %v462_v9  ;;  %v202_v18 = vmul.f32 %v651_v10, %v739_v1  ;;  %v203_v19 = vmul.f32 %v652_v11, %v739_v1  ;;  %v659_v20 = vunpack.c.l.bf16 %v703_v7  ;;  %v660_v21 = vunpack.c.h.bf16 %v703_v7  ;;  %v344_v7 = vld [vmem:[%s1354_s1 + $0x1c8] sm:$0xff] }
  0x41   :  { %v271_v22 = vadd.f32 %v747_v5, %v200_v12  ;;  %v272_v23 = vadd.f32 %v747_v5, %v201_v13  ;;  %v204_v26 = vmul.f32 %v655_v14, %v739_v1  ;;  %v205_v27 = vmul.f32 %v656_v15, %v739_v1  ;;  %v345_v14 = vld [vmem:[%s1354_s1 + $0x1d0] sm:$0xff]  ;;  %v346_v15 = vld [vmem:[%s1354_s1 + $0x1d8] sm:$0xff] }
  0x42   :  { %v273_v28 = vadd.f32 %v747_v5, %v202_v18  ;;  %v274_v29 = vadd.f32 %v747_v5, %v203_v19  ;;  %v206_v32 = vmul.f32 %v659_v20, %v739_v1  ;;  %v207_v33 = vmul.f32 %v660_v21, %v739_v1  ;;  %v347_v20 = vld [vmem:[%s1354_s1 + $0x1e0] sm:$0xff]  ;;  %v348_v21 = vld [vmem:[%s1354_s1 + $0x1e8] sm:$0xff] }
  0x43   :  { %v399_v34 = vadd.f32 %v335_v16, %v271_v22  ;;  %v400_v35 = vadd.f32 %v336_v17, %v272_v23  ;;  %v275_v36 = vadd.f32 %v747_v5, %v204_v26  ;;  %v276_v37 = vadd.f32 %v747_v5, %v205_v27 }
  0x44   :  { %v401_v40 = vadd.f32 %v337_v24, %v273_v28  ;;  %v402_v41 = vadd.f32 %v338_v25, %v274_v29  ;;  %v277_v42 = vadd.f32 %v747_v5, %v206_v32  ;;  %v278_v43 = vadd.f32 %v747_v5, %v207_v33  ;;  %v349_v28 = vld [vmem:[%s1354_s1 + $0x1f0] sm:$0xff]  ;;  %v350_v29 = vld [vmem:[%s1354_s1 + $0x1f8] sm:$0xff] }
  0x45   :  { %v463_v45 = vmax.f32 %v399_v34, 0.0  ;;  %v464_v46 = vmax.f32 %v400_v35, 0.0  ;;  %v403_v47 = vadd.f32 %v339_v30, %v275_v36  ;;  %v404_v48 = vadd.f32 %v340_v31, %v276_v37 }
  0x46   :  { %v465_v50 = vmax.f32 %v401_v40, 0.0  ;;  %v466_v51 = vmax.f32 %v402_v41, 0.0  ;;  %v405_v52 = vadd.f32 %v341_v38, %v277_v42  ;;  %v406_v53 = vadd.f32 %v342_v39, %v278_v43 }
  0x47   :  { %527 = vst [vmem:[%s1355_s4 + $0x180] sm:$0xff] %v463_v45  ;;  %528 = vst [vmem:[%s1355_s4 + $0x188] sm:$0xff] %v464_v46  ;;  %v467_v55 = vmax.f32 %v403_v47, 0.0  ;;  %v468_v56 = vmax.f32 %v404_v48, 0.0  ;;  %v663_v57 = vunpack.c.l.bf16 %v704_v44  ;;  %v664_v58 = vunpack.c.h.bf16 %v704_v44 }
  0x48   :  { %529 = vst [vmem:[%s1355_s4 + $0x190] sm:$0xff] %v465_v50  ;;  %530 = vst [vmem:[%s1355_s4 + $0x198] sm:$0xff] %v466_v51  ;;  %v469_v60 = vmax.f32 %v405_v52, 0.0  ;;  %v470_v61 = vmax.f32 %v406_v53, 0.0  ;;  %v667_v62 = vunpack.c.l.bf16 %v705_v49  ;;  %v668_v63 = vunpack.c.h.bf16 %v705_v49 }
  0x49   :  { %531 = vst [vmem:[%s1355_s4 + $0x1a0] sm:$0xff] %v467_v55  ;;  %532 = vst [vmem:[%s1355_s4 + $0x1a8] sm:$0xff] %v468_v56  ;;  %v208_v0 = vmul.f32 %v663_v57, %v739_v1  ;;  %v209_v2 = vmul.f32 %v664_v58, %v739_v1  ;;  %v671_v3 = vunpack.c.l.bf16 %v706_v54  ;;  %v672_v4 = vunpack.c.h.bf16 %v706_v54 }
  0x4a   :  { %533 = vst [vmem:[%s1355_s4 + $0x1b0] sm:$0xff] %v469_v60  ;;  %534 = vst [vmem:[%s1355_s4 + $0x1b8] sm:$0xff] %v470_v61  ;;  %v210_v8 = vmul.f32 %v667_v62, %v739_v1  ;;  %v211_v9 = vmul.f32 %v668_v63, %v739_v1  ;;  %v675_v10 = vunpack.c.l.bf16 %v707_v59  ;;  %v676_v11 = vunpack.c.h.bf16 %v707_v59 }
  0x4b   :  { %v279_v12 = vadd.f32 %v747_v5, %v208_v0  ;;  %v280_v13 = vadd.f32 %v747_v5, %v209_v2  ;;  %v212_v16 = vmul.f32 %v671_v3, %v739_v1  ;;  %v213_v17 = vmul.f32 %v672_v4, %v739_v1 }
  0x4c   :  { %v281_v18 = vadd.f32 %v747_v5, %v210_v8  ;;  %v282_v19 = vadd.f32 %v747_v5, %v211_v9  ;;  %v214_v22 = vmul.f32 %v675_v10, %v739_v1  ;;  %v215_v23 = vmul.f32 %v676_v11, %v739_v1 }
  0x4d   :  { %v407_v24 = vadd.f32 %v343_v6, %v279_v12  ;;  %v408_v25 = vadd.f32 %v344_v7, %v280_v13  ;;  %v283_v26 = vadd.f32 %v747_v5, %v212_v16  ;;  %v284_v27 = vadd.f32 %v747_v5, %v213_v17 }
  0x4e   :  { %v409_v30 = vadd.f32 %v345_v14, %v281_v18  ;;  %v410_v31 = vadd.f32 %v346_v15, %v282_v19  ;;  %v285_v32 = vadd.f32 %v747_v5, %v214_v22  ;;  %v286_v1 = vadd.f32 %v747_v5, %v215_v23 }
  0x4f   :  { %v471_v33 = vmax.f32 %v407_v24, 0.0  ;;  %v472_v34 = vmax.f32 %v408_v25, 0.0  ;;  %v411_v35 = vadd.f32 %v347_v20, %v283_v26  ;;  %v412_v36 = vadd.f32 %v348_v21, %v284_v27 }
  0x50   :  { %v473_v37 = vmax.f32 %v409_v30, 0.0  ;;  %v474_v38 = vmax.f32 %v410_v31, 0.0  ;;  %v413_v39 = vadd.f32 %v349_v28, %v285_v32  ;;  %v414_v40 = vadd.f32 %v350_v29, %v286_v1 }
  0x51   :  { %535 = vst [vmem:[%s1355_s4 + $0x1c0] sm:$0xff] %v471_v33  ;;  %536 = vst [vmem:[%s1355_s4 + $0x1c8] sm:$0xff] %v472_v34  ;;  %v475_v41 = vmax.f32 %v411_v35, 0.0  ;;  %v476_v42 = vmax.f32 %v412_v36, 0.0 }
  0x52   :  { %537 = vst [vmem:[%s1355_s4 + $0x1d0] sm:$0xff] %v473_v37  ;;  %538 = vst [vmem:[%s1355_s4 + $0x1d8] sm:$0xff] %v474_v38  ;;  %v477_v5 = vmax.f32 %v413_v39, 0.0  ;;  %v478_v43 = vmax.f32 %v414_v40, 0.0 }
  0x53   :  { %539 = vst [vmem:[%s1355_s4 + $0x1e0] sm:$0xff] %v475_v41  ;;  %540 = vst [vmem:[%s1355_s4 + $0x1e8] sm:$0xff] %v476_v42 }
  0x54   :  { %541 = vst [vmem:[%s1355_s4 + $0x1f0] sm:$0xff] %v477_v5  ;;  %542 = vst [vmem:[%s1355_s4 + $0x1f8] sm:$0xff] %v478_v43 }

// kernel: bottleneck_forward.6
= control target key start
LH: loop header
LB: loop body
LE: loop exit
PB: predicated region body
PF: predicated region fallthrough
CT: control target
= control target key end

     0   :  { %s2539_s1 = inlined_call_operand.vmem [shape: bf16[128,128], index: 1, kind: input, shape index: {}]   ;;  %s2540_s0 = inlined_call_operand.vmem [shape: bf16[512,128], index: 0, kind: input, shape index: {}]   ;;  %s2541_s2 = inlined_call_operand.vmem [shape: f32[1,128], index: 2, kind: input, shape index: {}]   ;;  %s2542_s3 = inlined_call_operand.vmem [shape: f32[1,128], index: 3, kind: input, shape index: {}]   ;;  %s2543_s4 = inlined_call_operand.vmem [shape: bf16[512,128], index: 4, kind: output, shape index: {0}]   ;;  %s2544_s5 = inlined_call_operand.vmem [shape: f32[1,1,256], index: 5, kind: output, shape index: {1}]  }
   0x1   :  { %v1917_v0 = vld [vmem:[%s2539_s1 + $0x38] sm:$0xff]   ;;  %v1918_v1 = vld [vmem:[%s2539_s1 + $0x30] sm:$0xff]   ;;  %v1919_v2 = vld [vmem:[%s2539_s1 + $0x28] sm:$0xff]  }
   0x2   :  { %1820 = vmatprep.subr.bf16.mxu0 %v1917_v0  ;;  %1900 = vmatprep.subr.bf16.mxu1 %v1917_v0  ;;  %v1920_v3 = vld [vmem:[%s2539_s1 + $0x20] sm:$0xff]   ;;  %v1718_v8 = vld [vmem:[%s2540_s0 + $0x8] sm:$0xff]   ;;  %v1719_v9 = vld [vmem:[%s2540_s0 + $0x10] sm:$0xff]  }
   0x3   :  { %1821 = vmatpush3.bf16.msra.mxu0 %v1917_v0  ;;  %1908 = vmatpush3.bf16.msra.mxu1 %v1917_v0  ;;  %v1431_v4 = vld [vmem:[%s2540_s0] sm:$0xff]   ;;  %v1921_v13 = vld [vmem:[%s2539_s1 + $0x18] sm:$0xff]   ;;  %v1436_v14 = vunpack.c.l.bf16 %v1718_v8  ;;  %v1437_v15 = vunpack.c.h.bf16 %v1718_v8  ;;  %v1440_v16 = vunpack.c.l.bf16 %v1719_v9  ;;  %v1441_v19 = vunpack.c.h.bf16 %v1719_v9  ;;  %v1922_v22 = vld [vmem:[%s2539_s1 + $0x10] sm:$0xff]  }
   0x4   :  { %1822 = vmatprep.subr.bf16.mxu0 %v1918_v1  ;;  %1901 = vmatprep.subr.bf16.mxu1 %v1918_v1  ;;  %v1974_v5 = vld [vmem:[%s2541_s2] ss:$0 sm:$0xff]  ;;  %v1432_v6 = vunpack.c.l.bf16 %v1431_v4  ;;  %v1433_v7 = vunpack.c.h.bf16 %v1431_v4  ;;  %v1720_v26 = vld [vmem:[%s2540_s0 + $0x18] sm:$0xff]   ;;  %v1923_v31 = vld [vmem:[%s2539_s1 + $0x8] sm:$0xff]  }
   0x5   :  { %v1985_v10 = vld [vmem:[%s2542_s3] ss:$0 sm:$0xff]  ;;  %v157_v23 = vmul.f32 %v1436_v14, %v1974_v5  ;;  %v158_v24 = vmul.f32 %v1437_v15, %v1974_v5  ;;  %v159_v25 = vmul.f32 %v1440_v16, %v1974_v5  ;;  %v160_v28 = vmul.f32 %v1441_v19, %v1974_v5  ;;  %v1722_v38 = vld [vmem:[%s2540_s0 + $0x28] sm:$0xff]   ;;  %v1723_v41 = vld [vmem:[%s2540_s0 + $0x30] sm:$0xff]  }
   0x6   :  { %v155_v11 = vmul.f32 %v1432_v6, %v1974_v5  ;;  %v156_v12 = vmul.f32 %v1433_v7, %v1974_v5  ;;  %v1721_v29 = vld [vmem:[%s2540_s0 + $0x20] sm:$0xff]   ;;  %v1444_v30 = vunpack.c.l.bf16 %v1720_v26  ;;  %v1445_v35 = vunpack.c.h.bf16 %v1720_v26  ;;  %v1724_v42 = vld [vmem:[%s2540_s0 + $0x38] sm:$0xff]   ;;  %v1726_v63 = vld [vmem:[%s2540_s0 + $0x48] sm:$0xff]  }
   0x7   :  { %1823 = vmatpush3.bf16.msra.mxu0 %v1918_v1  ;;  %1909 = vmatpush3.bf16.msra.mxu1 %v1918_v1  ;;  %v228_v32 = vadd.f32 %v1985_v10, %v157_v23  ;;  %v229_v33 = vadd.f32 %v1985_v10, %v158_v24  ;;  %v230_v34 = vadd.f32 %v1985_v10, %v159_v25  ;;  %v1448_v37 = vunpack.c.l.bf16 %v1721_v29  ;;  %v1924_v43 = vld [vmem:[%s2539_s1] sm:$0xff]   ;;  %v1727_v4 = vld [vmem:[%s2540_s0 + $0x50] sm:$0xff]   ;;  %v1728_v23 = vld [vmem:[%s2540_s0 + $0x58] sm:$0xff]  }
   0x8   :  { %1824 = vmatprep.subr.bf16.mxu0 %v1919_v2  ;;  %1902 = vmatprep.subr.bf16.mxu1 %v1919_v2  ;;  %v226_v17 = vadd.f32 %v1985_v10, %v155_v11  ;;  %v227_v18 = vadd.f32 %v1985_v10, %v156_v12  ;;  %v231_v36 = vadd.f32 %v1985_v10, %v160_v28  ;;  %v1449_v40 = vunpack.c.h.bf16 %v1721_v29  ;;  %v1725_v48 = vld [vmem:[%s2540_s0 + $0x40] sm:$0xff]  }
   0x9   :  { %v161_v39 = vmul.f32 %v1444_v30, %v1974_v5  ;;  %v292_v44 = vmax.f32 %v228_v32, 0.0  ;;  %v293_v45 = vmax.f32 %v229_v33, 0.0  ;;  %v294_v46 = vmax.f32 %v230_v34, 0.0 }
   0xa   :  { %v290_v20 = vmax.f32 %v226_v17, 0.0  ;;  %v291_v21 = vmax.f32 %v227_v18, 0.0  ;;  %v162_v47 = vmul.f32 %v1445_v35, %v1974_v5  ;;  %v295_v49 = vmax.f32 %v231_v36, 0.0 }
   0xb   :  { %1825 = vmatpush3.bf16.msra.mxu0 %v1919_v2  ;;  %1910 = vmatpush3.bf16.msra.mxu1 %v1919_v2  ;;  %v163_v50 = vmul.f32 %v1448_v37, %v1974_v5  ;;  %v1452_v51 = vunpack.c.l.bf16 %v1722_v38  ;;  %v1453_v52 = vunpack.c.h.bf16 %v1722_v38  ;;  %v1456_v53 = vunpack.c.l.bf16 %v1723_v41 }
   0xc   :  { %1826 = vmatprep.subr.bf16.mxu0 %v1920_v3  ;;  %1903 = vmatprep.subr.bf16.mxu1 %v1920_v3  ;;  %v354_v27 = vpack.c.bf16 %v291_v21, %v290_v20  ;;  %v1457_v54 = vunpack.c.h.bf16 %v1723_v41  ;;  %v1460_v55 = vunpack.c.l.bf16 %v1724_v42  ;;  %v1461_v56 = vunpack.c.h.bf16 %v1724_v42 }
   0xd   :  { %v164_v57 = vmul.f32 %v1449_v40, %v1974_v5  ;;  %v1464_v58 = vunpack.c.l.bf16 %v1725_v48  ;;  %v1465_v59 = vunpack.c.h.bf16 %v1725_v48  ;;  %v355_v60 = vpack.c.bf16 %v293_v45, %v292_v44  ;;  %v1733_v44 = vld [vmem:[%s2540_s0 + $0x80] sm:$0xff]  }
   0xe   :  { %1836 = vmatprep.mubr.bf16.mxu0 %v354_v27  ;;  %v232_v61 = vadd.f32 %v1985_v10, %v161_v39  ;;  %v233_v62 = vadd.f32 %v1985_v10, %v162_v47  ;;  %v356_v0 = vpack.c.bf16 %v295_v49, %v294_v46  ;;  %v234_v1 = vadd.f32 %v1985_v10, %v163_v50 }
   0xf   :  { %1827 = vmatpush3.bf16.msra.mxu0 %v1920_v3  ;;  %1911 = vmatpush3.bf16.msra.mxu1 %v1920_v3  ;;  %v165_v2 = vmul.f32 %v1452_v51, %v1974_v5  ;;  %v166_v3 = vmul.f32 %v1453_v52, %v1974_v5  ;;  %v167_v6 = vmul.f32 %v1456_v53, %v1974_v5  ;;  %v1468_v14 = vunpack.c.l.bf16 %v1726_v63  ;;  %v2078_v52 = vld [vmem:[%s2540_s0 + $0x60] sm:$0xff]  }
  0x10   :  { %1828 = vmatprep.subr.bf16.mxu0 %v1921_v13  ;;  %1904 = vmatprep.subr.bf16.mxu1 %v1921_v13  ;;  %v168_v7 = vmul.f32 %v1457_v54, %v1974_v5  ;;  %v169_v8 = vmul.f32 %v1460_v55, %v1974_v5  ;;  %v170_v9 = vmul.f32 %v1461_v56, %v1974_v5  ;;  %v296_v15 = vmax.f32 %v232_v61, 0.0 }
  0x11   :  { %v235_v11 = vadd.f32 %v1985_v10, %v164_v57  ;;  %v171_v12 = vmul.f32 %v1464_v58, %v1974_v5  ;;  %v297_v16 = vmax.f32 %v233_v62, 0.0  ;;  %v1469_v17 = vunpack.c.h.bf16 %v1726_v63 }
  0x12   :  { %v1472_v18 = vunpack.c.l.bf16 %v1727_v4  ;;  %v298_v19 = vmax.f32 %v234_v1, 0.0  ;;  %v236_v20 = vadd.f32 %v1985_v10, %v165_v2  ;;  %v237_v21 = vadd.f32 %v1985_v10, %v166_v3 }
  0x13   :  { %1829 = vmatpush3.bf16.msra.mxu0 %v1921_v13  ;;  %1912 = vmatpush3.bf16.msra.mxu1 %v1921_v13  ;;  %v172_v13 = vmul.f32 %v1465_v59, %v1974_v5  ;;  %v238_v24 = vadd.f32 %v1985_v10, %v167_v6  ;;  %v239_v25 = vadd.f32 %v1985_v10, %v168_v7  ;;  %v299_v28 = vmax.f32 %v235_v11, 0.0  ;;  %v1734_v59 = vld [vmem:[%s2540_s0 + $0x88] sm:$0xff]   ;;  %v1736_v11 = vld [vmem:[%s2540_s0 + $0x98] sm:$0xff]  }
  0x14   :  { %1830 = vmatprep.subr.bf16.mxu0 %v1922_v22  ;;  %1905 = vmatprep.subr.bf16.mxu1 %v1922_v22  ;;  %v240_v26 = vadd.f32 %v1985_v10, %v169_v8  ;;  %v241_v27 = vadd.f32 %v1985_v10, %v170_v9  ;;  %v242_v29 = vadd.f32 %v1985_v10, %v171_v12  ;;  %v1476_v35 = vunpack.c.l.bf16 %v1728_v23 }
  0x15   :  { %v243_v30 = vadd.f32 %v1985_v10, %v172_v13  ;;  %v357_v32 = vpack.c.bf16 %v297_v16, %v296_v15  ;;  %v174_v33 = vmul.f32 %v1469_v17, %v1974_v5  ;;  %v175_v34 = vmul.f32 %v1472_v18, %v1974_v5 }
  0x16   :  { %v300_v36 = vmax.f32 %v236_v20, 0.0  ;;  %v301_v37 = vmax.f32 %v237_v21, 0.0  ;;  %v1477_v39 = vunpack.c.h.bf16 %v1728_v23  ;;  %v302_v40 = vmax.f32 %v238_v24, 0.0  ;;  %v1737_v24 = vld [vmem:[%s2540_s0 + $0xa0] sm:$0xff]  }
  0x17   :  { %1831 = vmatpush3.bf16.msra.mxu0 %v1922_v22  ;;  %1913 = vmatpush3.bf16.msra.mxu1 %v1922_v22  ;;  %v1473_v22 = vunpack.c.h.bf16 %v1727_v4  ;;  %v303_v41 = vmax.f32 %v239_v25, 0.0  ;;  %v304_v42 = vmax.f32 %v240_v26, 0.0  ;;  %v358_v45 = vpack.c.bf16 %v299_v28, %v298_v19 }
  0x18   :  { %1832 = vmatprep.subr.bf16.mxu0 %v1923_v31  ;;  %1906 = vmatprep.subr.bf16.mxu1 %v1923_v31  ;;  %v306_v46 = vmax.f32 %v242_v29, 0.0  ;;  %v307_v47 = vmax.f32 %v243_v30, 0.0  ;;  %v245_v49 = vadd.f32 %v1985_v10, %v174_v33  ;;  %v2072_v50 = vadd.f32 %v1985_v10, %v175_v34  ;;  %v1738_v33 = vld [vmem:[%s2540_s0 + $0xa8] sm:$0xff]  }
  0x19   :  { %v176_v38 = vmul.f32 %v1473_v22, %v1974_v5  ;;  %v177_v51 = vmul.f32 %v1476_v35, %v1974_v5  ;;  %v178_v54 = vmul.f32 %v1477_v39, %v1974_v5  ;;  %v1496_v55 = vunpack.c.l.bf16 %v1733_v44 }
  0x1a   :  { %v359_v56 = vpack.c.bf16 %v301_v37, %v300_v36  ;;  %v360_v57 = vpack.c.bf16 %v303_v41, %v302_v40  ;;  %v1480_v62 = vunpack.c.l.bf16 %v2078_v52  ;;  %v1497_v63 = vunpack.c.h.bf16 %v1733_v44 }
  0x1b   :  { %1833 = vmatpush3.bf16.msra.mxu0 %v1923_v31  ;;  %1914 = vmatpush3.bf16.msra.mxu1 %v1923_v31  ;;  %v173_v31 = vmul.f32 %v1468_v14, %v1974_v5  ;;  %v2081_v53 = vadd.f32 %v1985_v10, %v176_v38  ;;  %v309_v1 = vmax.f32 %v245_v49, 0.0  ;;  %v310_v2 = vmax.f32 %v2072_v50, 0.0 }
  0x1c   :  { %1834 = vmatprep.subr.bf16.mxu0 %v1924_v43  ;;  %1907 = vmatprep.subr.bf16.mxu1 %v1924_v43  ;;  %v2097_v3 = vadd.f32 %v1985_v10, %v177_v51  ;;  %v187_v4 = vmul.f32 %v1496_v55, %v1974_v5  ;;  %v2102_v7 = vadd.f32 %v1985_v10, %v178_v54  ;;  %v1500_v9 = vunpack.c.l.bf16 %v1734_v59 }
  0x1d   :  { %v244_v48 = vadd.f32 %v1985_v10, %v173_v31  ;;  %v311_v6 = vmax.f32 %v2081_v53, 0.0  ;;  %v188_v8 = vmul.f32 %v1497_v63, %v1974_v5  ;;  %v1481_v12 = vunpack.c.h.bf16 %v2078_v52 }
  0x1e   :  { %v258_v13 = vadd.f32 %v1985_v10, %v187_v4  ;;  %v1501_v14 = vunpack.c.h.bf16 %v1734_v59  ;;  %v2111_v16 = vmul.f32 %v1480_v62, %v1974_v5  ;;  %v189_v18 = vmul.f32 %v1500_v9, %v1974_v5 }
  0x1f   :  { %1835 = vmatpush3.bf16.msra.mxu0 %v1924_v43  ;;  %1915 = vmatpush3.bf16.msra.mxu1 %v1924_v43  ;;  %v305_v43 = vmax.f32 %v241_v27, 0.0  ;;  %v308_v61 = vmax.f32 %v244_v48, 0.0  ;;  %v259_v17 = vadd.f32 %v1985_v10, %v188_v8  ;;  %v1508_v23 = vunpack.c.l.bf16 %v1736_v11 }
  0x20   :  { %v322_v20 = vmax.f32 %v258_v13, 0.0  ;;  %v190_v21 = vmul.f32 %v1501_v14, %v1974_v5  ;;  %v260_v27 = vadd.f32 %v1985_v10, %v189_v18  ;;  %v1509_v31 = vunpack.c.h.bf16 %v1736_v11  ;;  %v1741_v18 = vld [vmem:[%s2540_s0 + $0xc0] sm:$0xff]  }
  0x21   :  { %v2084_v58 = vpack.c.bf16 %v305_v43, %v304_v42  ;;  %v2120_v25 = vpack.c.bf16 %v309_v1, %v308_v61  ;;  %v323_v26 = vmax.f32 %v259_v17, 0.0  ;;  %v1512_v37 = vunpack.c.l.bf16 %v1737_v24  ;;  %v1740_v1 = vld [vmem:[%s2540_s0 + $0xb8] sm:$0xff]  }
  0x22   :  { %1837 = vmatmul.mubr.bf16.vlgmr.msra.gmra.mxu0 %v355_v60  ;;  %v2089_v60 = vpack.c.bf16 %v307_v47, %v306_v46  ;;  %v261_v29 = vadd.f32 %v1985_v10, %v190_v21  ;;  %v324_v35 = vmax.f32 %v260_v27, 0.0  ;;  %v194_v40 = vmul.f32 %v1509_v31, %v1974_v5  ;;  %v1739_v46 = vld [vmem:[%s2540_s0 + $0xb0] sm:$0xff]   ;;  %v1730_v47 = vld [vmem:[%s2540_s0 + $0x68] sm:$0xff]  }
  0x23   :  { %1840 = vmatprep.mubr.bf16.mxu0 %v356_v0  ;;  %v1735_v0 = vld [vmem:[%s2540_s0 + $0x90] sm:$0xff]   ;;  %v370_v34 = vpack.c.bf16 %v323_v26, %v322_v20  ;;  %v1513_v43 = vunpack.c.h.bf16 %v1737_v24  ;;  %v195_v44 = vmul.f32 %v1512_v37, %v1974_v5  ;;  %v1517_v54 = vunpack.c.h.bf16 %v1738_v33 }
  0x24   :  { %v1504_v15 = vunpack.c.l.bf16 %v1735_v0  ;;  %v1505_v19 = vunpack.c.h.bf16 %v1735_v0  ;;  %v325_v38 = vmax.f32 %v261_v29, 0.0  ;;  %v265_v49 = vadd.f32 %v1985_v10, %v194_v40  ;;  %v1743_v40 = vld [vmem:[%s2540_s0 + $0xd0] sm:$0xff]  }
  0x25   :  { %1868 = vmatprep.mubr.bf16.mxu1 %v370_v34  ;;  %v198_v62 = vmul.f32 %v1517_v54, %v1974_v5  ;;  %v1520_v63 = vunpack.c.l.bf16 %v1739_v46  ;;  %v1521_v0 = vunpack.c.h.bf16 %v1739_v46  ;;  %v312_v4 = vmax.f32 %v2097_v3, 0.0 }
  0x26   :  { %v191_v22 = vmul.f32 %v1504_v15, %v1974_v5  ;;  %v192_v28 = vmul.f32 %v1505_v19, %v1974_v5  ;;  %v371_v48 = vpack.c.bf16 %v325_v38, %v324_v35  ;;  %v329_v61 = vmax.f32 %v265_v49, 0.0 }
  0x27   :  { %v1484_v8 = vunpack.c.l.bf16 %v1730_v47  ;;  %v313_v13 = vmax.f32 %v2102_v7, 0.0  ;;  %v1485_v14 = vunpack.c.h.bf16 %v1730_v47  ;;  %v199_v15 = vmul.f32 %v1520_v63, %v1974_v5 }
  0x28   :  { %v262_v30 = vadd.f32 %v1985_v10, %v191_v22  ;;  %v263_v36 = vadd.f32 %v1985_v10, %v192_v28  ;;  %1869 = vmatmul.mubr.bf16.vlgmr.msra.gmra.mxu1 %v371_v48  ;;  %v200_v17 = vmul.f32 %v1521_v0, %v1974_v5  ;;  %v180_v3 = vmul.f32 %v1481_v12, %v1974_v5 }
  0x29   :  { %v1524_v19 = vunpack.c.l.bf16 %v1740_v1  ;;  %v1525_v20 = vunpack.c.h.bf16 %v1740_v1  ;;  %v270_v24 = vadd.f32 %v1985_v10, %v199_v15  ;;  %v1528_v27 = vunpack.c.l.bf16 %v1741_v18  ;;  %v1744_v15 = vld [vmem:[%s2540_s0 + $0xd8] sm:$0xff]  }
  0x2a   :  { %1841 = vmatmul.mubr.bf16.gmra.mxu0 %v357_v32  ;;  %v193_v32 = vmul.f32 %v1508_v23, %v1974_v5  ;;  %v326_v39 = vmax.f32 %v262_v30, 0.0  ;;  %v327_v42 = vmax.f32 %v263_v36, 0.0  ;;  %v269_v23 = vadd.f32 %v1985_v10, %v198_v62 }
  0x2b   :  { %1844 = vmatprep.mubr.bf16.mxu0 %v358_v45  ;;  %v1516_v45 = vunpack.c.l.bf16 %v1738_v33  ;;  %v1529_v52 = vunpack.c.h.bf16 %v1741_v18  ;;  %v364_v12 = vpack.c.bf16 %v311_v6, %v310_v2  ;;  %v250_v28 = vadd.f32 %v1985_v10, %v2111_v16  ;;  %v1732_v33 = vld [vmem:[%s2540_s0 + $0x78] sm:$0xff]   ;;  %v1742_v16 = vld [vmem:[%s2540_s0 + $0xc8] sm:$0xff]  }
  0x2c   :  { %v264_v41 = vadd.f32 %v1985_v10, %v193_v32  ;;  %v372_v55 = vpack.c.bf16 %v327_v42, %v326_v39  ;;  %v251_v31 = vadd.f32 %v1985_v10, %v180_v3  ;;  %v181_v32 = vmul.f32 %v1484_v8, %v1974_v5 }
  0x2d   :  { %v197_v59 = vmul.f32 %v1516_v45, %v1974_v5  ;;  %v201_v34 = vmul.f32 %v1524_v19, %v1974_v5  ;;  %v202_v50 = vmul.f32 %v1525_v20, %v1974_v5  ;;  %v365_v35 = vpack.c.bf16 %v313_v13, %v312_v4 }
  0x2e   :  { %v328_v51 = vmax.f32 %v264_v41, 0.0  ;;  %1872 = vmatprep.mubr.bf16.mxu1 %v372_v55  ;;  %v182_v53 = vmul.f32 %v1485_v14, %v1974_v5  ;;  %v333_v6 = vmax.f32 %v269_v23, 0.0  ;;  %v334_v36 = vmax.f32 %v270_v24, 0.0 }
  0x2f   :  { %v268_v22 = vadd.f32 %v1985_v10, %v197_v59  ;;  %v203_v38 = vmul.f32 %v1528_v27, %v1974_v5  ;;  %v204_v39 = vmul.f32 %v1529_v52, %v1974_v5  ;;  %v314_v41 = vmax.f32 %v250_v28, 0.0 }
  0x30   :  { %v373_v21 = vpack.c.bf16 %v329_v61, %v328_v51  ;;  %v315_v45 = vmax.f32 %v251_v31, 0.0  ;;  %v272_v46 = vadd.f32 %v1985_v10, %v201_v34  ;;  %v273_v47 = vadd.f32 %v1985_v10, %v202_v50 }
  0x31   :  { %v332_v2 = vmax.f32 %v268_v22, 0.0  ;;  %v1532_v48 = vunpack.c.l.bf16 %v1742_v16  ;;  %v1533_v51 = vunpack.c.h.bf16 %v1742_v16  ;;  %v1536_v54 = vunpack.c.l.bf16 %v1743_v40 }
  0x32   :  { %1845 = vmatmul.mubr.bf16.gmra.mxu0 %v359_v56  ;;  %v196_v56 = vmul.f32 %v1513_v43, %v1974_v5  ;;  %1873 = vmatmul.mubr.bf16.gmra.mxu1 %v373_v21  ;;  %v1537_v55 = vunpack.c.h.bf16 %v1743_v40  ;;  %v275_v59 = vadd.f32 %v1985_v10, %v204_v39  ;;  %v253_v61 = vadd.f32 %v1985_v10, %v182_v53  ;;  %v1745_v21 = vld [vmem:[%s2540_s0 + $0xe0] sm:$0xff]  }
  0x33   :  { %1848 = vmatprep.mubr.bf16.mxu0 %v360_v57  ;;  %v266_v57 = vadd.f32 %v1985_v10, %v195_v44  ;;  %v1492_v44 = vunpack.c.l.bf16 %v1732_v33  ;;  %v375_v49 = vpack.c.bf16 %v333_v6, %v332_v2  ;;  %v1493_v0 = vunpack.c.h.bf16 %v1732_v33 }
  0x34   :  { %v267_v9 = vadd.f32 %v1985_v10, %v196_v56  ;;  %v252_v56 = vadd.f32 %v1985_v10, %v181_v32  ;;  %v366_v1 = vpack.c.bf16 %v315_v45, %v314_v41  ;;  %v336_v4 = vmax.f32 %v272_v46, 0.0  ;;  %v1747_v41 = vld [vmem:[%s2540_s0 + $0xf0] sm:$0xff]  }
  0x35   :  { %v330_v11 = vmax.f32 %v266_v57, 0.0  ;;  %v274_v57 = vadd.f32 %v1985_v10, %v203_v38  ;;  %v337_v8 = vmax.f32 %v273_v47, 0.0  ;;  %v207_v13 = vmul.f32 %v1536_v54, %v1974_v5 }
  0x36   :  { %v331_v7 = vmax.f32 %v267_v9, 0.0  ;;  %v205_v9 = vmul.f32 %v1532_v48, %v1974_v5  ;;  %v208_v14 = vmul.f32 %v1537_v55, %v1974_v5  ;;  %v339_v3 = vmax.f32 %v275_v59, 0.0 }
  0x37   :  { %v338_v18 = vmax.f32 %v274_v57, 0.0  ;;  %v186_v20 = vmul.f32 %v1493_v0, %v1974_v5  ;;  %v377_v23 = vpack.c.bf16 %v337_v8, %v336_v4  ;;  %v278_v27 = vadd.f32 %v1985_v10, %v207_v13 }
  0x38   :  { %v374_v26 = vpack.c.bf16 %v331_v7, %v330_v11  ;;  %v206_v11 = vmul.f32 %v1533_v51, %v1974_v5  ;;  %v317_v7 = vmax.f32 %v253_v61, 0.0  ;;  %v276_v24 = vadd.f32 %v1985_v10, %v205_v9 }
  0x39   :  { %v279_v52 = vadd.f32 %v1985_v10, %v208_v14  ;;  %v378_v28 = vpack.c.bf16 %v339_v3, %v338_v18  ;;  %v257_v33 = vadd.f32 %v1985_v10, %v186_v20  ;;  %v342_v2 = vmax.f32 %v278_v27, 0.0 }
  0x3a   :  { %1849 = vmatmul.mubr.bf16.gmra.mxu0 %v2084_v58  ;;  %v1731_v58 = vld [vmem:[%s2540_s0 + $0x70] sm:$0xff]   ;;  %1876 = vmatprep.mubr.bf16.mxu1 %v374_v26  ;;  %v1540_v26 = vunpack.c.l.bf16 %v1744_v15  ;;  %v340_v50 = vmax.f32 %v276_v24, 0.0  ;;  %v1552_v51 = vunpack.c.l.bf16 %v1747_v41  ;;  %v1553_v54 = vunpack.c.h.bf16 %v1747_v41 }
  0x3b   :  { %1852 = vmatprep.mubr.bf16.mxu0 %v2089_v60  ;;  %v271_v60 = vadd.f32 %v1985_v10, %v200_v17  ;;  %v1488_v29 = vunpack.c.l.bf16 %v1731_v58  ;;  %v1489_v30 = vunpack.c.h.bf16 %v1731_v58  ;;  %1877 = vmatmul.mubr.bf16.gmra.mxu1 %v375_v49  ;;  %v185_v17 = vmul.f32 %v1492_v44, %v1974_v5 }
  0x3c   :  { %v316_v58 = vmax.f32 %v252_v56, 0.0  ;;  %v343_v6 = vmax.f32 %v279_v52, 0.0  ;;  %v321_v40 = vmax.f32 %v257_v33, 0.0  ;;  %v216_v0 = vmul.f32 %v1553_v54, %v1974_v5 }
  0x3d   :  { %v335_v37 = vmax.f32 %v271_v60, 0.0  ;;  %v183_v42 = vmul.f32 %v1488_v29, %v1974_v5  ;;  %v184_v43 = vmul.f32 %v1489_v30, %v1974_v5  ;;  %v277_v60 = vadd.f32 %v1985_v10, %v206_v11 }
  0x3e   :  { %v1544_v29 = vunpack.c.l.bf16 %v1745_v21  ;;  %v1545_v30 = vunpack.c.h.bf16 %v1745_v21  ;;  %v367_v31 = vpack.c.bf16 %v317_v7, %v316_v58  ;;  %v256_v32 = vadd.f32 %v1985_v10, %v185_v17 }
  0x3f   :  { %v254_v62 = vadd.f32 %v1985_v10, %v183_v42  ;;  %v255_v63 = vadd.f32 %v1985_v10, %v184_v43  ;;  %v341_v53 = vmax.f32 %v277_v60, 0.0  ;;  %v380_v45 = vpack.c.bf16 %v343_v6, %v342_v2 }
  0x40   :  { %v212_v38 = vmul.f32 %v1545_v30, %v1974_v5  ;;  %v320_v39 = vmax.f32 %v256_v32, 0.0  ;;  %v287_v17 = vadd.f32 %v1985_v10, %v216_v0 }
  0x41   :  { %v318_v19 = vmax.f32 %v254_v62, 0.0  ;;  %v319_v22 = vmax.f32 %v255_v63, 0.0  ;;  %v379_v44 = vpack.c.bf16 %v341_v53, %v340_v50  ;;  %v215_v63 = vmul.f32 %v1552_v51, %v1974_v5 }
  0x42   :  { %1853 = vmatmul.mubr.bf16.gmra.mxu0 %v2120_v25  ;;  %v376_v25 = vpack.c.bf16 %v335_v37, %v334_v36  ;;  %v1746_v36 = vld [vmem:[%s2540_s0 + $0xe8] sm:$0xff]   ;;  %v211_v37 = vmul.f32 %v1544_v29, %v1974_v5  ;;  %v283_v49 = vadd.f32 %v1985_v10, %v212_v38  ;;  %v369_v55 = vpack.c.bf16 %v321_v40, %v320_v39 }
  0x43   :  { %1856 = vmatprep.mubr.bf16.mxu0 %v364_v12  ;;  %v1541_v12 = vunpack.c.h.bf16 %v1744_v15  ;;  %v368_v34 = vpack.c.bf16 %v319_v22, %v318_v19  ;;  %v1548_v43 = vunpack.c.l.bf16 %v1746_v36  ;;  %v1549_v47 = vunpack.c.h.bf16 %v1746_v36 }
  0x44   :  { %1880 = vmatprep.mubr.bf16.mxu1 %v376_v25  ;;  %v282_v48 = vadd.f32 %v1985_v10, %v211_v37  ;;  %v347_v62 = vmax.f32 %v283_v49, 0.0  ;;  %v286_v15 = vadd.f32 %v1985_v10, %v215_v63  ;;  %v351_v20 = vmax.f32 %v287_v17, 0.0 }
  0x45   :  { %1881 = vmatmul.mubr.bf16.gmra.mxu1 %v377_v23  ;;  %v210_v16 = vmul.f32 %v1541_v12, %v1974_v5  ;;  %v213_v56 = vmul.f32 %v1548_v43, %v1974_v5  ;;  %v214_v59 = vmul.f32 %v1549_v47, %v1974_v5 }
  0x46   :  { %1884 = vmatprep.mubr.bf16.mxu1 %v378_v28  ;;  %v346_v61 = vmax.f32 %v282_v48, 0.0  ;;  %v350_v19 = vmax.f32 %v286_v15, 0.0 }
  0x47   :  { %v281_v46 = vadd.f32 %v1985_v10, %v210_v16  ;;  %v284_v4 = vadd.f32 %v1985_v10, %v213_v56  ;;  %v285_v9 = vadd.f32 %v1985_v10, %v214_v59 }
  0x48   :  { %v382_v14 = vpack.c.bf16 %v347_v62, %v346_v61  ;;  %v384_v24 = vpack.c.bf16 %v351_v20, %v350_v19 }
  0x49   :  { %v345_v57 = vmax.f32 %v281_v46, 0.0  ;;  %v348_v18 = vmax.f32 %v284_v4, 0.0  ;;  %v349_v3 = vmax.f32 %v285_v9, 0.0 }
  0x4a   :  { %1857 = vmatmul.mubr.bf16.gmra.mxu0 %v365_v35  ;;  %v209_v35 = vmul.f32 %v1540_v26, %v1974_v5 }
  0x4b   :  { %1860 = vmatprep.mubr.bf16.mxu0 %v366_v1  ;;  %v1748_v1 = vld [vmem:[%s2540_s0 + $0xf8] sm:$0xff]   ;;  %v383_v21 = vpack.c.bf16 %v349_v3, %v348_v18 }
  0x4c   :  { %v280_v42 = vadd.f32 %v1985_v10, %v209_v35  ;;  %v1556_v11 = vunpack.c.l.bf16 %v1748_v1  ;;  %v1557_v13 = vunpack.c.h.bf16 %v1748_v1 }
  0x4d   :  { %1885 = vmatmul.mubr.bf16.gmra.mxu1 %v379_v44 }
  0x4e   :  { %v344_v25 = vmax.f32 %v280_v42, 0.0  ;;  %1888 = vmatprep.mubr.bf16.mxu1 %v380_v45  ;;  %v217_v58 = vmul.f32 %v1556_v11, %v1974_v5  ;;  %v218_v7 = vmul.f32 %v1557_v13, %v1974_v5 }
  0x50   :  { %v381_v8 = vpack.c.bf16 %v345_v57, %v344_v25  ;;  %v288_v22 = vadd.f32 %v1985_v10, %v217_v58  ;;  %v289_v23 = vadd.f32 %v1985_v10, %v218_v7 }
  0x52   :  { %1861 = vmatmul.mubr.bf16.gmra.mxu0 %v367_v31  ;;  %v352_v26 = vmax.f32 %v288_v22, 0.0  ;;  %v353_v60 = vmax.f32 %v289_v23, 0.0 }
  0x53   :  { %1864 = vmatprep.mubr.bf16.mxu0 %v368_v34 }
  0x54   :  { %v385_v27 = vpack.c.bf16 %v353_v60, %v352_v26 }
  0x55   :  { %1889 = vmatmul.mubr.bf16.gmra.mxu1 %v381_v8 }
  0x56   :  { %1892 = vmatprep.mubr.bf16.mxu1 %v382_v14 }
  0x5a   :  { %1865 = vmatmul.mubr.bf16.gmra.mxu0 %v369_v55 }
  0x5d   :  { %1893 = vmatmul.mubr.bf16.gmra.mxu1 %v383_v21 }
  0x5e   :  { %1896 = vmatprep.mubr.bf16.mxu1 %v384_v24 }
  0x65   :  { %1897 = vmatmul.mubr.bf16.gmra.mxu1 %v385_v27 }
  0xe2   :  { %v1838_v52 = vpop.f32.mrf.mxu0 }
  0xe3   :  { %v1130_v34 = vmul.f32 %v1838_v52, %v1838_v52 }
  0xe4   :  { %v484_v12 = vpop.f32.mrf.mxu0 }
  0xe5   :  { %v1128_v30 = vmul.f32 %v484_v12, %v484_v12 }
  0xe6   :  { %v1839_v28 = vpop.f32.mrf.mxu0 }
  0xe7   :  { %v1566_v29 = vpack.c.bf16 %v1839_v28, %v1838_v52  ;;  %v1131_v2 = vmul.f32 %v1839_v28, %v1839_v28 }
  0xe8   :  { %v487_v5 = vpop.f32.mrf.mxu0  ;;  %v2260_v0 = vpop.f32.mrf.mxu1 }
  0xe9   :  { %1749 = vst [vmem:[%s2543_s4 + $0x8] sm:$0xff] %v1566_v29   ;;  %v1561_v31 = vpack.c.bf16 %v487_v5, %v484_v12  ;;  %v1059_v32 = vadd.f32 %v487_v5, %v484_v12  ;;  %v1129_v10 = vmul.f32 %v487_v5, %v487_v5 }
  0xea   :  { %v1842_v33 = vpop.f32.mrf.mxu0  ;;  %v2265_v13 = vpop.f32.mrf.mxu1 }
  0xeb   :  { %1562 = vst [vmem:[%s2543_s4] sm:$0xff] %v1561_v31   ;;  %v1060_v50 = vadd.f32 %v1838_v52, %v1059_v32  ;;  %v1192_v35 = vadd.f32 %v1129_v10, %v1128_v30  ;;  %v1134_v47 = vmul.f32 %v1842_v33, %v1842_v33 }
  0xec   :  { %v500_v53 = vpop.f32.mrf.mxu0  ;;  %v2270_v3 = vpop.f32.mrf.mxu1 }
  0xed   :  { %v1193_v6 = vadd.f32 %v1192_v35, %v1130_v34  ;;  %v1061_v16 = vadd.f32 %v1839_v28, %v1060_v50  ;;  %v1132_v38 = vmul.f32 %v500_v53, %v500_v53  ;;  %v1646_v20 = vpack.c.bf16 %v2270_v3, %v2260_v0 }
  0xee   :  { %v1843_v36 = vpop.f32.mrf.mxu0  ;;  %v2274_v22 = vpop.f32.mrf.mxu1 }
  0xef   :  { %v1062_v37 = vadd.f32 %v1061_v16, %v500_v53  ;;  %v1194_v39 = vadd.f32 %v1193_v6, %v1131_v2  ;;  %v1576_v40 = vpack.c.bf16 %v1843_v36, %v1842_v33  ;;  %v1135_v54 = vmul.f32 %v1843_v36, %v1843_v36  ;;  %1765 = vst [vmem:[%s2543_s4 + $0x88] sm:$0xff] %v1646_v20  }
  0xf0   :  { %v503_v41 = vpop.f32.mrf.mxu0  ;;  %v1641_v52 = vpack.c.bf16 %v2274_v22, %v2265_v13 }
  0xf1   :  { %v1195_v42 = vadd.f32 %v1194_v39, %v1132_v38  ;;  %1751 = vst [vmem:[%s2543_s4 + $0x18] sm:$0xff] %v1576_v40   ;;  %v1571_v43 = vpack.c.bf16 %v503_v41, %v500_v53  ;;  %v1063_v44 = vadd.f32 %v1062_v37, %v503_v41  ;;  %v1133_v45 = vmul.f32 %v503_v41, %v503_v41 }
  0xf2   :  { %v1846_v46 = vpop.f32.mrf.mxu0  ;;  %v2281_v12 = vpop.f32.mrf.mxu1  ;;  %1764 = vst [vmem:[%s2543_s4 + $0x80] sm:$0xff] %v1641_v52  }
  0xf3   :  { %1750 = vst [vmem:[%s2543_s4 + $0x10] sm:$0xff] %v1571_v43   ;;  %v1064_v48 = vadd.f32 %v1842_v33, %v1063_v44  ;;  %v1196_v49 = vadd.f32 %v1195_v42, %v1133_v45  ;;  %v1138_v14 = vmul.f32 %v1846_v46, %v1846_v46 }
  0xf4   :  { %v516_v51 = vpop.f32.mrf.mxu0  ;;  %v2289_v32 = vpop.f32.mrf.mxu1 }
  0xf5   :  { %v1197_v55 = vadd.f32 %v1196_v49, %v1134_v47  ;;  %v1065_v56 = vadd.f32 %v1843_v36, %v1064_v48  ;;  %v1136_v59 = vmul.f32 %v516_v51, %v516_v51 }
  0xf6   :  { %v1847_v25 = vpop.f32.mrf.mxu0  ;;  %v2294_v35 = vpop.f32.mrf.mxu1 }
  0xf7   :  { %v1066_v57 = vadd.f32 %v1065_v56, %v516_v51  ;;  %v1198_v61 = vadd.f32 %v1197_v55, %v1135_v54  ;;  %v1586_v62 = vpack.c.bf16 %v1847_v25, %v1846_v46  ;;  %v1139_v58 = vmul.f32 %v1847_v25, %v1847_v25 }
  0xf8   :  { %v519_v63 = vpop.f32.mrf.mxu0  ;;  %v1656_v16 = vpack.c.bf16 %v2294_v35, %v2281_v12  ;;  %v2298_v37 = vpop.f32.mrf.mxu1 }
  0xf9   :  { %v1199_v1 = vadd.f32 %v1198_v61, %v1136_v59  ;;  %1753 = vst [vmem:[%s2543_s4 + $0x28] sm:$0xff] %v1586_v62   ;;  %v1581_v4 = vpack.c.bf16 %v519_v63, %v516_v51  ;;  %v1067_v8 = vadd.f32 %v1066_v57, %v519_v63  ;;  %v1137_v9 = vmul.f32 %v519_v63, %v519_v63 }
  0xfa   :  { %v1850_v11 = vpop.f32.mrf.mxu0  ;;  %1767 = vst [vmem:[%s2543_s4 + $0x98] sm:$0xff] %v1656_v16   ;;  %v1651_v43 = vpack.c.bf16 %v2298_v37, %v2289_v32 }
  0xfb   :  { %1752 = vst [vmem:[%s2543_s4 + $0x20] sm:$0xff] %v1581_v4   ;;  %v1068_v15 = vadd.f32 %v1846_v46, %v1067_v8  ;;  %v1200_v17 = vadd.f32 %v1199_v1, %v1137_v9  ;;  %v1142_v10 = vmul.f32 %v1850_v11, %v1850_v11  ;;  %v2305_v44 = vpop.f32.mrf.mxu1 }
  0xfc   :  { %v532_v18 = vpop.f32.mrf.mxu0  ;;  %1766 = vst [vmem:[%s2543_s4 + $0x90] sm:$0xff] %v1651_v43  }
  0xfd   :  { %v1201_v7 = vadd.f32 %v1200_v17, %v1138_v14  ;;  %v1069_v19 = vadd.f32 %v1847_v25, %v1068_v15  ;;  %v1140_v24 = vmul.f32 %v532_v18, %v532_v18  ;;  %v2313_v51 = vpop.f32.mrf.mxu1 }
  0xfe   :  { %v1851_v21 = vpop.f32.mrf.mxu0 }
  0xff   :  { %v1070_v23 = vadd.f32 %v1069_v19, %v532_v18  ;;  %v1202_v26 = vadd.f32 %v1201_v7, %v1139_v58  ;;  %v1596_v60 = vpack.c.bf16 %v1851_v21, %v1850_v11  ;;  %v1143_v53 = vmul.f32 %v1851_v21, %v1851_v21  ;;  %v2318_v57 = vpop.f32.mrf.mxu1 }
 0x100   :  { %v535_v27 = vpop.f32.mrf.mxu0  ;;  %v1666_v63 = vpack.c.bf16 %v2318_v57, %v2305_v44 }
 0x101   :  { %v1203_v28 = vadd.f32 %v1202_v26, %v1140_v24  ;;  %1755 = vst [vmem:[%s2543_s4 + $0x38] sm:$0xff] %v1596_v60   ;;  %v1591_v29 = vpack.c.bf16 %v535_v27, %v532_v18  ;;  %v1071_v5 = vadd.f32 %v1070_v23, %v535_v27  ;;  %v1141_v30 = vmul.f32 %v535_v27, %v535_v27  ;;  %v2322_v4 = vpop.f32.mrf.mxu1 }
 0x102   :  { %v1854_v31 = vpop.f32.mrf.mxu0  ;;  %1769 = vst [vmem:[%s2543_s4 + $0xa8] sm:$0xff] %v1666_v63   ;;  %v1661_v17 = vpack.c.bf16 %v2322_v4, %v2313_v51 }
 0x103   :  { %1754 = vst [vmem:[%s2543_s4 + $0x30] sm:$0xff] %v1591_v29   ;;  %v1072_v33 = vadd.f32 %v1850_v11, %v1071_v5  ;;  %v1204_v34 = vadd.f32 %v1203_v28, %v1141_v30  ;;  %v1146_v54 = vmul.f32 %v1854_v31, %v1854_v31 }
 0x104   :  { %v548_v50 = vpop.f32.mrf.mxu0  ;;  %1768 = vst [vmem:[%s2543_s4 + $0xa0] sm:$0xff] %v1661_v17  }
 0x105   :  { %v1205_v2 = vadd.f32 %v1204_v34, %v1142_v10  ;;  %v1073_v6 = vadd.f32 %v1851_v21, %v1072_v33  ;;  %v1144_v39 = vmul.f32 %v548_v50, %v548_v50  ;;  %v2329_v18 = vpop.f32.mrf.mxu1 }
 0x106   :  { %v1855_v36 = vpop.f32.mrf.mxu0 }
 0x107   :  { %v1074_v38 = vadd.f32 %v1073_v6, %v548_v50  ;;  %v1206_v40 = vadd.f32 %v1205_v2, %v1143_v53  ;;  %v1606_v41 = vpack.c.bf16 %v1855_v36, %v1854_v31  ;;  %v1147_v59 = vmul.f32 %v1855_v36, %v1855_v36  ;;  %v2337_v23 = vpop.f32.mrf.mxu1 }
 0x108   :  { %v551_v42 = vpop.f32.mrf.mxu0 }
 0x109   :  { %v1207_v45 = vadd.f32 %v1206_v40, %v1144_v39  ;;  %1757 = vst [vmem:[%s2543_s4 + $0x48] sm:$0xff] %v1606_v41   ;;  %v1601_v46 = vpack.c.bf16 %v551_v42, %v548_v50  ;;  %v1075_v47 = vadd.f32 %v1074_v38, %v551_v42  ;;  %v1145_v48 = vmul.f32 %v551_v42, %v551_v42  ;;  %v2342_v52 = vpop.f32.mrf.mxu1 }
 0x10a   :  { %v1858_v49 = vpop.f32.mrf.mxu0  ;;  %v1676_v30 = vpack.c.bf16 %v2342_v52, %v2329_v18 }
 0x10b   :  { %1756 = vst [vmem:[%s2543_s4 + $0x40] sm:$0xff] %v1601_v46   ;;  %v1076_v55 = vadd.f32 %v1854_v31, %v1075_v47  ;;  %v1208_v56 = vadd.f32 %v1207_v45, %v1145_v48  ;;  %v1150_v24 = vmul.f32 %v1858_v49, %v1858_v49  ;;  %v2346_v10 = vpop.f32.mrf.mxu1 }
 0x10c   :  { %v564_v25 = vpop.f32.mrf.mxu0  ;;  %1771 = vst [vmem:[%s2543_s4 + $0xb8] sm:$0xff] %v1676_v30   ;;  %v1671_v6 = vpack.c.bf16 %v2346_v10, %v2337_v23 }
 0x10d   :  { %v1209_v61 = vadd.f32 %v1208_v56, %v1146_v54  ;;  %v1077_v62 = vadd.f32 %v1855_v36, %v1076_v55  ;;  %v1148_v9 = vmul.f32 %v564_v25, %v564_v25  ;;  %v2353_v16 = vpop.f32.mrf.mxu1 }
 0x10e   :  { %v1859_v1 = vpop.f32.mrf.mxu0  ;;  %1770 = vst [vmem:[%s2543_s4 + $0xb0] sm:$0xff] %v1671_v6   ;;  %v1162_v6 = vmul.f32 %v2260_v0, %v2260_v0 }
 0x10f   :  { %v1078_v8 = vadd.f32 %v1077_v62, %v564_v25  ;;  %v1210_v11 = vadd.f32 %v1209_v61, %v1147_v59  ;;  %v1616_v14 = vpack.c.bf16 %v1859_v1, %v1858_v49  ;;  %v1151_v28 = vmul.f32 %v1859_v1, %v1859_v1  ;;  %v2361_v42 = vpop.f32.mrf.mxu1 }
 0x110   :  { %v567_v15 = vpop.f32.mrf.mxu0 }
 0x111   :  { %v1211_v58 = vadd.f32 %v1210_v11, %v1148_v9  ;;  %1759 = vst [vmem:[%s2543_s4 + $0x58] sm:$0xff] %v1616_v14   ;;  %v1611_v7 = vpack.c.bf16 %v567_v15, %v564_v25  ;;  %v1079_v19 = vadd.f32 %v1078_v8, %v567_v15  ;;  %v1149_v20 = vmul.f32 %v567_v15, %v567_v15  ;;  %v2366_v48 = vpop.f32.mrf.mxu1 }
 0x112   :  { %v1862_v21 = vpop.f32.mrf.mxu0  ;;  %v1686_v56 = vpack.c.bf16 %v2366_v48, %v2353_v16 }
 0x113   :  { %1758 = vst [vmem:[%s2543_s4 + $0x50] sm:$0xff] %v1611_v7   ;;  %v1080_v26 = vadd.f32 %v1858_v49, %v1079_v19  ;;  %v1212_v60 = vadd.f32 %v1211_v58, %v1149_v20  ;;  %v1154_v43 = vmul.f32 %v1862_v21, %v1862_v21  ;;  %v2370_v59 = vpop.f32.mrf.mxu1 }
 0x114   :  { %v580_v27 = vpop.f32.mrf.mxu0  ;;  %1773 = vst [vmem:[%s2543_s4 + $0xc8] sm:$0xff] %v1686_v56   ;;  %v1681_v9 = vpack.c.bf16 %v2370_v59, %v2361_v42  ;;  %v1165_v56 = vmul.f32 %v2298_v37, %v2298_v37 }
 0x115   :  { %v1213_v29 = vadd.f32 %v1212_v60, %v1150_v24  ;;  %v1081_v5 = vadd.f32 %v1859_v1, %v1080_v26  ;;  %v1152_v34 = vmul.f32 %v580_v27, %v580_v27  ;;  %v2377_v11 = vpop.f32.mrf.mxu1 }
 0x116   :  { %v1863_v31 = vpop.f32.mrf.mxu0  ;;  %1772 = vst [vmem:[%s2543_s4 + $0xc0] sm:$0xff] %v1681_v9  }
 0x117   :  { %v1082_v33 = vadd.f32 %v1081_v5, %v580_v27  ;;  %v1214_v50 = vadd.f32 %v1213_v29, %v1151_v28  ;;  %v1626_v53 = vpack.c.bf16 %v1863_v31, %v1862_v21  ;;  %v1155_v49 = vmul.f32 %v1863_v31, %v1863_v31  ;;  %v2385_v7 = vpop.f32.mrf.mxu1 }
 0x118   :  { %v583_v2 = vpop.f32.mrf.mxu0  ;;  %v1160_v5 = vmul.f32 %v2265_v13, %v2265_v13 }
 0x119   :  { %v1215_v36 = vadd.f32 %v1214_v50, %v1152_v34  ;;  %1761 = vst [vmem:[%s2543_s4 + $0x68] sm:$0xff] %v1626_v53   ;;  %v1621_v38 = vpack.c.bf16 %v583_v2, %v580_v27  ;;  %v1083_v39 = vadd.f32 %v1082_v33, %v583_v2  ;;  %v1153_v40 = vmul.f32 %v583_v2, %v583_v2  ;;  %v2390_v24 = vpop.f32.mrf.mxu1 }
 0x11a   :  { %v1866_v41 = vpop.f32.mrf.mxu0  ;;  %v1696_v28 = vpack.c.bf16 %v2390_v24, %v2377_v11  ;;  %v1161_v53 = vmul.f32 %v2274_v22, %v2274_v22 }
 0x11b   :  { %1760 = vst [vmem:[%s2543_s4 + $0x60] sm:$0xff] %v1621_v38   ;;  %v1084_v45 = vadd.f32 %v1862_v21, %v1083_v39  ;;  %v1216_v46 = vadd.f32 %v1215_v36, %v1153_v40  ;;  %v1158_v19 = vmul.f32 %v1866_v41, %v1866_v41  ;;  %v2394_v29 = vpop.f32.mrf.mxu1  ;;  %v1163_v40 = vmul.f32 %v2270_v3, %v2270_v3 }
 0x11c   :  { %v596_v47 = vpop.f32.mrf.mxu0  ;;  %1775 = vst [vmem:[%s2543_s4 + $0xd8] sm:$0xff] %v1696_v28   ;;  %v1691_v33 = vpack.c.bf16 %v2394_v29, %v2385_v7 }
 0x11d   :  { %v1217_v54 = vadd.f32 %v1216_v46, %v1154_v43  ;;  %v1085_v55 = vadd.f32 %v1863_v31, %v1084_v45  ;;  %v1156_v62 = vmul.f32 %v596_v47, %v596_v47  ;;  %v2404_v34 = vpop.f32.mrf.mxu1 }
 0x11e   :  { %v1867_v25 = vpop.f32.mrf.mxu0  ;;  %1774 = vst [vmem:[%s2543_s4 + $0xd0] sm:$0xff] %v1691_v33  }
 0x11f   :  { %v1086_v61 = vadd.f32 %v1085_v55, %v596_v47  ;;  %v1218_v63 = vadd.f32 %v1217_v54, %v1155_v49  ;;  %v1636_v1 = vpack.c.bf16 %v1867_v25, %v1866_v41  ;;  %v1159_v26 = vmul.f32 %v1867_v25, %v1867_v25 }
 0x120   :  { %v599_v8 = vpop.f32.mrf.mxu0 }
 0x121   :  { %v1219_v14 = vadd.f32 %v1218_v63, %v1156_v62  ;;  %1763 = vst [vmem:[%s2543_s4 + $0x78] sm:$0xff] %v1636_v1   ;;  %v1631_v15 = vpack.c.bf16 %v599_v8, %v596_v47  ;;  %v1087_v17 = vadd.f32 %v1086_v61, %v599_v8  ;;  %v1157_v58 = vmul.f32 %v599_v8, %v599_v8 }
 0x122   :  { %v1164_v47 = vmul.f32 %v2289_v32, %v2289_v32  ;;  %v1167_v1 = vmul.f32 %v2294_v35, %v2294_v35 }
 0x123   :  { %1762 = vst [vmem:[%s2543_s4 + $0x70] sm:$0xff] %v1631_v15   ;;  %v1088_v20 = vadd.f32 %v1866_v41, %v1087_v17  ;;  %v1220_v21 = vadd.f32 %v1219_v14, %v1157_v58  ;;  %v1168_v17 = vmul.f32 %v2313_v51, %v2313_v51 }
 0x125   :  { %v1089_v60 = vadd.f32 %v1867_v25, %v1088_v20  ;;  %v1221_v27 = vadd.f32 %v1220_v21, %v1158_v19  ;;  %v1166_v25 = vmul.f32 %v2281_v12, %v2281_v12  ;;  %v1169_v20 = vmul.f32 %v2322_v4, %v2322_v4 }
 0x127   :  { %v1222_v30 = vadd.f32 %v1221_v27, %v1159_v26  ;;  %v1090_v31 = vadd.f32 %v1089_v60, %v2265_v13  ;;  %v2412_v13 = vpop.f32.mrf.mxu1  ;;  %v1171_v60 = vmul.f32 %v2318_v57, %v2318_v57 }
 0x129   :  { %v1091_v50 = vadd.f32 %v1090_v31, %v2274_v22  ;;  %v1223_v2 = vadd.f32 %v1222_v30, %v1160_v5  ;;  %v2417_v39 = vpop.f32.mrf.mxu1 }
 0x12a   :  { %v1706_v43 = vpack.c.bf16 %v2417_v39, %v2404_v34 }
 0x12b   :  { %v1092_v36 = vadd.f32 %v2260_v0, %v1091_v50  ;;  %v1224_v38 = vadd.f32 %v1223_v2, %v1161_v53  ;;  %v2424_v45 = vpop.f32.mrf.mxu1  ;;  %v1173_v50 = vmul.f32 %v2346_v10, %v2346_v10 }
 0x12c   :  { %1777 = vst [vmem:[%s2543_s4 + $0xe8] sm:$0xff] %v1706_v43   ;;  %v1701_v49 = vpack.c.bf16 %v2424_v45, %v2412_v13 }
 0x12d   :  { %v1225_v41 = vadd.f32 %v1224_v38, %v1162_v6  ;;  %v1093_v22 = vadd.f32 %v2270_v3, %v1092_v36  ;;  %v2434_v54 = vpop.f32.mrf.mxu1  ;;  %v1176_v38 = vmul.f32 %v2361_v42, %v2361_v42 }
 0x12e   :  { %1776 = vst [vmem:[%s2543_s4 + $0xe0] sm:$0xff] %v1701_v49   ;;  %v1180_v49 = vmul.f32 %v2385_v7, %v2385_v7 }
 0x12f   :  { %v1094_v46 = vadd.f32 %v1093_v22, %v2289_v32  ;;  %v1226_v0 = vadd.f32 %v1225_v41, %v1163_v40  ;;  %v2442_v32 = vpop.f32.mrf.mxu1  ;;  %v1177_v22 = vmul.f32 %v2370_v59, %v2370_v59 }
 0x131   :  { %v1227_v3 = vadd.f32 %v1226_v0, %v1164_v47  ;;  %v1095_v55 = vadd.f32 %v1094_v46, %v2298_v37  ;;  %v2447_v63 = vpop.f32.mrf.mxu1 }
 0x132   :  { %v1716_v9 = vpack.c.bf16 %v2447_v63, %v2434_v54 }
 0x133   :  { %v1096_v61 = vadd.f32 %v2281_v12, %v1095_v55  ;;  %v1228_v62 = vadd.f32 %v1227_v3, %v1165_v56  ;;  %v2454_v14 = vpop.f32.mrf.mxu1  ;;  %v1181_v56 = vmul.f32 %v2394_v29, %v2394_v29 }
 0x134   :  { %1779 = vst [vmem:[%s2543_s4 + $0xf8] sm:$0xff] %v1716_v9   ;;  %v1711_v58 = vpack.c.bf16 %v2454_v14, %v2442_v32 }
 0x135   :  { %v1229_v8 = vadd.f32 %v1228_v62, %v1166_v25  ;;  %v1097_v37 = vadd.f32 %v2294_v35, %v1096_v61 }
 0x136   :  { %1778 = vst [vmem:[%s2543_s4 + $0xf0] sm:$0xff] %v1711_v58  }
 0x137   :  { %v1098_v15 = vadd.f32 %v1097_v37, %v2313_v51  ;;  %v1230_v12 = vadd.f32 %v1229_v8, %v1167_v1  ;;  %v1170_v51 = vmul.f32 %v2305_v44, %v2305_v44  ;;  %v1184_v8 = vmul.f32 %v2412_v13, %v2412_v13 }
 0x139   :  { %v1231_v19 = vadd.f32 %v1230_v12, %v1168_v17  ;;  %v1099_v35 = vadd.f32 %v1098_v15, %v2322_v4  ;;  %v1172_v4 = vmul.f32 %v2337_v23, %v2337_v23  ;;  %v1185_v15 = vmul.f32 %v2424_v45, %v2424_v45 }
 0x13b   :  { %v1100_v21 = vadd.f32 %v2305_v44, %v1099_v35  ;;  %v1232_v26 = vadd.f32 %v1231_v19, %v1169_v20  ;;  %v1174_v44 = vmul.f32 %v2329_v18, %v2329_v18  ;;  %v1188_v35 = vmul.f32 %v2442_v32, %v2442_v32 }
 0x13d   :  { %v1233_v27 = vadd.f32 %v1232_v26, %v1170_v51  ;;  %v1101_v28 = vadd.f32 %v2318_v57, %v1100_v21  ;;  %v1175_v57 = vmul.f32 %v2342_v52, %v2342_v52  ;;  %v1189_v21 = vmul.f32 %v2454_v14, %v2454_v14 }
 0x13f   :  { %v1102_v5 = vadd.f32 %v1101_v28, %v2337_v23  ;;  %v1234_v30 = vadd.f32 %v1233_v27, %v1171_v60 }
 0x141   :  { %v1235_v31 = vadd.f32 %v1234_v30, %v1172_v4  ;;  %v1103_v33 = vadd.f32 %v1102_v5, %v2346_v10 }
 0x143   :  { %v1104_v53 = vadd.f32 %v2329_v18, %v1103_v33  ;;  %v1236_v2 = vadd.f32 %v1235_v31, %v1173_v50  ;;  %v1178_v18 = vmul.f32 %v2353_v16, %v2353_v16  ;;  %v1925_v50 = vmov 1966171168  }
 0x145   :  { %v1237_v6 = vadd.f32 %v1236_v2, %v1174_v44  ;;  %v1105_v36 = vadd.f32 %v2342_v52, %v1104_v53  ;;  %v1179_v52 = vmul.f32 %v2366_v48, %v2366_v48  ;;  %v1267_v44 = vlaneseq }
 0x147   :  { %v1106_v23 = vadd.f32 %v1105_v36, %v2361_v42  ;;  %v1238_v40 = vadd.f32 %v1237_v6, %v1175_v57  ;;  %v1268_v36 = vshrl.u32 %v1267_v44, 7  ;;  %vm1281_vm0 = vcmp.lt.s32.totalorder %v1267_v44, 256 }
 0x149   :  { %v1239_v41 = vadd.f32 %v1238_v40, %v1176_v38  ;;  %v1107_v10 = vadd.f32 %v1106_v23, %v2370_v59 }
 0x14b   :  { %v1108_v43 = vadd.f32 %v2353_v16, %v1107_v10  ;;  %v1240_v46 = vadd.f32 %v1239_v41, %v1177_v22  ;;  %v1182_v16 = vmul.f32 %v2377_v11, %v2377_v11 }
 0x14d   :  { %v1241_v47 = vadd.f32 %v1240_v46, %v1178_v18  ;;  %v1109_v0 = vadd.f32 %v2366_v48, %v1108_v43  ;;  %v1183_v48 = vmul.f32 %v2390_v24, %v2390_v24 }
 0x14f   :  { %v1110_v42 = vadd.f32 %v1109_v0, %v2385_v7  ;;  %v1242_v3 = vadd.f32 %v1241_v47, %v1179_v52 }
 0x151   :  { %v1243_v55 = vadd.f32 %v1242_v3, %v1180_v49  ;;  %v1111_v59 = vadd.f32 %v1110_v42, %v2394_v29 }
 0x153   :  { %v1112_v25 = vadd.f32 %v2377_v11, %v1111_v59  ;;  %v1244_v61 = vadd.f32 %v1243_v55, %v1181_v56  ;;  %v1186_v11 = vmul.f32 %v2404_v34, %v2404_v34 }
 0x155   :  { %v1245_v62 = vadd.f32 %v1244_v61, %v1182_v16  ;;  %v1113_v1 = vadd.f32 %v2390_v24, %v1112_v25  ;;  %v1187_v24 = vmul.f32 %v2417_v39, %v2417_v39 }
 0x157   :  { %v1114_v7 = vadd.f32 %v1113_v1, %v2412_v13  ;;  %v1246_v37 = vadd.f32 %v1245_v62, %v1183_v48 }
 0x159   :  { %v1247_v9 = vadd.f32 %v1246_v37, %v1184_v8  ;;  %v1115_v29 = vadd.f32 %v1114_v7, %v2424_v45 }
 0x15b   :  { %v1116_v17 = vadd.f32 %v2404_v34, %v1115_v29  ;;  %v1248_v12 = vadd.f32 %v1247_v9, %v1185_v15  ;;  %v1190_v34 = vmul.f32 %v2434_v54, %v2434_v54 }
 0x15d   :  { %v1249_v58 = vadd.f32 %v1248_v12, %v1186_v11  ;;  %v1117_v19 = vadd.f32 %v2417_v39, %v1116_v17  ;;  %v1191_v39 = vmul.f32 %v2447_v63, %v2447_v63 }
 0x15f   :  { %v1118_v13 = vadd.f32 %v1117_v19, %v2442_v32  ;;  %v1250_v20 = vadd.f32 %v1249_v58, %v1187_v24 }
 0x161   :  { %v1251_v51 = vadd.f32 %v1250_v20, %v1188_v35  ;;  %v1119_v45 = vadd.f32 %v1118_v13, %v2454_v14  ;;  %v1265_v14 = vunpack.c.l.s4 %v1925_v50 }
 0x163   :  { %v1120_v26 = vadd.f32 %v2434_v54, %v1119_v45  ;;  %v1252_v60 = vadd.f32 %v1251_v51, %v1189_v21  ;;  %v1266_v6 = vunpack.c.0.s8 %v1265_v14 }
 0x165   :  { %v1121_v27 = vadd.f32 %v2447_v63, %v1120_v26  ;;  %v1253_v28 = vadd.f32 %v1252_v60, %v1190_v34  ;;  %v1269_v63 = vsub.s32 %v1266_v6, %v1268_v36 }
 0x167   :  { %v1122_v32 = vrot.slane %v1121_v27, 4  ;;  %v1254_v5 = vadd.f32 %v1253_v28, %v1191_v39 }
 0x169   :  { %v1123_v4 = vadd.f32 %v1122_v32, %v1121_v27  ;;  %v1255_v30 = vrot.slane %v1254_v5, 4 }
 0x16b   :  { %v1124_v31 = vrot.slane %v1123_v4, 2  ;;  %v1256_v33 = vadd.f32 %v1255_v30, %v1254_v5 }
 0x16d   :  { %v1125_v53 = vadd.f32 %v1124_v31, %v1123_v4  ;;  %v1257_v2 = vrot.slane %v1256_v33, 2 }
 0x16f   :  { %v1126_v57 = vrot.slane %v1125_v53, 1  ;;  %v1258_v54 = vadd.f32 %v1257_v2, %v1256_v33 }
 0x171   :  { %v1259_v23 = vrot.slane %v1258_v54, 1  ;;  %v1127_v38 = vadd.f32 %v1126_v57, %v1125_v53 }
 0x173   :  { %v1260_v40 = vadd.f32 %v1259_v23, %v1258_v54 }
 0x175   :  { %v1263_v41 = vcombine.low %v1127_v38, %v1260_v40 }
 0x177   :  { %v1270_v10 = vrot.slane %v1263_v41, %v1269_v63 }
 0x179   :  { %v1277_v22 = vrot.slane %v1270_v10, %v1269_v63 }
 0x17b   :  { %1283 = vst.msk [vmem:[%s2544_s5] sm:$0x3] %vm1281_vm0, %v1277_v22 }

</bundles_post_ra>
